<compile_context>
chip_gen: v7x
topology: tpu7x:2x2x1
jax: 0.10.0
libtpu: 0.0.40
codegen_flags: <defaults>
</compile_context>

<pallas_src>
import functools

import jax
import jax.numpy as jnp
from jax import lax
from jax.experimental import pallas as pl
from jax.experimental.pallas import tpu as pltpu


def _round_up(x, m):
    return (x + m - 1) // m * m


def _ln_relu_masked(h, g, b, cmask, inv_c, eps=1e-5):
    # PyTorch nn.LayerNorm: biased variance, eps inside the sqrt.  Statistics are
    # taken over the true Cq lanes only (cmask); padded lanes carry g = b = 0 so
    # they come out exactly 0 after the affine + ReLU.
    mu = jnp.sum(h * cmask, axis=-1, keepdims=True) * inv_c
    d = (h - mu) * cmask
    var = jnp.sum(d * d, axis=-1, keepdims=True) * inv_c
    hn = (h - mu) * lax.rsqrt(var + eps)
    return jnp.maximum(hn * g + b, 0.0)


def can_kernel(xp_ref, yp_ref,
               wl_ref, wr_ref, wq_ref, wk_ref,
               lnp_ref,
               a1_ref, a2_ref,
               *, n_tokens, cq):
    n_pad = a1_ref.shape[1]
    c_pad = lnp_ref.shape[1]
    inv_c = 1.0 / cq

    lnp = lnp_ref[...]                       # (8, C_pad): gl, bl, gr, br, gq, bq, gk, bk
    gl, bl = lnp[0:1, :], lnp[1:2, :]
    gr, br = lnp[2:3, :], lnp[3:4, :]
    gq, bq = lnp[4:5, :], lnp[5:6, :]
    gk, bk = lnp[6:7, :], lnp[7:8, :]

    # Lane mask over the true Cq channels (needed so padded lanes don't pollute
    # the LayerNorm variance).
    lane = lax.broadcasted_iota(jnp.int32, (1, c_pad), 1)
    cmask = (lane < cq).astype(jnp.float32)

    # --- projection stage: bf16 MXU matmuls, f32 LayerNorm / ReLU ------------
    xp = xp_ref[0]                           # (N_pad, P_pad) bf16
    yp = yp_ref[0]
    x = jnp.dot(xp, wl_ref[...], preferred_element_type=jnp.float32)
    x = _ln_relu_masked(x, gl, bl, cmask, inv_c)
    y = jnp.dot(yp, wr_ref[...], preferred_element_type=jnp.float32)
    y = _ln_relu_masked(y, gr, br, cmask, inv_c)

    q = _ln_relu_masked(
        jnp.dot(x.astype(jnp.bfloat16), wq_ref[...],
                preferred_element_type=jnp.float32),
        gq, bq, cmask, inv_c)
    k = _ln_relu_masked(
        jnp.dot(y.astype(jnp.bfloat16), wk_ref[...],
                preferred_element_type=jnp.float32),
        gk, bk, cmask, inv_c)

    # --- attention scores: ONE matmul, contracting last dims (no explicit .T) -
    s1 = lax.dot_general(q.astype(jnp.bfloat16), k.astype(jnp.bfloat16),
                         (((1,), (1,)), ((), ())),
                         preferred_element_type=jnp.float32)   # (N_pad, N_pad)

    if n_tokens < n_pad:
        rid = lax.broadcasted_iota(jnp.int32, (n_pad, n_pad), 0)
        cid = lax.broadcasted_iota(jnp.int32, (n_pad, n_pad), 1)
        valid = (rid < n_tokens) & (cid < n_tokens)   # symmetric under transpose
        s1 = jnp.where(valid, s1, -1e30)

    def _softmax_rows(s):
        e = jnp.exp(s - jnp.max(s, axis=-1, keepdims=True))
        inv = pl.reciprocal(jnp.sum(e, axis=-1, keepdims=True), approx=True)
        return e * inv

    # attn1_ = softmax(q k^T); attn2_ = softmax(k q^T) and k q^T = (q k^T)^T,
    # so reuse s1 via an XLU transpose instead of a second N*N*Cq MXU matmul.
    a1_ref[0] = _softmax_rows(s1)
    a2_ref[0] = _softmax_rows(s1.T)


def extract_patches(x, K=4):
    # NCHW -> (B, N, C*K*K), patch features in (c, kh, kw) order
    B, C, H, W = x.shape
    x = x.reshape(B, C, H // K, K, W // K, K)
    x = x.transpose(0, 2, 4, 1, 3, 5)        # B, H/K, W/K, C, K, K
    return x.reshape(B, (H // K) * (W // K), C * K * K)


def cross_attention_visattn(left, right, params):
    B, C, H, W = left.shape
    K = 4
    N = (H // K) * (W // K)
    P = C * K * K
    Cq = params["wl"].shape[1]

    # Pad to lane-dense / MXU-friendly sizes (multiples of 128).
    N_pad = _round_up(N, 128)
    P_pad = _round_up(P, 128)
    C_pad = _round_up(Cq, 128)

    xp = extract_patches(left, K)
    yp = extract_patches(right, K)
    xp = jnp.pad(xp, ((0, 0), (0, N_pad - N), (0, P_pad - P))).astype(jnp.bfloat16)
    yp = jnp.pad(yp, ((0, 0), (0, N_pad - N), (0, P_pad - P))).astype(jnp.bfloat16)

    wl = jnp.pad(params["wl"], ((0, P_pad - P), (0, C_pad - Cq))).astype(jnp.bfloat16)
    wr = jnp.pad(params["wr"], ((0, P_pad - P), (0, C_pad - Cq))).astype(jnp.bfloat16)
    wq = jnp.pad(params["wq"], ((0, C_pad - Cq), (0, C_pad - Cq))).astype(jnp.bfloat16)
    wk = jnp.pad(params["wk"], ((0, C_pad - Cq), (0, C_pad - Cq))).astype(jnp.bfloat16)

    # Pack the eight LayerNorm gamma/beta vectors into one (8, C_pad) f32 array.
    lnp = jnp.concatenate([params["gl"], params["bl"], params["gr"], params["br"],
                           params["gq"], params["bq"], params["gk"], params["bk"]],
                          axis=0)                           # (8, Cq)
    lnp = jnp.pad(lnp, ((0, 0), (0, C_pad - Cq)))           # padded g = b = 0

    tok_spec = pl.BlockSpec((1, N_pad, P_pad), lambda b: (b, 0, 0))
    out_spec = pl.BlockSpec((1, N_pad, N_pad), lambda b: (b, 0, 0))
    wpat_spec = pl.BlockSpec((P_pad, C_pad), lambda b: (0, 0))
    wqk_spec = pl.BlockSpec((C_pad, C_pad), lambda b: (0, 0))
    ln_spec = pl.BlockSpec((8, C_pad), lambda b: (0, 0))

    grid_spec = pltpu.PrefetchScalarGridSpec(
        num_scalar_prefetch=0,
        grid=(B,),
        in_specs=[tok_spec, tok_spec,
                  wpat_spec, wpat_spec, wqk_spec, wqk_spec,
                  ln_spec],
        out_specs=[out_spec, out_spec],
    )

    kernel = functools.partial(can_kernel, n_tokens=N, cq=Cq)
    a1, a2 = pl.pallas_call(
        kernel,
        out_shape=(jax.ShapeDtypeStruct((B, N_pad, N_pad), jnp.float32),
                   jax.ShapeDtypeStruct((B, N_pad, N_pad), jnp.float32)),
        grid_spec=grid_spec,
        compiler_params=pltpu.CompilerParams(
            dimension_semantics=("parallel",)),
    )(xp, yp, wl, wr, wq, wk, lnp)

    return a1[:, :N, :N], a2[:, :N, :N]


def reference(left, right, params):
    # pure-JAX (f32) reference of the same forward pass
    xp = extract_patches(left)
    yp = extract_patches(right)

    def ln_relu(h, g, b):
        mu = jnp.mean(h, axis=-1, keepdims=True)
        var = jnp.mean((h - mu) ** 2, axis=-1, keepdims=True)
        return jnp.maximum((h - mu) / jnp.sqrt(var + 1e-5) * g + b, 0.0)

    x = ln_relu(xp @ params["wl"], params["gl"], params["bl"])
    y = ln_relu(yp @ params["wr"], params["gr"], params["br"])
    q = ln_relu(x @ params["wq"], params["gq"], params["bq"])
    k = ln_relu(y @ params["wk"], params["gk"], params["bk"])
    a1 = jax.nn.softmax(jnp.einsum("bnd,bmd->bnm", q, k), axis=-1)
    a2 = jax.nn.softmax(jnp.einsum("bnd,bmd->bnm", k, q), axis=-1)
    return a1, a2


def init_params(key, in_channels, qkv_channels):
    K = 4
    P = in_channels * K * K
    ks = jax.random.split(key, 4)
    scale_patch = 1.0 / jnp.sqrt(P)
    scale_lin = 1.0 / jnp.sqrt(qkv_channels)
    # Conv2d weights (Cq, C, 4, 4) flattened to (C*16, Cq) for direct matmul.
    wl = jax.random.normal(ks[0], (P, qkv_channels), jnp.float32) * scale_patch
    wr = jax.random.normal(ks[1], (P, qkv_channels), jnp.float32) * scale_patch
    wq = jax.random.normal(ks[2], (qkv_channels, qkv_channels), jnp.float32) * scale_lin
    wk = jax.random.normal(ks[3], (qkv_channels, qkv_channels), jnp.float32) * scale_lin
    ones = jnp.ones((1, qkv_channels), jnp.float32)
    zeros = jnp.zeros((1, qkv_channels), jnp.float32)
    return dict(wl=wl, wr=wr, wq=wq, wk=wk,
                gl=ones, bl=zeros, gr=ones, br=zeros,
                gq=ones, bq=zeros, gk=ones, bk=zeros)


if __name__ == "__main__":
    B, C, H, W = 2, 4, 16, 16         # -> N = 16 tokens per image
    Cq = 32
    key = jax.random.PRNGKey(0)
    k_left, k_right, k_param = jax.random.split(key, 3)
    left = jax.random.normal(k_left, (B, C, H, W), jnp.float32)
    right = jax.random.normal(k_right, (B, C, H, W), jnp.float32)
    params = init_params(k_param, C, Cq)

    a1, a2 = cross_attention_visattn(left, right, params)
    jax.block_until_ready((a1, a2))

    r1, r2 = reference(left, right, params)
    assert a1.shape == (B, 16, 16) and a2.shape == (B, 16, 16)
    # bf16 matmuls + approx reciprocal -> slightly looser tolerance than pure f32
    assert jnp.allclose(a1, r1, atol=3e-2, rtol=3e-2)
    assert jnp.allclose(a2, r2, atol=3e-2, rtol=3e-2)
    # softmax rows must still sum to 1
    assert jnp.allclose(jnp.sum(a1, axis=-1), 1.0, atol=1e-2)
    assert jnp.allclose(jnp.sum(a2, axis=-1), 1.0, atol=1e-2)
    print("KERNEL_OK")
</pallas_src>

<mosaic_0001>
module attributes {stable_mosaic.version = 11 : i64} {
  func.func @can_kernel(%arg0: i32, %arg1: memref<1x128x128xbf16, #tpu.memory_space<vmem>>, %arg2: memref<1x128x128xbf16, #tpu.memory_space<vmem>>, %arg3: memref<128x128xbf16, #tpu.memory_space<vmem>>, %arg4: memref<128x128xbf16, #tpu.memory_space<vmem>>, %arg5: memref<128x128xbf16, #tpu.memory_space<vmem>>, %arg6: memref<128x128xbf16, #tpu.memory_space<vmem>>, %arg7: memref<8x128xf32, #tpu.memory_space<vmem>>, %arg8: memref<1x128x128xf32, #tpu.memory_space<vmem>>, %arg9: memref<1x128x128xf32, #tpu.memory_space<vmem>>) attributes {dimension_semantics = [#tpu.dimension_semantics<parallel>], iteration_bounds = array<i64: 2>, scalar_prefetch = 0 : i64, scratch_operands = 0 : i64, tpu.core_type = #tpu.core_type<tc>, window_params = [{transform_indices = @transform_0, window_bounds = array<i64: 1, 128, 128>}, {transform_indices = @transform_1, window_bounds = array<i64: 1, 128, 128>}, {pipeline_mode = #tpu.pipeline_mode<synchronous>, transform_indices = @transform_2, window_bounds = array<i64: 128, 128>}, {pipeline_mode = #tpu.pipeline_mode<synchronous>, transform_indices = @transform_3, window_bounds = array<i64: 128, 128>}, {pipeline_mode = #tpu.pipeline_mode<synchronous>, transform_indices = @transform_4, window_bounds = array<i64: 128, 128>}, {pipeline_mode = #tpu.pipeline_mode<synchronous>, transform_indices = @transform_5, window_bounds = array<i64: 128, 128>}, {pipeline_mode = #tpu.pipeline_mode<synchronous>, transform_indices = @transform_6, window_bounds = array<i64: 8, 128>}, {transform_indices = @transform_7, window_bounds = array<i64: 1, 128, 128>}, {transform_indices = @transform_8, window_bounds = array<i64: 1, 128, 128>}]} {
    %c0 = arith.constant 0 : index
    %c0_0 = arith.constant 0 : index
    %0 = vector.load %arg7[%c0, %c0_0] : memref<8x128xf32, #tpu.memory_space<vmem>>, vector<8x128xf32>
    %1 = vector.extract_strided_slice %0 {offsets = [0, 0], sizes = [1, 128], strides = [1, 1]} : vector<8x128xf32> to vector<1x128xf32>
    %2 = vector.extract_strided_slice %0 {offsets = [1, 0], sizes = [1, 128], strides = [1, 1]} : vector<8x128xf32> to vector<1x128xf32>
    %3 = vector.extract_strided_slice %0 {offsets = [2, 0], sizes = [1, 128], strides = [1, 1]} : vector<8x128xf32> to vector<1x128xf32>
    %4 = vector.extract_strided_slice %0 {offsets = [3, 0], sizes = [1, 128], strides = [1, 1]} : vector<8x128xf32> to vector<1x128xf32>
    %5 = vector.extract_strided_slice %0 {offsets = [4, 0], sizes = [1, 128], strides = [1, 1]} : vector<8x128xf32> to vector<1x128xf32>
    %6 = vector.extract_strided_slice %0 {offsets = [5, 0], sizes = [1, 128], strides = [1, 1]} : vector<8x128xf32> to vector<1x128xf32>
    %7 = vector.extract_strided_slice %0 {offsets = [6, 0], sizes = [1, 128], strides = [1, 1]} : vector<8x128xf32> to vector<1x128xf32>
    %8 = vector.extract_strided_slice %0 {offsets = [7, 0], sizes = [1, 128], strides = [1, 1]} : vector<8x128xf32> to vector<1x128xf32>
    %9 = tpu.iota {dimensions = array<i32: 1>} : vector<1x128xi32>
    %c32_i32 = arith.constant 32 : i32
    %10 = vector.broadcast %c32_i32 : i32 to vector<1x128xi32>
    %11 = arith.cmpi slt, %9, %10 : vector<1x128xi32>
    %12 = arith.extui %11 : vector<1x128xi1> to vector<1x128xi32>
    %13 = arith.sitofp %12 : vector<1x128xi32> to vector<1x128xf32>
    %c0_1 = arith.constant 0 : index
    %c0_2 = arith.constant 0 : index
    %c0_3 = arith.constant 0 : index
    %14 = vector.load %arg1[%c0_1, %c0_2, %c0_3] : memref<1x128x128xbf16, #tpu.memory_space<vmem>>, vector<1x128x128xbf16>
    %15 = vector.shape_cast %14 : vector<1x128x128xbf16> to vector<128x128xbf16>
    %c0_4 = arith.constant 0 : index
    %c0_5 = arith.constant 0 : index
    %c0_6 = arith.constant 0 : index
    %16 = vector.load %arg2[%c0_4, %c0_5, %c0_6] : memref<1x128x128xbf16, #tpu.memory_space<vmem>>, vector<1x128x128xbf16>
    %17 = vector.shape_cast %16 : vector<1x128x128xbf16> to vector<128x128xbf16>
    %c0_7 = arith.constant 0 : index
    %c0_8 = arith.constant 0 : index
    %18 = vector.load %arg3[%c0_7, %c0_8] : memref<128x128xbf16, #tpu.memory_space<vmem>>, vector<128x128xbf16>
    %cst = arith.constant dense<0.000000e+00> : vector<128x128xf32>
    %19 = tpu.matmul %15, %18, %cst {dimension_numbers = #tpu.dot_dimension_numbers<[1], [0], [0], [1], [0, 0, 1, 1], [], []>} : vector<128x128xbf16>, vector<128x128xbf16>, vector<128x128xf32> -> vector<128x128xf32>
    %20 = vector.broadcast %13 : vector<1x128xf32> to vector<128x128xf32>
    %21 = arith.mulf %19, %20 : vector<128x128xf32>
    %cst_9 = arith.constant dense<0.000000e+00> : vector<128xf32>
    %22 = vector.multi_reduction <add>, %21, %cst_9 [1] : vector<128x128xf32> to vector<128xf32>
    %23 = vector.shape_cast %22 : vector<128xf32> to vector<128x1xf32>
    %cst_10 = arith.constant 3.125000e-02 : f32
    %24 = vector.broadcast %cst_10 : f32 to vector<128x1xf32>
    %25 = arith.mulf %23, %24 : vector<128x1xf32>
    %26 = vector.broadcast %25 : vector<128x1xf32> to vector<128x128xf32>
    %27 = arith.subf %19, %26 : vector<128x128xf32>
    %28 = vector.broadcast %13 : vector<1x128xf32> to vector<128x128xf32>
    %29 = arith.mulf %27, %28 : vector<128x128xf32>
    %30 = arith.mulf %29, %29 : vector<128x128xf32>
    %cst_11 = arith.constant dense<0.000000e+00> : vector<128xf32>
    %31 = vector.multi_reduction <add>, %30, %cst_11 [1] : vector<128x128xf32> to vector<128xf32>
    %32 = vector.shape_cast %31 : vector<128xf32> to vector<128x1xf32>
    %cst_12 = arith.constant 3.125000e-02 : f32
    %33 = vector.broadcast %cst_12 : f32 to vector<128x1xf32>
    %34 = arith.mulf %32, %33 : vector<128x1xf32>
    %35 = vector.broadcast %25 : vector<128x1xf32> to vector<128x128xf32>
    %36 = arith.subf %19, %35 : vector<128x128xf32>
    %cst_13 = arith.constant 9.99999974E-6 : f32
    %37 = vector.broadcast %cst_13 : f32 to vector<128x1xf32>
    %38 = arith.addf %34, %37 : vector<128x1xf32>
    %39 = math.rsqrt %38 : vector<128x1xf32>
    %40 = vector.broadcast %39 : vector<128x1xf32> to vector<128x128xf32>
    %41 = arith.mulf %36, %40 : vector<128x128xf32>
    %42 = vector.broadcast %1 : vector<1x128xf32> to vector<128x128xf32>
    %43 = arith.mulf %41, %42 : vector<128x128xf32>
    %44 = vector.broadcast %2 : vector<1x128xf32> to vector<128x128xf32>
    %45 = arith.addf %43, %44 : vector<128x128xf32>
    %cst_14 = arith.constant 0.000000e+00 : f32
    %46 = vector.broadcast %cst_14 : f32 to vector<128x128xf32>
    %47 = arith.maximumf %45, %46 : vector<128x128xf32>
    %c0_15 = arith.constant 0 : index
    %c0_16 = arith.constant 0 : index
    %48 = vector.load %arg4[%c0_15, %c0_16] : memref<128x128xbf16, #tpu.memory_space<vmem>>, vector<128x128xbf16>
    %cst_17 = arith.constant dense<0.000000e+00> : vector<128x128xf32>
    %49 = tpu.matmul %17, %48, %cst_17 {dimension_numbers = #tpu.dot_dimension_numbers<[1], [0], [0], [1], [0, 0, 1, 1], [], []>} : vector<128x128xbf16>, vector<128x128xbf16>, vector<128x128xf32> -> vector<128x128xf32>
    %50 = vector.broadcast %13 : vector<1x128xf32> to vector<128x128xf32>
    %51 = arith.mulf %49, %50 : vector<128x128xf32>
    %cst_18 = arith.constant dense<0.000000e+00> : vector<128xf32>
    %52 = vector.multi_reduction <add>, %51, %cst_18 [1] : vector<128x128xf32> to vector<128xf32>
    %53 = vector.shape_cast %52 : vector<128xf32> to vector<128x1xf32>
    %cst_19 = arith.constant 3.125000e-02 : f32
    %54 = vector.broadcast %cst_19 : f32 to vector<128x1xf32>
    %55 = arith.mulf %53, %54 : vector<128x1xf32>
    %56 = vector.broadcast %55 : vector<128x1xf32> to vector<128x128xf32>
    %57 = arith.subf %49, %56 : vector<128x128xf32>
    %58 = vector.broadcast %13 : vector<1x128xf32> to vector<128x128xf32>
    %59 = arith.mulf %57, %58 : vector<128x128xf32>
    %60 = arith.mulf %59, %59 : vector<128x128xf32>
    %cst_20 = arith.constant dense<0.000000e+00> : vector<128xf32>
    %61 = vector.multi_reduction <add>, %60, %cst_20 [1] : vector<128x128xf32> to vector<128xf32>
    %62 = vector.shape_cast %61 : vector<128xf32> to vector<128x1xf32>
    %cst_21 = arith.constant 3.125000e-02 : f32
    %63 = vector.broadcast %cst_21 : f32 to vector<128x1xf32>
    %64 = arith.mulf %62, %63 : vector<128x1xf32>
    %65 = vector.broadcast %55 : vector<128x1xf32> to vector<128x128xf32>
    %66 = arith.subf %49, %65 : vector<128x128xf32>
    %cst_22 = arith.constant 9.99999974E-6 : f32
    %67 = vector.broadcast %cst_22 : f32 to vector<128x1xf32>
    %68 = arith.addf %64, %67 : vector<128x1xf32>
    %69 = math.rsqrt %68 : vector<128x1xf32>
    %70 = vector.broadcast %69 : vector<128x1xf32> to vector<128x128xf32>
    %71 = arith.mulf %66, %70 : vector<128x128xf32>
    %72 = vector.broadcast %3 : vector<1x128xf32> to vector<128x128xf32>
    %73 = arith.mulf %71, %72 : vector<128x128xf32>
    %74 = vector.broadcast %4 : vector<1x128xf32> to vector<128x128xf32>
    %75 = arith.addf %73, %74 : vector<128x128xf32>
    %cst_23 = arith.constant 0.000000e+00 : f32
    %76 = vector.broadcast %cst_23 : f32 to vector<128x128xf32>
    %77 = arith.maximumf %75, %76 : vector<128x128xf32>
    %78 = arith.truncf %47 : vector<128x128xf32> to vector<128x128xbf16>
    %c0_24 = arith.constant 0 : index
    %c0_25 = arith.constant 0 : index
    %79 = vector.load %arg5[%c0_24, %c0_25] : memref<128x128xbf16, #tpu.memory_space<vmem>>, vector<128x128xbf16>
    %cst_26 = arith.constant dense<0.000000e+00> : vector<128x128xf32>
    %80 = tpu.matmul %78, %79, %cst_26 {dimension_numbers = #tpu.dot_dimension_numbers<[1], [0], [0], [1], [0, 0, 1, 1], [], []>} : vector<128x128xbf16>, vector<128x128xbf16>, vector<128x128xf32> -> vector<128x128xf32>
    %81 = vector.broadcast %13 : vector<1x128xf32> to vector<128x128xf32>
    %82 = arith.mulf %80, %81 : vector<128x128xf32>
    %cst_27 = arith.constant dense<0.000000e+00> : vector<128xf32>
    %83 = vector.multi_reduction <add>, %82, %cst_27 [1] : vector<128x128xf32> to vector<128xf32>
    %84 = vector.shape_cast %83 : vector<128xf32> to vector<128x1xf32>
    %cst_28 = arith.constant 3.125000e-02 : f32
    %85 = vector.broadcast %cst_28 : f32 to vector<128x1xf32>
    %86 = arith.mulf %84, %85 : vector<128x1xf32>
    %87 = vector.broadcast %86 : vector<128x1xf32> to vector<128x128xf32>
    %88 = arith.subf %80, %87 : vector<128x128xf32>
    %89 = vector.broadcast %13 : vector<1x128xf32> to vector<128x128xf32>
    %90 = arith.mulf %88, %89 : vector<128x128xf32>
    %91 = arith.mulf %90, %90 : vector<128x128xf32>
    %cst_29 = arith.constant dense<0.000000e+00> : vector<128xf32>
    %92 = vector.multi_reduction <add>, %91, %cst_29 [1] : vector<128x128xf32> to vector<128xf32>
    %93 = vector.shape_cast %92 : vector<128xf32> to vector<128x1xf32>
    %cst_30 = arith.constant 3.125000e-02 : f32
    %94 = vector.broadcast %cst_30 : f32 to vector<128x1xf32>
    %95 = arith.mulf %93, %94 : vector<128x1xf32>
    %96 = vector.broadcast %86 : vector<128x1xf32> to vector<128x128xf32>
    %97 = arith.subf %80, %96 : vector<128x128xf32>
    %cst_31 = arith.constant 9.99999974E-6 : f32
    %98 = vector.broadcast %cst_31 : f32 to vector<128x1xf32>
    %99 = arith.addf %95, %98 : vector<128x1xf32>
    %100 = math.rsqrt %99 : vector<128x1xf32>
    %101 = vector.broadcast %100 : vector<128x1xf32> to vector<128x128xf32>
    %102 = arith.mulf %97, %101 : vector<128x128xf32>
    %103 = vector.broadcast %5 : vector<1x128xf32> to vector<128x128xf32>
    %104 = arith.mulf %102, %103 : vector<128x128xf32>
    %105 = vector.broadcast %6 : vector<1x128xf32> to vector<128x128xf32>
    %106 = arith.addf %104, %105 : vector<128x128xf32>
    %cst_32 = arith.constant 0.000000e+00 : f32
    %107 = vector.broadcast %cst_32 : f32 to vector<128x128xf32>
    %108 = arith.maximumf %106, %107 : vector<128x128xf32>
    %109 = arith.truncf %77 : vector<128x128xf32> to vector<128x128xbf16>
    %c0_33 = arith.constant 0 : index
    %c0_34 = arith.constant 0 : index
    %110 = vector.load %arg6[%c0_33, %c0_34] : memref<128x128xbf16, #tpu.memory_space<vmem>>, vector<128x128xbf16>
    %cst_35 = arith.constant dense<0.000000e+00> : vector<128x128xf32>
    %111 = tpu.matmul %109, %110, %cst_35 {dimension_numbers = #tpu.dot_dimension_numbers<[1], [0], [0], [1], [0, 0, 1, 1], [], []>} : vector<128x128xbf16>, vector<128x128xbf16>, vector<128x128xf32> -> vector<128x128xf32>
    %112 = vector.broadcast %13 : vector<1x128xf32> to vector<128x128xf32>
    %113 = arith.mulf %111, %112 : vector<128x128xf32>
    %cst_36 = arith.constant dense<0.000000e+00> : vector<128xf32>
    %114 = vector.multi_reduction <add>, %113, %cst_36 [1] : vector<128x128xf32> to vector<128xf32>
    %115 = vector.shape_cast %114 : vector<128xf32> to vector<128x1xf32>
    %cst_37 = arith.constant 3.125000e-02 : f32
    %116 = vector.broadcast %cst_37 : f32 to vector<128x1xf32>
    %117 = arith.mulf %115, %116 : vector<128x1xf32>
    %118 = vector.broadcast %117 : vector<128x1xf32> to vector<128x128xf32>
    %119 = arith.subf %111, %118 : vector<128x128xf32>
    %120 = vector.broadcast %13 : vector<1x128xf32> to vector<128x128xf32>
    %121 = arith.mulf %119, %120 : vector<128x128xf32>
    %122 = arith.mulf %121, %121 : vector<128x128xf32>
    %cst_38 = arith.constant dense<0.000000e+00> : vector<128xf32>
    %123 = vector.multi_reduction <add>, %122, %cst_38 [1] : vector<128x128xf32> to vector<128xf32>
    %124 = vector.shape_cast %123 : vector<128xf32> to vector<128x1xf32>
    %cst_39 = arith.constant 3.125000e-02 : f32
    %125 = vector.broadcast %cst_39 : f32 to vector<128x1xf32>
    %126 = arith.mulf %124, %125 : vector<128x1xf32>
    %127 = vector.broadcast %117 : vector<128x1xf32> to vector<128x128xf32>
    %128 = arith.subf %111, %127 : vector<128x128xf32>
    %cst_40 = arith.constant 9.99999974E-6 : f32
    %129 = vector.broadcast %cst_40 : f32 to vector<128x1xf32>
    %130 = arith.addf %126, %129 : vector<128x1xf32>
    %131 = math.rsqrt %130 : vector<128x1xf32>
    %132 = vector.broadcast %131 : vector<128x1xf32> to vector<128x128xf32>
    %133 = arith.mulf %128, %132 : vector<128x128xf32>
    %134 = vector.broadcast %7 : vector<1x128xf32> to vector<128x128xf32>
    %135 = arith.mulf %133, %134 : vector<128x128xf32>
    %136 = vector.broadcast %8 : vector<1x128xf32> to vector<128x128xf32>
    %137 = arith.addf %135, %136 : vector<128x128xf32>
    %cst_41 = arith.constant 0.000000e+00 : f32
    %138 = vector.broadcast %cst_41 : f32 to vector<128x128xf32>
    %139 = arith.maximumf %137, %138 : vector<128x128xf32>
    %140 = arith.truncf %108 : vector<128x128xf32> to vector<128x128xbf16>
    %141 = arith.truncf %139 : vector<128x128xf32> to vector<128x128xbf16>
    %cst_42 = arith.constant dense<0.000000e+00> : vector<128x128xf32>
    %142 = tpu.matmul %140, %141, %cst_42 {dimension_numbers = #tpu.dot_dimension_numbers<[1], [1], [0], [0], [0, 0, 1, 0], [], []>} : vector<128x128xbf16>, vector<128x128xbf16>, vector<128x128xf32> -> vector<128x128xf32>
    %143 = tpu.iota {dimensions = array<i32: 0>} : vector<128x128xi32>
    %144 = tpu.iota {dimensions = array<i32: 1>} : vector<128x128xi32>
    %c16_i32 = arith.constant 16 : i32
    %145 = vector.broadcast %c16_i32 : i32 to vector<128x128xi32>
    %146 = arith.cmpi slt, %143, %145 : vector<128x128xi32>
    %c16_i32_43 = arith.constant 16 : i32
    %147 = vector.broadcast %c16_i32_43 : i32 to vector<128x128xi32>
    %148 = arith.cmpi slt, %144, %147 : vector<128x128xi32>
    %149 = arith.andi %146, %148 : vector<128x128xi1>
    %cst_44 = arith.constant -1.000000e+30 : f32
    %150 = vector.broadcast %cst_44 : f32 to vector<128x128xf32>
    %151 = arith.select %149, %142, %150 : vector<128x128xi1>, vector<128x128xf32>
    %cst_45 = arith.constant dense<0xFF800000> : vector<128xf32>
    %152 = vector.multi_reduction <maximumf>, %151, %cst_45 [1] : vector<128x128xf32> to vector<128xf32>
    %153 = vector.shape_cast %152 : vector<128xf32> to vector<128x1xf32>
    %154 = vector.broadcast %153 : vector<128x1xf32> to vector<128x128xf32>
    %155 = arith.subf %151, %154 : vector<128x128xf32>
    %156 = math.exp %155 : vector<128x128xf32>
    %cst_46 = arith.constant dense<0.000000e+00> : vector<128xf32>
    %157 = vector.multi_reduction <add>, %156, %cst_46 [1] : vector<128x128xf32> to vector<128xf32>
    %158 = vector.shape_cast %157 : vector<128xf32> to vector<128x1xf32>
    %159 = tpu.reciprocal %158 {approx = true} : vector<128x1xf32> -> vector<128x1xf32>
    %160 = vector.broadcast %159 : vector<128x1xf32> to vector<128x128xf32>
    %161 = arith.mulf %156, %160 : vector<128x128xf32>
    %c0_47 = arith.constant 0 : index
    %c0_48 = arith.constant 0 : index
    %c0_49 = arith.constant 0 : index
    %162 = vector.load %arg8[%c0_47, %c0_48, %c0_49] : memref<1x128x128xf32, #tpu.memory_space<vmem>>, vector<1x128x128xf32>
    %163 = vector.shape_cast %162 : vector<1x128x128xf32> to vector<128x128xf32>
    %164 = vector.shape_cast %161 : vector<128x128xf32> to vector<1x128x128xf32>
    tpu.vector_store %arg8[%c0_47, %c0_48, %c0_49], %164 {strides = array<i32>} : memref<1x128x128xf32, #tpu.memory_space<vmem>>, vector<1x128x128xf32>,
    %165 = tpu.transpose %151, [1, 0] : vector<128x128xf32> -> vector<128x128xf32>
    %cst_50 = arith.constant dense<0xFF800000> : vector<128xf32>
    %166 = vector.multi_reduction <maximumf>, %165, %cst_50 [1] : vector<128x128xf32> to vector<128xf32>
    %167 = vector.shape_cast %166 : vector<128xf32> to vector<128x1xf32>
    %168 = vector.broadcast %167 : vector<128x1xf32> to vector<128x128xf32>
    %169 = arith.subf %165, %168 : vector<128x128xf32>
    %170 = math.exp %169 : vector<128x128xf32>
    %cst_51 = arith.constant dense<0.000000e+00> : vector<128xf32>
    %171 = vector.multi_reduction <add>, %170, %cst_51 [1] : vector<128x128xf32> to vector<128xf32>
    %172 = vector.shape_cast %171 : vector<128xf32> to vector<128x1xf32>
    %173 = tpu.reciprocal %172 {approx = true} : vector<128x1xf32> -> vector<128x1xf32>
    %174 = vector.broadcast %173 : vector<128x1xf32> to vector<128x128xf32>
    %175 = arith.mulf %170, %174 : vector<128x128xf32>
    %c0_52 = arith.constant 0 : index
    %c0_53 = arith.constant 0 : index
    %c0_54 = arith.constant 0 : index
    %176 = vector.load %arg9[%c0_52, %c0_53, %c0_54] : memref<1x128x128xf32, #tpu.memory_space<vmem>>, vector<1x128x128xf32>
    %177 = vector.shape_cast %176 : vector<1x128x128xf32> to vector<128x128xf32>
    %178 = vector.shape_cast %175 : vector<128x128xf32> to vector<1x128x128xf32>
    tpu.vector_store %arg9[%c0_52, %c0_53, %c0_54], %178 {strides = array<i32>} : memref<1x128x128xf32, #tpu.memory_space<vmem>>, vector<1x128x128xf32>,
    return
  }
  func.func @transform_0(%arg0: i32) -> (i32, i32, i32) {
    %c0_i32 = arith.constant 0 : i32
    %c0_i32_0 = arith.constant 0 : i32
    %c0_i32_1 = arith.constant 0 : i32
    return %arg0, %c0_i32, %c0_i32_0 : i32, i32, i32
  }
  func.func @transform_1(%arg0: i32) -> (i32, i32, i32) {
    %c0_i32 = arith.constant 0 : i32
    %c0_i32_0 = arith.constant 0 : i32
    %c0_i32_1 = arith.constant 0 : i32
    return %arg0, %c0_i32, %c0_i32_0 : i32, i32, i32
  }
  func.func @transform_2(%arg0: i32) -> (i32, i32) {
    %c0_i32 = arith.constant 0 : i32
    %c0_i32_0 = arith.constant 0 : i32
    %c0_i32_1 = arith.constant 0 : i32
    return %c0_i32, %c0_i32_0 : i32, i32
  }
  func.func @transform_3(%arg0: i32) -> (i32, i32) {
    %c0_i32 = arith.constant 0 : i32
    %c0_i32_0 = arith.constant 0 : i32
    %c0_i32_1 = arith.constant 0 : i32
    return %c0_i32, %c0_i32_0 : i32, i32
  }
  func.func @transform_4(%arg0: i32) -> (i32, i32) {
    %c0_i32 = arith.constant 0 : i32
    %c0_i32_0 = arith.constant 0 : i32
    %c0_i32_1 = arith.constant 0 : i32
    return %c0_i32, %c0_i32_0 : i32, i32
  }
  func.func @transform_5(%arg0: i32) -> (i32, i32) {
    %c0_i32 = arith.constant 0 : i32
    %c0_i32_0 = arith.constant 0 : i32
    %c0_i32_1 = arith.constant 0 : i32
    return %c0_i32, %c0_i32_0 : i32, i32
  }
  func.func @transform_6(%arg0: i32) -> (i32, i32) {
    %c0_i32 = arith.constant 0 : i32
    %c0_i32_0 = arith.constant 0 : i32
    %c0_i32_1 = arith.constant 0 : i32
    return %c0_i32, %c0_i32_0 : i32, i32
  }
  func.func @transform_7(%arg0: i32) -> (i32, i32, i32) {
    %c0_i32 = arith.constant 0 : i32
    %c0_i32_0 = arith.constant 0 : i32
    %c0_i32_1 = arith.constant 0 : i32
    return %arg0, %c0_i32, %c0_i32_0 : i32, i32, i32
  }
  func.func @transform_8(%arg0: i32) -> (i32, i32, i32) {
    %c0_i32 = arith.constant 0 : i32
    %c0_i32_0 = arith.constant 0 : i32
    %c0_i32_1 = arith.constant 0 : i32
    return %arg0, %c0_i32, %c0_i32_0 : i32, i32, i32
  }
}

</mosaic_0001>

<bundles_post_ra>
// kernel: tpu_custom_call.1
= control target key start
LH: loop header
LB: loop body
LE: loop exit
PB: predicated region body
PF: predicated region fallthrough
CT: control target
= control target key end

     0   :  { %s5549_s0 = inlined_call_operand.hbm [shape: bf16[2,128,128], index: 0, kind: input, shape index: {}]   ;;  %s5550_s1 = inlined_call_operand.hbm [shape: bf16[2,128,128], index: 1, kind: input, shape index: {}]   ;;  %s5551_s2 = inlined_call_operand.hbm [shape: bf16[128,128], index: 2, kind: input, shape index: {}]   ;;  %s5552_s3 = inlined_call_operand.hbm [shape: bf16[128,128], index: 3, kind: input, shape index: {}]   ;;  %s5553_s4 = inlined_call_operand.hbm [shape: bf16[128,128], index: 4, kind: input, shape index: {}]   ;;  %s5554_s5 = inlined_call_operand.hbm [shape: bf16[128,128], index: 5, kind: input, shape index: {}]   ;;  %s5555_s6 = inlined_call_operand.vmem [shape: f32[8,128], index: 6, kind: input, shape index: {}]   ;;  %s5556_s7 = inlined_call_operand.hbm [shape: f32[2,128,128], index: 7, kind: output, shape index: {0}]   ;;  %s5557_s8 = inlined_call_operand.hbm [shape: f32[2,128,128], index: 8, kind: output, shape index: {1}]  }
   0x1   :  { %5567 = sst [smem:[#allocation25_spill]] %s5549_s0 }
   0x2   :  { %5568 = sst [smem:[#allocation26_spill]] %s5551_s2 }
   0x3   :  { %5569 = sst [smem:[#allocation27_spill]] %s5552_s3 }
   0x4   :  { %14 = vsyncpa [#allocation3], 0 }
   0x5   :  { %16 = vsyncpa [#allocation3 + $0x1], 0 }
   0x6   :  { %17 = vsyncpa [#allocation6], 0 }
   0x7   :  { %19 = vsyncpa [#allocation6 + $0x1], 0 }
   0x8   :  { %20 = vsyncpa [#allocation9], 0 }
   0x9   :  { %21 = vsyncpa [#allocation12], 0 }
   0xa   :  { %22 = vsyncpa [#allocation4], 0 }
   0xb   :  { %24 = vsyncpa [#allocation4 + $0x1], 0 }
   0xc   :  { %25 = vsyncpa [#allocation15], 0 }
   0xd   :  { %27 = vsyncpa [#allocation15 + $0x1], 0  ;;  %s4094_s27 = smov 0   ;;  %s4096_s28 = smov 0  }
   0xe   :  { %s4098_s29 = smov 0   ;;  %s4100_s30 = smov 0  }
   0xf LB: > { %5570 = sst [smem:[#allocation23_spill]] %s4021_s27  ;;  %s4115_s9 = sadd.s32 4294967295, %s4033_s30   ;;  %s4033_s30 = sphi %s4100_s30, %s5600_s30   ;;  %s4029_s29 = sphi %s4098_s29, %s5599_s29   ;;  %s4025_s28 = sphi %s4096_s28, %s5598_s28   ;;  %s4021_s27 = sphi %s4094_s27, %s5597_s27  }
  0x10   : > { %s3016_s10 = sadd.s32 4294967294, %s4033_s30   ;;  %p53_p0 = scmp.ne.s32.totalorder %s4025_s28, %s4021_s27 }
  0x11   : > { %p5558_p1 = scmp.eq.s32.totalorder %s4115_s9, 0  ;;  %p214_p3 = scmp.eq.s32.totalorder %s3016_s10, 1 }
  0x12   : > { %p3017_p5 = scmp.ge.s32.totalorder %s4033_s30, 1  ;;  %p247_p7 = scmp.lt.s32.totalorder %s4033_s30, 3 }
  0x13   : > { %p4124_p4 = por %p5558_p1, %p53_p0  ;;  %p4129_p6 = por %p214_p3, %p53_p0 }
  0x14   : > { %p4134_p8 = pnand %p3017_p5, %p247_p7  ;;  %s4035_s14 = smov [#allocation7]  }
  0x15   : > { %s5571_s11 = scalar_select %p4124_p4, 1, 0 }
  0x16   : > { %s5572_s12 = scalar_select %p4129_p6, 1, 0 }
  0x17   : > { %s5574_s13 = scalar_select %p4134_p8, 1, 0 }
  0x18   : > { %5573 = sst [smem:[#allocation24_spill]] %s5572_s12  ;;  %s259_s15 = sshll.u32 %s4035_s14, 4  ;;  %s4138_s15 = int_to_ptr.vmem [resolvable:$true] %s259_s15 }
  0x19   : > { %p3363_p9 = pneg %p4134_p8  ;;  %s4036_s17 = smov [#allocation8]  }
  0x1a   : > { %s272_s18 = sshll.u32 %s4036_s17, 4  ;;  %s4037_s19 = smov [#allocation10]   ;;  %s4149_s18 = int_to_ptr.vmem [resolvable:$true] %s272_s18 }
  0x1b   : > { %p4145_p11 = pnand %p3363_p9, %p5558_p1  ;;  %s4151_s20 = sshll.u32 %s4037_s19, 4  ;;  %s286_s20 = int_to_ptr.vmem [resolvable:$true] %s4151_s20 }
  0x1c   : > { %s5576_s2 = sld [smem:[#allocation26_spill]] }
  0x1d   : > { %p4161_p13 = pneg %p4145_p11 }
  0x22   : > { %s3747_s23 = scalar_lea.hbm %s5576_s2, 1024 }
  0x23   : > { %p3748_p12 = scmp.ne.s32.totalorder %s5576_s2, %s3747_s23  ;;  %p3754_p5 = scmp.lt.u32.totalorder %s3747_s23, %s5576_s2 }
  0x25   : > { %p3750_p0 = pnand %p4161_p13, %p3748_p12 }
  0x27   : > { %p3751_p3 = pneg %p3750_p0 }
  0x29   : > { %p3756_p7 = pnand %p3754_p5, %p3751_p3 }
  0x2b   : > { %3759 = shalt.err (!%p3756_p7)
}
  0x2c   : > { %s3760_s17 = scalar_lea.vmem %s4138_s15, 1024  ;;  %p3768_p2 = scmp.lt.s32.totalorder %s4138_s15, %s4138_s15 }
  0x2d   : > { %p3761_p9 = scmp.ne.s32.totalorder %s4138_s15, %s3760_s17  ;;  %p3769_p6 = scmp.lt.s32.totalorder %s3760_s17, %s3760_s17 }
  0x2f   : > { %p3763_p10 = pnand %p3761_p9, %p4161_p13  ;;  %p3770_p12 = por %p3769_p6, %p3768_p2 }
  0x31   : > { %p3764_p1 = pneg %p3763_p10 }
  0x33   : > { %p3771_p0 = pnand %p3770_p12, %p3764_p1 }
  0x35   : > { %3774 = shalt.err (!%p3771_p0)
}
  0x36   : > { %s5563_s19 = smov 64   ;;  %s5565_s21 = smov 4  }
  0x37   : > { %3366 = dma.hbm_to_vmem [thread:$0]  (!%p4145_p11), %s5576_s2, 1024, %s4138_s15, [#allocation6], %s5563_s19, %s5563_s19, %s5565_s21  }
  0x38   : > { %s5578_s3 = sld [smem:[#allocation27_spill]] }
  0x3e   : > { %s3775_s10 = scalar_lea.hbm %s5578_s3, 1024 }
  0x3f   : > { %p3776_p1 = scmp.ne.s32.totalorder %s5578_s3, %s3775_s10  ;;  %p3782_p10 = scmp.lt.u32.totalorder %s3775_s10, %s5578_s3 }
  0x41   : > { %p3778_p2 = pnand %p3776_p1, %p4161_p13 }
  0x43   : > { %p3779_p6 = pneg %p3778_p2 }
  0x45   : > { %p3784_p3 = pnand %p3782_p10, %p3779_p6 }
  0x47   : > { %3787 = shalt.err (!%p3784_p3)
}
  0x48   : > { %s3788_s15 = scalar_lea.vmem %s4149_s18, 1024  ;;  %p3796_p12 = scmp.lt.s32.totalorder %s4149_s18, %s4149_s18 }
  0x49   : > { %p3789_p5 = scmp.ne.s32.totalorder %s4149_s18, %s3788_s15  ;;  %p3797_p0 = scmp.lt.s32.totalorder %s3788_s15, %s3788_s15 }
  0x4b   : > { %p3791_p7 = pnand %p3789_p5, %p4161_p13  ;;  %p3798_p1 = por %p3797_p0, %p3796_p12 }
  0x4d   : > { %p3792_p9 = pneg %p3791_p7 }
  0x4f   : > { %p3799_p2 = pnand %p3798_p1, %p3792_p9 }
  0x51   : > { %3802 = shalt.err (!%p3799_p2)
}
  0x52   : > { %3369 = dma.hbm_to_vmem [thread:$0]  (!%p4145_p11), %s5578_s3, 1024, %s4149_s18, [#allocation9], %s5563_s19, %s5563_s19, %s5565_s21  }
  0x53   : > { %s3803_s24 = scalar_lea.hbm %s5553_s4, 1024 }
  0x54   : > { %p3804_p6 = scmp.ne.s32.totalorder %s5553_s4, %s3803_s24  ;;  %p3810_p5 = scmp.lt.u32.totalorder %s3803_s24, %s5553_s4 }
  0x56   : > { %p3806_p10 = pnand %p3804_p6, %p4161_p13 }
  0x58   : > { %p3807_p3 = pneg %p3806_p10 }
  0x5a   : > { %p3812_p7 = pnand %p3810_p5, %p3807_p3 }
  0x5c   : > { %3815 = shalt.err (!%p3812_p7)
}
  0x5d   : > { %s3816_s15 = scalar_lea.vmem %s286_s20, 1024  ;;  %p3824_p1 = scmp.lt.s32.totalorder %s286_s20, %s286_s20 }
  0x5e   : > { %p3817_p9 = scmp.ne.s32.totalorder %s286_s20, %s3816_s15  ;;  %p3825_p2 = scmp.lt.s32.totalorder %s3816_s15, %s3816_s15 }
  0x60   : > { %p3819_p12 = pnand %p3817_p9, %p4161_p13  ;;  %p3826_p4 = por %p3825_p2, %p3824_p1 }
  0x62   : > { %p3820_p0 = pneg %p3819_p12 }
  0x64   : > { %p3827_p8 = pnand %p3826_p4, %p3820_p0 }
  0x66   : > { %3830 = shalt.err (!%p3827_p8)
}
  0x67   : > { %3372 = dma.hbm_to_vmem [thread:$0]  (!%p4145_p11), %s5553_s4, 1024, %s286_s20, [#allocation9], %s5563_s19, %s5563_s19, %s5565_s21  }
  0x68   : > { %s4040_s12 = smov [#allocation11]   ;;  %s3831_s25 = scalar_lea.hbm %s5554_s5, 1024 }
  0x69   : > { %s298_s22 = sshll.u32 %s4040_s12, 4  ;;  %p3832_p4 = scmp.ne.s32.totalorder %s5554_s5, %s3831_s25  ;;  %s299_s22 = int_to_ptr.vmem [resolvable:$true] %s298_s22 }
  0x6a   : > { %p3838_p10 = scmp.lt.u32.totalorder %s3831_s25, %s5554_s5 }
  0x6b   : > { %p3834_p8 = pnand %p3832_p4, %p4161_p13 }
  0x6d   : > { %p3835_p6 = pneg %p3834_p8 }
  0x6f   : > { %p3840_p3 = pnand %p3838_p10, %p3835_p6 }
  0x71   : > { %3843 = shalt.err (!%p3840_p3)
}
  0x72   : > { %s3844_s20 = scalar_lea.vmem %s299_s22, 1024  ;;  %p3852_p12 = scmp.lt.s32.totalorder %s299_s22, %s299_s22 }
  0x73   : > { %p3845_p5 = scmp.ne.s32.totalorder %s299_s22, %s3844_s20  ;;  %p3853_p0 = scmp.lt.s32.totalorder %s3844_s20, %s3844_s20 }
  0x75   : > { %p3847_p7 = pnand %p3845_p5, %p4161_p13  ;;  %p3854_p1 = por %p3853_p0, %p3852_p12 }
  0x77   : > { %p3848_p9 = pneg %p3847_p7 }
  0x79   : > { %p3855_p2 = pnand %p3854_p1, %p3848_p9 }
  0x7b   : > { %3858 = shalt.err (!%p3855_p2)
}
  0x7c   : > { %3375 = dma.hbm_to_vmem [thread:$0]  (!%p4145_p11), %s5554_s5, 1024, %s299_s22, [#allocation12], %s5563_s19, %s5563_s19, %s5565_s21  }
  0x7d   : > { %s4255_s26 = sadd.s32 1, %s4033_s30   ;;  %s40_s16 = sadd.s32 1, %s4029_s29 }
  0x7e   : > { %s37_s12 = ssub.s32 %s4033_s30, %s4255_s26  ;;  %p47_p13 = scmp.ne.s32.totalorder %s4029_s29, %s4025_s28 }
  0x7f   : > { %p38_p4 = scmp.eq.s32.totalorder %s37_s12, 0  ;;  %p48_p8 = scmp.eq.s32.totalorder %s4033_s30, 0 }
  0x80   : > { %p5579_p6 = scmp.eq.s32.totalorder %s4115_s9, 1  ;;  %p3394_p3 = scmp.lt.s32.totalorder %s4033_s30, 2 }
  0x81   : > { %s4271_s24 = scalar_select %p38_p4, %s4029_s29, %s40_s16  }
  0x82   : > { %p4265_p10 = por %p5579_p6, %p47_p13  ;;  %p49_p5 = por %p48_p8, %p47_p13 }
  0x83   : > { %s315_s25 = sand.u32 1, %s4029_s29   ;;  %s3095_s22 = sshll.u32 %s4033_s30, 10 }
  0x84   : > { %s3023_s10 = sshll.u32 %s315_s25, 6  ;;  %s5581_s0 = sld [smem:[#allocation25_spill]] }
  0x85   : > { %s319_s20 = scalar_lea.vmem [#allocation2], %s3023_s10  ;;  %p4282_p11 = pnand %p3394_p3, %p49_p5 }
  0x86   : > { %s326_s18 = sshll.u32 %s319_s20, 4  ;;  %s4289_s14 = scalar_lea.hbm %s5550_s1, %s3095_s22  ;;  %s4280_s18 = int_to_ptr.vmem [resolvable:$true] %s326_s18 }
  0x87   : > { %s340_s17 = scalar_lea.vmem [#allocation5], %s3023_s10  ;;  %s4293_s21 = scalar_lea.sflag [#allocation3], %s315_s25 }
  0x88   : > { %s4291_s19 = sshll.u32 %s340_s17, 4  ;;  %p3861_p9 = pneg %p4282_p11  ;;  %s4325_s19 = int_to_ptr.vmem [resolvable:$true] %s4291_s19 }
  0x8a   : > { %s4278_s15 = scalar_lea.hbm %s5581_s0, %s3095_s22  ;;  %s3864_s16 = scalar_lea.hbm %s5581_s0, 2048 }
  0x8b   : > { %s3859_s20 = scalar_lea.hbm %s4278_s15, 1024  ;;  %p3865_p1 = scmp.lt.u32.totalorder %s4278_s15, %s5581_s0 }
  0x8c   : > { %p3860_p7 = scmp.ne.s32.totalorder %s4278_s15, %s3859_s20  ;;  %p3866_p2 = scmp.lt.u32.totalorder %s3864_s16, %s3859_s20 }
  0x8d   : > { %p3868_p4 = scmp.lt.u32.totalorder %s3859_s20, %s4278_s15 }
  0x8e   : > { %p3862_p12 = pnand %p3861_p9, %p3860_p7  ;;  %p3867_p13 = por %p3866_p2, %p3865_p1 }
  0x90   : > { %p3863_p0 = pneg %p3862_p12  ;;  %p3869_p8 = por %p3868_p4, %p3867_p13 }
  0x92   : > { %p3870_p6 = pnand %p3869_p8, %p3863_p0 }
  0x94   : > { %3873 = shalt.err (!%p3870_p6)
}
  0x95   : > { %s3874_s25 = scalar_lea.vmem %s4280_s18, 1024  ;;  %s4041_s2 = smov [#allocation2]  }
  0x96   : > { %p3875_p3 = scmp.ne.s32.totalorder %s4280_s18, %s3874_s25  ;;  %s3879_s3 = sshll.u32 %s4041_s2, 4  ;;  %s3880_s3 = int_to_ptr.vmem [resolvable:$false] %s3879_s3 }
  0x97   : > { %s3881_s10 = scalar_lea.vmem %s3880_s3, 2048  ;;  %p3882_p12 = scmp.lt.s32.totalorder %s4280_s18, %s3880_s3 }
  0x98   : > { %p3877_p5 = pnand %p3875_p3, %p3861_p9  ;;  %p3883_p1 = scmp.lt.s32.totalorder %s3881_s10, %s3874_s25 }
  0x9a   : > { %p3878_p7 = pneg %p3877_p5  ;;  %p3884_p2 = por %p3883_p1, %p3882_p12 }
  0x9c   : > { %p3885_p13 = pnand %p3884_p2, %p3878_p7 }
  0x9e   : > { %3888 = shalt.err (!%p3885_p13)
}
  0x9f   : > { %s5583_s17 = smov 4   ;;  %s5584_s20 = smov 64  }
  0xa0   : > { %3379 = dma.hbm_to_vmem [thread:$0]  (!%p4282_p11), %s4278_s15, 1024, %s4280_s18, %s4293_s21, %s5584_s20, %s5584_s20, %s5583_s17  }
  0xa1   : > { %s336_s16 = sand.u32 1, %s4033_s30   ;;  %s3889_s22 = scalar_lea.hbm %s4289_s14, 1024 }
  0xa2   : > { %s4328_s12 = scalar_lea.sflag [#allocation6], %s336_s16  ;;  %p3890_p0 = scmp.ne.s32.totalorder %s4289_s14, %s3889_s22 }
  0xa3   : > { %s3894_s3 = scalar_lea.hbm %s5550_s1, 2048  ;;  %p3895_p6 = scmp.lt.u32.totalorder %s4289_s14, %s5550_s1 }
  0xa4   : > { %p3892_p4 = pnand %p3890_p0, %p3861_p9  ;;  %p3896_p3 = scmp.lt.u32.totalorder %s3894_s3, %s3889_s22 }
  0xa5   : > { %p3898_p7 = scmp.lt.u32.totalorder %s3889_s22, %s4289_s14 }
  0xa6   : > { %p3893_p8 = pneg %p3892_p4  ;;  %p3897_p5 = por %p3896_p3, %p3895_p6 }
  0xa8   : > { %p3899_p12 = por %p3898_p7, %p3897_p5 }
  0xaa   : > { %p3900_p1 = pnand %p3899_p12, %p3893_p8 }
  0xac   : > { %3903 = shalt.err (!%p3900_p1)
}
  0xad   : > { %s3904_s21 = scalar_lea.vmem %s4325_s19, 1024  ;;  %s4042_s15 = smov [#allocation5]  }
  0xae   : > { %p3905_p2 = scmp.ne.s32.totalorder %s4325_s19, %s3904_s21  ;;  %s3909_s18 = sshll.u32 %s4042_s15, 4  ;;  %s3910_s18 = int_to_ptr.vmem [resolvable:$false] %s3909_s18 }
  0xaf   : > { %s3911_s0 = scalar_lea.vmem %s3910_s18, 2048  ;;  %p3912_p4 = scmp.lt.s32.totalorder %s4325_s19, %s3910_s18 }
  0xb0   : > { %p3907_p13 = pnand %p3905_p2, %p3861_p9  ;;  %p3913_p6 = scmp.lt.s32.totalorder %s3911_s0, %s3904_s21 }
  0xb2   : > { %p3908_p0 = pneg %p3907_p13  ;;  %p3914_p3 = por %p3913_p6, %p3912_p4 }
  0xb4   : > { %p3915_p5 = pnand %p3914_p3, %p3908_p0 }
  0xb6   : > { %3918 = shalt.err (!%p3915_p5)
}
  0xb7   : > { %3382 = dma.hbm_to_vmem [thread:$0]  (!%p4282_p11), %s4289_s14, 1024, %s4325_s19, %s4328_s12, %s5584_s20, %s5584_s20, %s5583_s17  }
  0xb8   : > { %p5585_p9 = scmp.ne.s32.totalorder %s5574_s13, 0 }
  0xb9   : > { %s4360_s16 = sand.u32 (!%p5585_p9), 1, %s4025_s28   ;;  %p5586_p8 = scmp.ne.s32.totalorder (!%p5585_p9), %s5571_s11, 0 }
  0xba   : > { %359 = sbr.rel (%p5585_p9) target bundleno = 2146 (0x862), region = 48  ;;  %s3030_s22 = sshll.u32 (!%p5585_p9), %s4360_s16, 6 }
  0xbb   : > { %s362_s25 = scalar_lea.sflag (!%p5585_p9), [#allocation3], %s4360_s16  ;;  %s4364_s2 = scalar_lea.vmem (!%p5585_p9), [#allocation2], %s3030_s22 }
  0xc1   : > { %3992 = dma.done.wait (%p5586_p8), %s362_s25, 1024  }
  0xc2   : > { %3994 = vsyncadd (%p5586_p8), %s362_s25, 4294966272  ;;  %s370_s19 = sand.u32 1, %s4115_s9   ;;  %s4371_s27 = scalar_lea.vmem [#allocation5], %s3030_s22 }
  0xc3   : > { %s371_s13 = scalar_lea.sflag [#allocation6], %s370_s19 }
  0xc4   : > { %3996 = dma.done.wait (%p5586_p8), %s371_s13, 1024  }
  0xc5   : > { %3998 = vsyncadd (%p5586_p8), %s371_s13, 4294966272  ;;  %p5587_p11 = scmp.eq.s32.totalorder %s4115_s9, 0 }
  0xc7   : > { %4000 = dma.done.wait (%p5587_p11), [#allocation6], 1024   ;;  %p5588_p7 = pmov %p5587_p11 }
  0xc9   : > { %4002 = vsyncadd (%p5588_p7), [#allocation6], 4294966272  ;;  %p5589_p12 = pmov %p5588_p7 }
  0xca   : > { %p5590_p1 = pmov %p5588_p7 }
  0xcb   : > { %4004 = dma.done.wait (%p5589_p12), [#allocation9], 2048  }
  0xcc   : > { %4006 = vsyncadd (%p5590_p1), [#allocation9], 4294965248  ;;  %p5591_p2 = pmov %p5590_p1 }
  0xcd   : > { %p5592_p13 = pmov %p5590_p1 }
  0xce   : > { %4008 = dma.done.wait (%p5591_p2), [#allocation12], 1024  }
  0xcf   : > { %4010 = vsyncadd (%p5592_p13), [#allocation12], 4294966272  ;;  %v3442_v0 = vld [vmem:[#allocation7] sm:$0xff]   ;;  %v3443_v1 = vld [vmem:[#allocation7 + $0x8] sm:$0xff]   ;;  %v435_v44 = vlaneseq  ;;  %v4043_v51 = vmov 0.0   ;;  %s3036_s12 = sshll.u32 %s4360_s16, 7 }
  0xd0   : > { %3179 = vmatprep.subr.bf16.mxu1 %v3442_v0  ;;  %v3444_v2 = vld [vmem:[#allocation7 + $0x10] sm:$0xff]   ;;  %v3445_v3 = vld [vmem:[#allocation7 + $0x18] sm:$0xff]   ;;  %v3450_v4 = vld [vmem:[%s4364_s2] sm:$0xff]   ;;  %s5377_s3 = scalar_lea.vmem [#allocation13], %s3036_s12  ;;  %s3097_s10 = sshll.u32 %s4115_s9, 11 }
  0xd1   : > { %3180 = vmatpush3.bf16.msra.mxu1 %v3442_v0  ;;  %3195 = vmatprep.mubr.bf16.mxu1 %v3450_v4  ;;  %v3446_v5 = vld [vmem:[#allocation7 + $0x20] sm:$0xff]   ;;  %v3447_v6 = vld [vmem:[#allocation7 + $0x28] sm:$0xff]   ;;  %v3448_v7 = vld [vmem:[#allocation7 + $0x30] sm:$0xff]   ;;  %v4434_v47 = vand.u32 127, %v435_v44  ;;  %s2834_s21 = sshll.u32 %s5377_s3, 4  ;;  %s5425_s0 = scalar_lea.hbm %s5556_s7, %s3097_s10  ;;  %s5427_s21 = int_to_ptr.vmem [resolvable:$true] %s2834_s21 }
  0xd2   : > { %3181 = vmatprep.subr.bf16.mxu1 %v3443_v1  ;;  %v3449_v8 = vld [vmem:[#allocation7 + $0x38] sm:$0xff]   ;;  %v3452_v9 = vld [vmem:[#allocation8] sm:$0xff]   ;;  %v3451_v10 = vld [vmem:[%s4364_s2 + $0x8] sm:$0xff]   ;;  %s2816_s22 = scalar_lea.sflag [#allocation4], %s4360_s16  ;;  %s3919_s25 = scalar_lea.vmem %s5427_s21, 2048 }
  0xd3   : > { %v3453_v11 = vld [vmem:[#allocation8 + $0x8] sm:$0xff]   ;;  %v3454_v12 = vld [vmem:[%s4364_s2 + $0x10] sm:$0xff]   ;;  %v3455_v14 = vld [vmem:[%s4364_s2 + $0x18] sm:$0xff]   ;;  %vm437_vm0 = vcmp.lt.s32.totalorder %v4434_v47, 32  ;;  %vm2430_vm1 = vcmp.lt.s32.totalorder %v4434_v47, 16  ;;  %p3920_p0 = scmp.ne.s32.totalorder %s5427_s21, %s3919_s25 }
  0xd4   : > { %v3456_v13 = vld [vmem:[#allocation8 + $0x10] sm:$0xff]   ;;  %v3458_v15 = vld [vmem:[%s4364_s2 + $0x20] sm:$0xff]   ;;  %v3457_v16 = vld [vmem:[#allocation8 + $0x18] sm:$0xff]   ;;  %v4441_v52 = vsel %vm437_vm0, 1.0, %v4043_v51 }
  0xd5   : > { %3182 = vmatpush3.bf16.msra.mxu1 %v3443_v1  ;;  %v3460_v17 = vld [vmem:[#allocation8 + $0x20] sm:$0xff]   ;;  %v3459_v18 = vld [vmem:[%s4364_s2 + $0x28] sm:$0xff]   ;;  %v3462_v19 = vld [vmem:[%s4364_s2 + $0x30] sm:$0xff]   ;;  %p3921_p4 = pnand %p3920_p0, %p4265_p10 }
  0xd6   : > { %3183 = vmatprep.subr.bf16.mxu1 %v3444_v2  ;;  %v3461_v20 = vld [vmem:[#allocation8 + $0x28] sm:$0xff]   ;;  %v3464_v21 = vld [vmem:[#allocation8 + $0x30] sm:$0xff]   ;;  %v3463_v22 = vld [vmem:[%s4364_s2 + $0x38] sm:$0xff]   ;;  %s4045_s2 = smov [#allocation13]  }
  0xd7   : > { %v3466_v23 = vld [vmem:[%s4371_s27] sm:$0xff]   ;;  %v3465_v24 = vld [vmem:[#allocation8 + $0x38] sm:$0xff]   ;;  %v3467_v25 = vld [vmem:[%s4371_s27 + $0x8] sm:$0xff]   ;;  %p3922_p6 = pneg %p3921_p4  ;;  %s3923_s19 = sshll.u32 %s4045_s2, 4  ;;  %s3924_s19 = int_to_ptr.vmem [resolvable:$false] %s3923_s19 }
  0xd8   : > { %v3468_v26 = vld [vmem:[%s4371_s27 + $0x10] sm:$0xff]   ;;  %v3469_v27 = vld [vmem:[%s4371_s27 + $0x18] sm:$0xff]   ;;  %v3470_v28 = vld [vmem:[%s4371_s27 + $0x20] sm:$0xff]   ;;  %s3925_s13 = scalar_lea.vmem %s3924_s19, 4096  ;;  %p3926_p3 = scmp.lt.s32.totalorder %s5427_s21, %s3924_s19 }
  0xd9   : > { %3184 = vmatpush3.bf16.msra.mxu1 %v3444_v2  ;;  %v3471_v29 = vld [vmem:[%s4371_s27 + $0x28] sm:$0xff]   ;;  %v3472_v30 = vld [vmem:[%s4371_s27 + $0x30] sm:$0xff]   ;;  %v3473_v31 = vld [vmem:[%s4371_s27 + $0x38] sm:$0xff]   ;;  %p3927_p5 = scmp.lt.s32.totalorder %s3925_s13, %s3919_s25 }
  0xda   : > { %3185 = vmatprep.subr.bf16.mxu1 %v3445_v3 }
  0xdb   : > { %p3928_p9 = por %p3927_p5, %p3926_p3 }
  0xdd   : > { %3186 = vmatpush3.bf16.msra.mxu1 %v3445_v3  ;;  %p3929_p8 = pnand %p3928_p9, %p3922_p6 }
  0xde   : > { %3187 = vmatprep.subr.bf16.mxu1 %v3446_v5 }
  0xe1   : > { %3188 = vmatpush3.bf16.msra.mxu1 %v3446_v5 }
  0xe2   : > { %3189 = vmatprep.subr.bf16.mxu1 %v3447_v6 }
  0xe5   : > { %3190 = vmatpush3.bf16.msra.mxu1 %v3447_v6 }
  0xe6   : > { %3191 = vmatprep.subr.bf16.mxu1 %v3448_v7 }
  0xe9   : > { %3192 = vmatpush3.bf16.msra.mxu1 %v3448_v7 }
  0xea   : > { %3193 = vmatprep.subr.bf16.mxu1 %v3449_v8 }
  0xed   : > { %3194 = vmatpush3.bf16.msra.mxu1 %v3449_v8 }
  0xee   : > { %3211 = vmatprep.subr.bf16.mxu1 %v3452_v9 }
  0xf0   : > { %3196 = vmatmul.mubr.bf16.vlgmr.msra.gmra.mrb[0].mxu1 %v3451_v10 }
  0xf1   : > { %3212 = vmatpush3.bf16.msra.mxu1 %v3452_v9  ;;  %3199 = vmatprep.mubr.bf16.mxu1 %v3454_v12 }
  0xf2   : > { %3213 = vmatprep.subr.bf16.mxu1 %v3453_v11 }
  0xf5   : > { %3214 = vmatpush3.bf16.msra.mxu1 %v3453_v11 }
  0xf6   : > { %3215 = vmatprep.subr.bf16.mxu1 %v3456_v13 }
  0xf8   : > { %3200 = vmatmul.mubr.bf16.gmra.mrb[4].mxu1 %v3455_v14 }
  0xf9   : > { %3216 = vmatpush3.bf16.msra.mxu1 %v3456_v13  ;;  %3203 = vmatprep.mubr.bf16.mxu1 %v3458_v15 }
  0xfa   : > { %3217 = vmatprep.subr.bf16.mxu1 %v3457_v16 }
  0xfd   : > { %3218 = vmatpush3.bf16.msra.mxu1 %v3457_v16 }
  0xfe   : > { %3219 = vmatprep.subr.bf16.mxu1 %v3460_v17 }
 0x100   : > { %3204 = vmatmul.mubr.bf16.gmra.mrb[8].mxu1 %v3459_v18 }
 0x101   : > { %3220 = vmatpush3.bf16.msra.mxu1 %v3460_v17  ;;  %3207 = vmatprep.mubr.bf16.mxu1 %v3462_v19 }
 0x102   : > { %3221 = vmatprep.subr.bf16.mxu1 %v3461_v20 }
 0x105   : > { %3222 = vmatpush3.bf16.msra.mxu1 %v3461_v20 }
 0x106   : > { %3223 = vmatprep.subr.bf16.mxu1 %v3464_v21 }
 0x108   : > { %3208 = vmatmul.mubr.bf16.gmra.mrb[12].mxu1 %v3463_v22 }
 0x109   : > { %3224 = vmatpush3.bf16.msra.mxu1 %v3464_v21  ;;  %3227 = vmatprep.mubr.bf16.mxu1 %v3466_v23 }
 0x10a   : > { %3225 = vmatprep.subr.bf16.mxu1 %v3465_v24 }
 0x10d   : > { %3226 = vmatpush3.bf16.msra.mxu1 %v3465_v24 }
 0x110   : > { %3228 = vmatmul.mubr.bf16.vlgmr.msra.gmra.mrb[16].mxu1 %v3467_v25 }
 0x111   : > { %3231 = vmatprep.mubr.bf16.mxu1 %v3468_v26 }
 0x118   : > { %3232 = vmatmul.mubr.bf16.gmra.mrb[20].mxu1 %v3469_v27 }
 0x119   : > { %3235 = vmatprep.mubr.bf16.mxu1 %v3470_v28 }
 0x120   : > { %3236 = vmatmul.mubr.bf16.gmra.mrb[24].mxu1 %v3471_v29 }
 0x121   : > { %3239 = vmatprep.mubr.bf16.mxu1 %v3472_v30 }
 0x128   : > { %3240 = vmatmul.mubr.bf16.gmra.mrb[28].mxu1 %v3473_v31 }
 0x1c3   : > { %v4405_v32 = vpop.f32.mrb[0].mxu1 }
 0x1c4   : > { %v4407_v33 = vpop.f32.mrb[1].mxu1  ;;  %v683_v22 = vmul.f32 %v4405_v32, %v4441_v52 }
 0x1c5   : > { %v4409_v34 = vpop.f32.mrb[2].mxu1  ;;  %v681_v20 = vmul.f32 %v4441_v52, %v4407_v33 }
 0x1c6   : > { %v4411_v35 = vpop.f32.mrb[3].mxu1  ;;  %v684_v23 = vmul.f32 %v4409_v34, %v4441_v52 }
 0x1c7   : > { %v682_v21 = vmul.f32 %v4441_v52, %v4411_v35 }
 0x1cb   : > { %v4413_v36 = vpop.f32.mrb[4].mxu1 }
 0x1cc   : > { %v4415_v37 = vpop.f32.mrb[5].mxu1 }
 0x1cd   : > { %v4417_v38 = vpop.f32.mrb[6].mxu1 }
 0x1ce   : > { %v4419_v39 = vpop.f32.mrb[7].mxu1 }
 0x1d3   : > { %v4421_v40 = vpop.f32.mrb[8].mxu1 }
 0x1d4   : > { %v4423_v41 = vpop.f32.mrb[9].mxu1 }
 0x1d5   : > { %v4425_v42 = vpop.f32.mrb[10].mxu1 }
 0x1d6   : > { %v4427_v43 = vpop.f32.mrb[11].mxu1 }
 0x1db   : > { %v4429_v45 = vpop.f32.mrb[12].mxu1 }
 0x1dc   : > { %v4431_v46 = vpop.f32.mrb[13].mxu1 }
 0x1dd   : > { %v4436_v48 = vpop.f32.mrb[14].mxu1 }
 0x1de   : > { %v4438_v49 = vpop.f32.mrb[15].mxu1 }
 0x1e3   : > { %v3229_v50 = vpop.f32.mrb[16].mxu1 }
 0x1e4   : > { %v1091_v53 = vpop.f32.mrb[17].mxu1  ;;  %v1156_v54 = vmul.f32 %v3229_v50, %v4441_v52 }
 0x1e5   : > { %v4444_v55 = vpop.f32.mrb[18].mxu1  ;;  %v1154_v56 = vmul.f32 %v4441_v52, %v1091_v53 }
 0x1e6   : > { %1174 = vadd.xlane.f32.xlu1 %v1156_v54  ;;  %v1094_v57 = vpop.f32.mrb[19].mxu1  ;;  %v1157_v58 = vmul.f32 %v4444_v55, %v4441_v52 }
 0x1e7   : > { %1170 = vadd.xlane.f32.xlu0 %v1154_v56  ;;  %v1155_v59 = vmul.f32 %v4441_v52, %v1094_v57 }
 0x1ea   : > { %1176 = vadd.xlane.f32.xlu1 %v1157_v58 }
 0x1eb   : > { %1172 = vadd.xlane.f32.xlu0 %v1155_v59  ;;  %v4450_v60 = vpop.f32.mrb[20].mxu1 }
 0x1ec   : > { %v4452_v61 = vpop.f32.mrb[21].mxu1  ;;  %v1160_v2 = vmul.f32 %v4450_v60, %v4441_v52 }
 0x1ed   : > { %v4454_v62 = vpop.f32.mrb[22].mxu1  ;;  %v1158_v63 = vmul.f32 %v4441_v52, %v4452_v61 }
 0x1ee   : > { %v4458_v0 = vpop.f32.mrb[23].mxu1  ;;  %v1161_v3 = vmul.f32 %v4454_v62, %v4441_v52 }
 0x1ef   : > { %1178 = vadd.xlane.f32.xlu0 %v1158_v63  ;;  %v1159_v1 = vmul.f32 %v4441_v52, %v4458_v0 }
 0x1f1   : > { %1180 = vadd.xlane.f32.xlu1 %v1159_v1 }
 0x1f3   : > { %1182 = vadd.xlane.f32.xlu0 %v1160_v2  ;;  %v4466_v4 = vpop.f32.mrb[24].mxu1 }
 0x1f4   : > { %v4468_v5 = vpop.f32.mrb[25].mxu1  ;;  %v1164_v10 = vmul.f32 %v4466_v4, %v4441_v52 }
 0x1f5   : > { %1184 = vadd.xlane.f32.xlu1 %v1161_v3  ;;  %v4470_v6 = vpop.f32.mrb[26].mxu1  ;;  %v1162_v7 = vmul.f32 %v4441_v52, %v4468_v5 }
 0x1f6   : > { %v4474_v8 = vpop.f32.mrb[27].mxu1  ;;  %v1165_v11 = vmul.f32 %v4470_v6, %v4441_v52 }
 0x1f7   : > { %1186 = vadd.xlane.f32.xlu0 %v1162_v7  ;;  %v1163_v9 = vmul.f32 %v4441_v52, %v4474_v8 }
 0x1f9   : > { %1188 = vadd.xlane.f32.xlu1 %v1163_v9 }
 0x1fb   : > { %1190 = vadd.xlane.f32.xlu0 %v1164_v10  ;;  %v4482_v12 = vpop.f32.mrb[28].mxu1 }
 0x1fc   : > { %v4484_v13 = vpop.f32.mrb[29].mxu1  ;;  %v1168_v18 = vmul.f32 %v4482_v12, %v4441_v52 }
 0x1fd   : > { %1192 = vadd.xlane.f32.xlu1 %v1165_v11  ;;  %v4486_v14 = vpop.f32.mrb[30].mxu1  ;;  %v1166_v15 = vmul.f32 %v4441_v52, %v4484_v13 }
 0x1fe   : > { %v4490_v16 = vpop.f32.mrb[31].mxu1  ;;  %v1169_v19 = vmul.f32 %v4486_v14, %v4441_v52 }
 0x1ff   : > { %1194 = vadd.xlane.f32.xlu0 %v1166_v15  ;;  %v1167_v17 = vmul.f32 %v4441_v52, %v4490_v16 }
 0x201   : > { %1196 = vadd.xlane.f32.xlu1 %v1167_v17 }
 0x203   : > { %1198 = vadd.xlane.f32.xlu0 %v1168_v18 }
 0x205   : > { %1200 = vadd.xlane.f32.xlu1 %v1169_v19 }
 0x207   : > { %697 = vadd.xlane.f32.xlu0 %v681_v20 }
 0x209   : > { %699 = vadd.xlane.f32.xlu1 %v682_v21 }
 0x20b   : > { %701 = vadd.xlane.f32.xlu0 %v683_v22 }
 0x20d   : > { %703 = vadd.xlane.f32.xlu1 %v684_v23 }
 0x273   : > { %v1175_v24 = vpop.xlane.xlu1 %1174 }
 0x274   : > { %v1204_v25 = vmul.f32 0.03125, %v1175_v24  ;;  %v1171_v26 = vpop.xlane.xlu0 %1170 }
 0x275   : > { %v1202_v27 = vmul.f32 0.03125, %v1171_v26 }
 0x276   : > { %v4506_v28 = vsub.f32 %v3229_v50, %v1204_v25 }
 0x277   : > { %v4508_v29 = vsub.f32 %v1091_v53, %v1202_v27  ;;  %v1177_v30 = vpop.xlane.xlu1 %1176 }
 0x278   : > { %v1205_v31 = vmul.f32 0.03125, %v1177_v30  ;;  %v1173_v51 = vpop.xlane.xlu0 %1172  ;;  %v1236_v1 = vmul.f32 %v4441_v52, %v4506_v28 }
 0x279   : > { %v1203_v54 = vmul.f32 0.03125, %v1173_v51  ;;  %v1234_v56 = vmul.f32 %v4441_v52, %v4508_v29 }
 0x27a   : > { %v4513_v58 = vsub.f32 %v4444_v55, %v1205_v31 }
 0x27b   : > { %v4515_v59 = vsub.f32 %v1094_v57, %v1203_v54  ;;  %v1250_v63 = vmul.f32 %v1234_v56, %v1234_v56  ;;  %v1252_v57 = vmul.f32 %v1236_v1, %v1236_v1 }
 0x27c   : > { %v1179_v50 = vpop.xlane.xlu0 %1178  ;;  %v1237_v7 = vmul.f32 %v4441_v52, %v4513_v58 }
 0x27d   : > { %v1206_v2 = vmul.f32 0.03125, %v1179_v50  ;;  %1266 = vadd.xlane.f32.xlu0 %v1250_v63  ;;  %v1235_v53 = vmul.f32 %v4441_v52, %v4515_v59 }
 0x27e   : > { %v1181_v3 = vpop.xlane.xlu1 %1180  ;;  %v1253_v20 = vmul.f32 %v1237_v7, %v1237_v7 }
 0x27f   : > { %v4524_v9 = vsub.f32 %v4452_v61, %v1206_v2  ;;  %v1207_v55 = vmul.f32 0.03125, %v1181_v3  ;;  %v1251_v10 = vmul.f32 %v1235_v53, %v1235_v53  ;;  %v3474_v53 = vld [vmem:[#allocation11] sm:$0xff]  }
 0x280   : > { %v1183_v11 = vpop.xlane.xlu0 %1182  ;;  %3275 = vmatprep.subr.bf16.mxu1 %v3474_v53 }
 0x281   : > { %v4527_v15 = vsub.f32 %v4458_v0, %v1207_v55  ;;  %v1208_v17 = vmul.f32 0.03125, %v1183_v11  ;;  %1270 = vadd.xlane.f32.xlu0 %v1252_v57  ;;  %1268 = vadd.xlane.f32.xlu1 %v1251_v10  ;;  %v1238_v18 = vmul.f32 %v4441_v52, %v4524_v9 }
 0x282   : > { %v1185_v19 = vpop.xlane.xlu1 %1184  ;;  %3276 = vmatpush3.bf16.msra.mxu1 %v3474_v53 }
 0x283   : > { %v4532_v21 = vsub.f32 %v4450_v60, %v1208_v17  ;;  %v1209_v61 = vmul.f32 0.03125, %v1185_v19  ;;  %v1254_v22 = vmul.f32 %v1238_v18, %v1238_v18  ;;  %v1239_v23 = vmul.f32 %v4441_v52, %v4527_v15 }
 0x284   : > { %v1187_v24 = vpop.xlane.xlu0 %1186 }
 0x285   : > { %v4537_v0 = vsub.f32 %v4454_v62, %v1209_v61  ;;  %v1210_v25 = vmul.f32 0.03125, %v1187_v24  ;;  %1274 = vadd.xlane.f32.xlu0 %v1254_v22  ;;  %1272 = vadd.xlane.f32.xlu1 %v1253_v20  ;;  %v1240_v26 = vmul.f32 %v4441_v52, %v4532_v21  ;;  %v1255_v30 = vmul.f32 %v1239_v23, %v1239_v23  ;;  %v3475_v22 = vld [vmem:[#allocation11 + $0x8] sm:$0xff]  }
 0x286   : > { %v1189_v27 = vpop.xlane.xlu1 %1188  ;;  %3277 = vmatprep.subr.bf16.mxu1 %v3475_v22 }
 0x287   : > { %v4542_v60 = vsub.f32 %v4468_v5, %v1210_v25  ;;  %v1211_v31 = vmul.f32 0.03125, %v1189_v27  ;;  %v1256_v51 = vmul.f32 %v1240_v26, %v1240_v26  ;;  %v1241_v54 = vmul.f32 %v4441_v52, %v4537_v0  ;;  %3278 = vmatpush3.bf16.msra.mxu1 %v3475_v22 }
 0x288   : > { %v1191_v56 = vpop.xlane.xlu0 %1190 }
 0x289   : > { %v4547_v62 = vsub.f32 %v4474_v8, %v1211_v31  ;;  %v1212_v63 = vmul.f32 0.03125, %v1191_v56  ;;  %1278 = vadd.xlane.f32.xlu0 %v1256_v51  ;;  %1276 = vadd.xlane.f32.xlu1 %v1255_v30  ;;  %v1242_v1 = vmul.f32 %v4441_v52, %v4542_v60  ;;  %v1257_v2 = vmul.f32 %v1241_v54, %v1241_v54 }
 0x28a   : > { %v1193_v50 = vpop.xlane.xlu1 %1192 }
 0x28b   : > { %v4552_v5 = vsub.f32 %v4466_v4, %v1212_v63  ;;  %v1213_v3 = vmul.f32 0.03125, %v1193_v50  ;;  %v1258_v7 = vmul.f32 %v1242_v1, %v1242_v1  ;;  %v1243_v55 = vmul.f32 %v4441_v52, %v4547_v62 }
 0x28c   : > { %v1195_v57 = vpop.xlane.xlu0 %1194 }
 0x28d   : > { %v4557_v8 = vsub.f32 %v4470_v6, %v1213_v3  ;;  %v1214_v10 = vmul.f32 0.03125, %v1195_v57  ;;  %1282 = vadd.xlane.f32.xlu0 %v1258_v7  ;;  %1280 = vadd.xlane.f32.xlu1 %v1257_v2  ;;  %v1244_v11 = vmul.f32 %v4441_v52, %v4552_v5  ;;  %v1259_v18 = vmul.f32 %v1243_v55, %v1243_v55 }
 0x28e   : > { %v1197_v17 = vpop.xlane.xlu1 %1196 }
 0x28f   : > { %v4562_v4 = vsub.f32 %v4484_v13, %v1214_v10  ;;  %v1215_v19 = vmul.f32 0.03125, %v1197_v17  ;;  %v1260_v20 = vmul.f32 %v1244_v11, %v1244_v11  ;;  %v1245_v61 = vmul.f32 %v4441_v52, %v4557_v8 }
 0x290   : > { %v1199_v6 = vpop.xlane.xlu0 %1198 }
 0x291   : > { %v4567_v23 = vsub.f32 %v4490_v16, %v1215_v19  ;;  %v1216_v24 = vmul.f32 0.03125, %v1199_v6  ;;  %1286 = vadd.xlane.f32.xlu0 %v1260_v20  ;;  %1284 = vadd.xlane.f32.xlu1 %v1259_v18  ;;  %v1246_v25 = vmul.f32 %v4441_v52, %v4562_v4  ;;  %v1261_v27 = vmul.f32 %v1245_v61, %v1245_v61  ;;  %v3476_v16 = vld [vmem:[#allocation11 + $0x10] sm:$0xff]  }
 0x292   : > { %v1201_v26 = vpop.xlane.xlu1 %1200  ;;  %3279 = vmatprep.subr.bf16.mxu1 %v3476_v16 }
 0x293   : > { %v4572_v13 = vsub.f32 %v4482_v12, %v1216_v24  ;;  %v1217_v30 = vmul.f32 0.03125, %v1201_v26  ;;  %v1262_v31 = vmul.f32 %v1246_v25, %v1246_v25  ;;  %v1247_v51 = vmul.f32 %v4441_v52, %v4567_v23  ;;  %3280 = vmatpush3.bf16.msra.mxu1 %v3476_v16  ;;  %v3479_v26 = vld [vmem:[#allocation11 + $0x28] sm:$0xff]   ;;  %v3481_v16 = vld [vmem:[#allocation11 + $0x38] sm:$0xff]  }
 0x294   : > { %v698_v54 = vpop.xlane.xlu0 %697 }
 0x295   : > { %v4577_v56 = vsub.f32 %v4486_v14, %v1217_v30  ;;  %v729_v63 = vmul.f32 0.03125, %v698_v54  ;;  %1290 = vadd.xlane.f32.xlu0 %v1262_v31  ;;  %1288 = vadd.xlane.f32.xlu1 %v1261_v27  ;;  %v1248_v1 = vmul.f32 %v4441_v52, %v4572_v13  ;;  %v1263_v12 = vmul.f32 %v1247_v51, %v1247_v51  ;;  %v3477_v14 = vld [vmem:[#allocation11 + $0x18] sm:$0xff]   ;;  %v3480_v30 = vld [vmem:[#allocation11 + $0x30] sm:$0xff]  }
 0x296   : > { %v700_v50 = vpop.xlane.xlu1 %699  ;;  %3281 = vmatprep.subr.bf16.mxu1 %v3477_v14  ;;  %v687_v31 = vmul.f32 %v4413_v36, %v4441_v52  ;;  %v686_v51 = vmul.f32 %v4441_v52, %v4419_v39  ;;  %v689_v54 = vmul.f32 %v4441_v52, %v4423_v41 }
 0x297   : > { %v4582_v2 = vsub.f32 %v4407_v33, %v729_v63  ;;  %v730_v53 = vmul.f32 0.03125, %v700_v50  ;;  %v1264_v3 = vmul.f32 %v1248_v1, %v1248_v1  ;;  %v1249_v7 = vmul.f32 %v4441_v52, %v4577_v56  ;;  %3282 = vmatpush3.bf16.msra.mxu1 %v3477_v14  ;;  %v3482_v1 = vld [vmem:[#allocation10] sm:$0xff]   ;;  %v3484_v14 = vld [vmem:[#allocation10 + $0x10] sm:$0xff]  }
 0x298   : > { %v702_v55 = vpop.xlane.xlu0 %701  ;;  %v688_v63 = vmul.f32 %v4417_v38, %v4441_v52  ;;  %3243 = vmatprep.subr.bf16.mxu0 %v3482_v1  ;;  %v691_v50 = vmul.f32 %v4421_v40, %v4441_v52 }
 0x299   : > { %v4587_v57 = vsub.f32 %v4411_v35, %v730_v53  ;;  %v731_v10 = vmul.f32 0.03125, %v702_v55  ;;  %1294 = vadd.xlane.f32.xlu0 %v1264_v3  ;;  %1292 = vadd.xlane.f32.xlu1 %v1263_v12  ;;  %v761_v11 = vmul.f32 %v4441_v52, %v4582_v2  ;;  %v1265_v33 = vmul.f32 %v1249_v7, %v1249_v7  ;;  %v3478_v35 = vld [vmem:[#allocation11 + $0x20] sm:$0xff]   ;;  %v3483_v53 = vld [vmem:[#allocation10 + $0x8] sm:$0xff]  }
 0x29a   : > { %v704_v17 = vpop.xlane.xlu1 %703  ;;  %3283 = vmatprep.subr.bf16.mxu1 %v3478_v35  ;;  %v690_v12 = vmul.f32 %v4441_v52, %v4427_v43  ;;  %3244 = vmatpush3.bf16.msra.mxu0 %v3482_v1  ;;  %v693_v3 = vmul.f32 %v4441_v52, %v4431_v46  ;;  %v692_v7 = vmul.f32 %v4425_v42, %v4441_v52 }
 0x29b   : > { %v4592_v18 = vsub.f32 %v4405_v32, %v731_v10  ;;  %v732_v19 = vmul.f32 0.03125, %v704_v17  ;;  %v777_v20 = vmul.f32 %v761_v11, %v761_v11  ;;  %v762_v61 = vmul.f32 %v4441_v52, %v4587_v57  ;;  %3284 = vmatpush3.bf16.msra.mxu1 %v3478_v35  ;;  %3245 = vmatprep.subr.bf16.mxu0 %v3483_v53  ;;  %v3485_v11 = vld [vmem:[#allocation10 + $0x18] sm:$0xff]  }
 0x29c   : > { %3285 = vmatprep.subr.bf16.mxu1 %v3479_v26  ;;  %v695_v55 = vmul.f32 %v4429_v45, %v4441_v52  ;;  %v694_v10 = vmul.f32 %v4441_v52, %v4438_v49  ;;  %v696_v17 = vmul.f32 %v4436_v48, %v4441_v52 }
 0x29d   : > { %v4597_v22 = vsub.f32 %v4409_v34, %v732_v19  ;;  %793 = vadd.xlane.f32.xlu0 %v777_v20  ;;  %1296 = vadd.xlane.f32.xlu1 %v1265_v33  ;;  %v763_v6 = vmul.f32 %v4441_v52, %v4592_v18  ;;  %v778_v25 = vmul.f32 %v762_v61, %v762_v61  ;;  %v3486_v33 = vld [vmem:[#allocation10 + $0x20] sm:$0xff]   ;;  %v3487_v19 = vld [vmem:[#allocation10 + $0x28] sm:$0xff]   ;;  %v3488_v20 = vld [vmem:[#allocation10 + $0x30] sm:$0xff]  }
 0x29e   : > { %v685_v34 = vmul.f32 %v4441_v52, %v4415_v37  ;;  %3246 = vmatpush3.bf16.msra.mxu0 %v3483_v53  ;;  %v3489_v61 = vld [vmem:[#allocation10 + $0x38] sm:$0xff]  }
 0x29f   : > { %v779_v24 = vmul.f32 %v763_v6, %v763_v6  ;;  %v764_v32 = vmul.f32 %v4441_v52, %v4597_v22  ;;  %3286 = vmatpush3.bf16.msra.mxu1 %v3479_v26  ;;  %3247 = vmatprep.subr.bf16.mxu0 %v3484_v14 }
 0x2a0   : > { %3287 = vmatprep.subr.bf16.mxu1 %v3480_v30 }
 0x2a1   : > { %797 = vadd.xlane.f32.xlu0 %v779_v24  ;;  %795 = vadd.xlane.f32.xlu1 %v778_v25  ;;  %v780_v27 = vmul.f32 %v764_v32, %v764_v32 }
 0x2a2   : > { %3248 = vmatpush3.bf16.msra.mxu0 %v3484_v14 }
 0x2a3   : > { %3288 = vmatpush3.bf16.msra.mxu1 %v3480_v30  ;;  %3249 = vmatprep.subr.bf16.mxu0 %v3485_v11 }
 0x2a4   : > { %3289 = vmatprep.subr.bf16.mxu1 %v3481_v16 }
 0x2a5   : > { %705 = vadd.xlane.f32.xlu0 %v685_v34  ;;  %799 = vadd.xlane.f32.xlu1 %v780_v27 }
 0x2a6   : > { %3250 = vmatpush3.bf16.msra.mxu0 %v3485_v11 }
 0x2a7   : > { %3290 = vmatpush3.bf16.msra.mxu1 %v3481_v16  ;;  %3251 = vmatprep.subr.bf16.mxu0 %v3486_v33 }
 0x2a9   : > { %709 = vadd.xlane.f32.xlu0 %v687_v31  ;;  %707 = vadd.xlane.f32.xlu1 %v686_v51  ;;  %v4628_v31 = vshrl.u32 %v435_v44, 7 }
 0x2aa   : > { %3252 = vmatpush3.bf16.msra.mxu0 %v3486_v33 }
 0x2ab   : > { %3253 = vmatprep.subr.bf16.mxu0 %v3487_v19 }
 0x2ad   : > { %713 = vadd.xlane.f32.xlu0 %v689_v54  ;;  %711 = vadd.xlane.f32.xlu1 %v688_v63 }
 0x2ae   : > { %3254 = vmatpush3.bf16.msra.mxu0 %v3487_v19 }
 0x2af   : > { %3255 = vmatprep.subr.bf16.mxu0 %v3488_v20 }
 0x2b1   : > { %717 = vadd.xlane.f32.xlu0 %v691_v50  ;;  %715 = vadd.xlane.f32.xlu1 %v690_v12  ;;  %v1364_v12 = vsub.s32 2, %v4628_v31 }
 0x2b2   : > { %3256 = vmatpush3.bf16.msra.mxu0 %v3488_v20 }
 0x2b3   : > { %3257 = vmatprep.subr.bf16.mxu0 %v3489_v61 }
 0x2b5   : > { %721 = vadd.xlane.f32.xlu0 %v693_v3  ;;  %719 = vadd.xlane.f32.xlu1 %v692_v7  ;;  %v4634_v7 = vld [vmem:[%s5555_s6] sm:$0xff] }
 0x2b6   : > { %3258 = vmatpush3.bf16.msra.mxu0 %v3489_v61  ;;  %v1384_v61 = vsub.s32 3, %v4628_v31 }
 0x2b9   : > { %725 = vadd.xlane.f32.xlu0 %v695_v55  ;;  %723 = vadd.xlane.f32.xlu1 %v694_v10 }
 0x2bd   : > { %727 = vadd.xlane.f32.xlu1 %v696_v17  ;;  %v4637_v17 = vrot.slane %v4634_v7, %v1364_v12 }
 0x30a   : > { %v1267_v35 = vpop.xlane.xlu0 %1266 }
 0x30b   : > { %v1298_v6 = vmul.f32 0.03125, %v1267_v35 }
 0x30d   : > { %v1314_v24 = vadd.f32 1e-05, %v1298_v6 }
 0x30e   : > { %v1271_v25 = vpop.xlane.xlu0 %1270  ;;  %v1269_v32 = vpop.xlane.xlu1 %1268 }
 0x30f   : > { %3490 = vrsqrt.f32 %v1314_v24  ;;  %v1300_v26 = vmul.f32 0.03125, %v1271_v25  ;;  %v1299_v34 = vmul.f32 0.03125, %v1269_v32 }
 0x311   : > { %v1316_v27 = vadd.f32 1e-05, %v1300_v26  ;;  %v1315_v30 = vadd.f32 1e-05, %v1299_v34 }
 0x312   : > { %v1275_v51 = vpop.xlane.xlu0 %1274  ;;  %v1273_v16 = vpop.xlane.xlu1 %1272 }
 0x313   : > { %3492 = vrsqrt.f32 %v1316_v27  ;;  %v1302_v54 = vmul.f32 0.03125, %v1275_v51  ;;  %v1301_v63 = vmul.f32 0.03125, %v1273_v16  ;;  %v4644_v16 = vrot.slane %v4634_v7, %v1384_v61 }
 0x314   : > { %3494 = vrsqrt.f32 %v1315_v30 }
 0x315   : > { %v1318_v1 = vadd.f32 1e-05, %v1302_v54  ;;  %v1317_v50 = vadd.f32 1e-05, %v1301_v63 }
 0x316   : > { %v1279_v53 = vpop.xlane.xlu0 %1278  ;;  %v1277_v3 = vpop.xlane.xlu1 %1276 }
 0x317   : > { %3496 = vrsqrt.f32 %v1318_v1  ;;  %v1304_v44 = vmul.f32 0.03125, %v1279_v53  ;;  %v1303_v14 = vmul.f32 0.03125, %v1277_v3 }
 0x318   : > { %3498 = vrsqrt.f32 %v1317_v50 }
 0x319   : > { %v3491_v55 = vpop.eup %3490  ;;  %v1320_v10 = vadd.f32 1e-05, %v1304_v44  ;;  %v1319_v11 = vadd.f32 1e-05, %v1303_v14 }
 0x31a   : > { %v1283_v33 = vpop.xlane.xlu0 %1282  ;;  %v1281_v19 = vpop.xlane.xlu1 %1280  ;;  %v1346_v20 = vmul.f32 %v3491_v55, %v4508_v29 }
 0x31b   : > { %3500 = vrsqrt.f32 %v1320_v10  ;;  %v1306_v35 = vmul.f32 0.03125, %v1283_v33  ;;  %v1305_v6 = vmul.f32 0.03125, %v1281_v19 }
 0x31c   : > { %3502 = vrsqrt.f32 %v1319_v11  ;;  %v1366_v51 = vmul.f32 %v4637_v17, %v1346_v20 }
 0x31d   : > { %v3493_v24 = vpop.eup %3492  ;;  %v1322_v25 = vadd.f32 1e-05, %v1306_v35  ;;  %v1321_v32 = vadd.f32 1e-05, %v1305_v6 }
 0x31e   : > { %v3495_v26 = vpop.eup %3494  ;;  %v1348_v34 = vmul.f32 %v3493_v24, %v4506_v28  ;;  %v1287_v27 = vpop.xlane.xlu0 %1286  ;;  %v1386_v55 = vadd.f32 %v4644_v16, %v1366_v51 }
 0x31f   : > { %v1285_v30 = vpop.xlane.xlu1 %1284  ;;  %3504 = vrsqrt.f32 %v1322_v25  ;;  %v1308_v29 = vmul.f32 0.03125, %v1287_v27  ;;  %v1347_v63 = vmul.f32 %v3495_v26, %v4515_v59 }
 0x320   : > { %v1307_v54 = vmul.f32 0.03125, %v1285_v30  ;;  %v1368_v1 = vmul.f32 %v4637_v17, %v1348_v34  ;;  %3506 = vrsqrt.f32 %v1321_v32  ;;  %v1402_v34 = vmax.f32 %v1386_v55, 0.0 }
 0x321   : > { %v3497_v50 = vpop.eup %3496  ;;  %v1324_v12 = vadd.f32 1e-05, %v1308_v29  ;;  %v1367_v28 = vmul.f32 %v4637_v17, %v1347_v63 }
 0x322   : > { %v1323_v53 = vadd.f32 1e-05, %v1307_v54  ;;  %v3499_v3 = vpop.eup %3498  ;;  %v1291_v44 = vpop.xlane.xlu0 %1290  ;;  %v1350_v10 = vmul.f32 %v3497_v50, %v4524_v9  ;;  %v1388_v20 = vadd.f32 %v4644_v16, %v1368_v1 }
 0x323   : > { %v1289_v14 = vpop.xlane.xlu1 %1288  ;;  %v1349_v11 = vmul.f32 %v3499_v3, %v4513_v58  ;;  %3508 = vrsqrt.f32 %v1324_v12  ;;  %v1310_v33 = vmul.f32 0.03125, %v1291_v44  ;;  %v1387_v19 = vadd.f32 %v4644_v16, %v1367_v28 }
 0x324   : > { %v1309_v59 = vmul.f32 0.03125, %v1289_v14  ;;  %3510 = vrsqrt.f32 %v1323_v53  ;;  %v1370_v25 = vmul.f32 %v4637_v17, %v1350_v10  ;;  %v1404_v63 = vmax.f32 %v1388_v20, 0.0 }
 0x325   : > { %v3501_v61 = vpop.eup %3500  ;;  %v1369_v35 = vmul.f32 %v4637_v17, %v1349_v11  ;;  %v1326_v6 = vadd.f32 1e-05, %v1310_v33  ;;  %v1403_v58 = vmax.f32 %v1387_v19, 0.0  ;;  %v891_v33 = vsub.s32 0, %v4628_v31 }
 0x326   : > { %v1325_v24 = vadd.f32 1e-05, %v1309_v59  ;;  %v3503_v32 = vpop.eup %3502  ;;  %v1295_v26 = vpop.xlane.xlu0 %1294  ;;  %v1352_v27 = vmul.f32 %v3501_v61, %v4532_v21  ;;  %v1390_v3 = vadd.f32 %v4644_v16, %v1370_v25 }
 0x327   : > { %v1293_v9 = vpop.xlane.xlu1 %1292  ;;  %3512 = vrsqrt.f32 %v1326_v6  ;;  %v1312_v30 = vmul.f32 0.03125, %v1295_v26  ;;  %v1389_v29 = vadd.f32 %v4644_v16, %v1369_v35  ;;  %v1851_v54 = vpack.c.bf16 %v1403_v58, %v1402_v34 }
 0x328   : > { %v1311_v51 = vmul.f32 0.03125, %v1293_v9  ;;  %3514 = vrsqrt.f32 %v1325_v24  ;;  %v1351_v1 = vmul.f32 %v3503_v32, %v4527_v15  ;;  %v1372_v10 = vmul.f32 %v4637_v17, %v1352_v27 }
 0x329   : > { %v3505_v50 = vpop.eup %3504  ;;  %v1328_v12 = vadd.f32 1e-05, %v1312_v30  ;;  %v1405_v28 = vmax.f32 %v1389_v29, 0.0  ;;  %3291 = vmatprep.mubr.bf16.mxu1 %v1851_v54  ;;  %v911_v35 = vsub.s32 1, %v4628_v31  ;;  %v1406_v32 = vmax.f32 %v1390_v3, 0.0 }
 0x32a   : > { %v1327_v53 = vadd.f32 1e-05, %v1311_v51  ;;  %v3507_v44 = vpop.eup %3506  ;;  %v794_v14 = vpop.xlane.xlu0 %793  ;;  %v1371_v55 = vmul.f32 %v4637_v17, %v1351_v1  ;;  %v1354_v11 = vmul.f32 %v3505_v50, %v4542_v60  ;;  %v1392_v30 = vadd.f32 %v4644_v16, %v1372_v10 }
 0x32b   : > { %v1297_v21 = vpop.xlane.xlu1 %1296  ;;  %3516 = vrsqrt.f32 %v1328_v12  ;;  %v825_v15 = vmul.f32 0.03125, %v794_v14  ;;  %v1852_v19 = vpack.c.bf16 %v1405_v28, %v1404_v63  ;;  %v1353_v61 = vmul.f32 %v3507_v44, %v4537_v0 }
 0x32c   : > { %v1313_v59 = vmul.f32 0.03125, %v1297_v21  ;;  %3518 = vrsqrt.f32 %v1327_v53  ;;  %v1391_v20 = vadd.f32 %v4644_v16, %v1371_v55  ;;  %v1374_v60 = vmul.f32 %v4637_v17, %v1354_v11 }
 0x32d   : > { %v3509_v6 = vpop.eup %3508  ;;  %v841_v24 = vadd.f32 1e-05, %v825_v15  ;;  %3292 = vmatmul.mubr.bf16.vlgmr.msra.gmra.mrb[32].mxu1 %v1852_v19  ;;  %v1373_v27 = vmul.f32 %v4637_v17, %v1353_v61  ;;  %v1408_v55 = vmax.f32 %v1392_v30, 0.0  ;;  %v4690_v30 = vrot.slane %v4634_v7, %v911_v35 }
 0x32e   : > { %v1329_v25 = vadd.f32 1e-05, %v1313_v59  ;;  %v3511_v26 = vpop.eup %3510  ;;  %v798_v9 = vpop.xlane.xlu0 %797  ;;  %v1407_v58 = vmax.f32 %v1391_v20, 0.0  ;;  %v1356_v51 = vmul.f32 %v3509_v6, %v4552_v5  ;;  %v1394_v50 = vadd.f32 %v4644_v16, %v1374_v60 }
 0x32f   : > { %v796_v34 = vpop.xlane.xlu1 %795  ;;  %3520 = vrsqrt.f32 %v841_v24  ;;  %v827_v0 = vmul.f32 0.03125, %v798_v9  ;;  %v1355_v54 = vmul.f32 %v3511_v26, %v4547_v62  ;;  %v1393_v1 = vadd.f32 %v4644_v16, %v1373_v27 }
 0x330   : > { %v826_v29 = vmul.f32 0.03125, %v796_v34  ;;  %3522 = vrsqrt.f32 %v1329_v25  ;;  %v1853_v63 = vpack.c.bf16 %v1407_v58, %v1406_v32  ;;  %v1376_v44 = vmul.f32 %v4637_v17, %v1356_v51 }
 0x331   : > { %v3513_v12 = vpop.eup %3512  ;;  %v843_v53 = vadd.f32 1e-05, %v827_v0  ;;  %v1375_v3 = vmul.f32 %v4637_v17, %v1355_v54  ;;  %v1409_v10 = vmax.f32 %v1393_v1, 0.0  ;;  %v1410_v62 = vmax.f32 %v1394_v50, 0.0 }
 0x332   : > { %v842_v28 = vadd.f32 1e-05, %v826_v29  ;;  %v3515_v14 = vpop.eup %3514  ;;  %3295 = vmatprep.mubr.bf16.mxu1 %v1853_v63  ;;  %v706_v5 = vpop.xlane.xlu0 %705  ;;  %v1358_v11 = vmul.f32 %v3513_v12, %v4562_v4  ;;  %v1396_v6 = vadd.f32 %v4644_v16, %v1376_v44 }
 0x333   : > { %v800_v21 = vpop.xlane.xlu1 %799  ;;  %3524 = vrsqrt.f32 %v843_v53  ;;  %v733_v15 = vmul.f32 0.03125, %v706_v5  ;;  %v1395_v19 = vadd.f32 %v4644_v16, %v1375_v3  ;;  %v1854_v20 = vpack.c.bf16 %v1409_v10, %v1408_v55 }
 0x334   : > { %v828_v59 = vmul.f32 0.03125, %v800_v21  ;;  %3526 = vrsqrt.f32 %v842_v28  ;;  %v1357_v61 = vmul.f32 %v3515_v14, %v4557_v8  ;;  %v1378_v26 = vmul.f32 %v4637_v17, %v1358_v11 }
 0x335   : > { %v3517_v24 = vpop.eup %3516  ;;  %v4681_v25 = vsub.f32 %v4415_v37, %v733_v15  ;;  %v1411_v60 = vmax.f32 %v1395_v19, 0.0  ;;  %3296 = vmatmul.mubr.bf16.gmra.mrb[36].mxu1 %v1854_v20  ;;  %v4687_v8 = vrot.slane %v4634_v7, %v891_v33  ;;  %v1412_v35 = vmax.f32 %v1396_v6, 0.0 }
 0x336   : > { %v844_v32 = vadd.f32 1e-05, %v828_v59  ;;  %v3519_v4 = vpop.eup %3518  ;;  %v710_v9 = vpop.xlane.xlu0 %709  ;;  %v1377_v58 = vmul.f32 %v4637_v17, %v1357_v61  ;;  %v1360_v27 = vmul.f32 %v3517_v24, %v4572_v13  ;;  %v1398_v1 = vadd.f32 %v4644_v16, %v1378_v26 }
 0x337   : > { %v708_v34 = vpop.xlane.xlu1 %707  ;;  %v735_v37 = vmul.f32 0.03125, %v710_v9  ;;  %v1855_v0 = vpack.c.bf16 %v1411_v60, %v1410_v62  ;;  %v765_v29 = vmul.f32 %v4441_v52, %v4681_v25  ;;  %v1359_v63 = vmul.f32 %v3519_v4, %v4567_v23 }
 0x338   : > { %3528 = vrsqrt.f32 %v844_v32  ;;  %v734_v51 = vmul.f32 0.03125, %v708_v34  ;;  %v1397_v54 = vadd.f32 %v4644_v16, %v1377_v58  ;;  %v1380_v50 = vmul.f32 %v4637_v17, %v1360_v27 }
 0x339   : > { %v3521_v13 = vpop.eup %3520  ;;  %v4698_v33 = vsub.f32 %v4413_v36, %v735_v37  ;;  %3299 = vmatprep.mubr.bf16.mxu1 %v1855_v0  ;;  %v781_v3 = vmul.f32 %v765_v29, %v765_v29  ;;  %v1379_v23 = vmul.f32 %v4637_v17, %v1359_v63  ;;  %v1414_v14 = vmax.f32 %v1398_v1, 0.0 }
 0x33a   : > { %v4701_v7 = vsub.f32 %v4419_v39, %v734_v51  ;;  %v3523_v12 = vpop.eup %3522  ;;  %v714_v53 = vpop.xlane.xlu0 %713  ;;  %v1413_v44 = vmax.f32 %v1397_v54, 0.0  ;;  %v1400_v11 = vadd.f32 %v4644_v16, %v1380_v50 }
 0x33b   : > { %v712_v28 = vpop.xlane.xlu1 %711  ;;  %v737_v5 = vmul.f32 0.03125, %v714_v53  ;;  %v767_v36 = vmul.f32 %v4441_v52, %v4698_v33  ;;  %801 = vadd.xlane.f32.xlu0 %v781_v3  ;;  %v1399_v10 = vadd.f32 %v4644_v16, %v1379_v23  ;;  %v1361_v62 = vmul.f32 %v3523_v12, %v4577_v56 }
 0x33c   : > { %v736_v21 = vmul.f32 0.03125, %v712_v28  ;;  %v766_v39 = vmul.f32 %v4441_v52, %v4701_v7  ;;  %v1856_v55 = vpack.c.bf16 %v1413_v44, %v1412_v35  ;;  %v1416_v4 = vmax.f32 %v1400_v11, 0.0 }
 0x33d   : > { %v3525_v15 = vpop.eup %3524  ;;  %v4713_v59 = vsub.f32 %v4423_v41, %v737_v5  ;;  %v783_v20 = vmul.f32 %v767_v36, %v767_v36  ;;  %v1415_v60 = vmax.f32 %v1399_v10, 0.0  ;;  %v1381_v26 = vmul.f32 %v4637_v17, %v1361_v62 }
 0x33e   : > { %v4716_v19 = vsub.f32 %v4417_v38, %v736_v21  ;;  %v782_v61 = vmul.f32 %v766_v39, %v766_v39  ;;  %v3527_v6 = vpop.eup %3526  ;;  %3300 = vmatmul.mubr.bf16.gmra.mrb[40].mxu1 %v1856_v55  ;;  %v718_v24 = vpop.xlane.xlu0 %717  ;;  %v873_v56 = vmul.f32 %v3521_v13, %v4582_v2 }
 0x33f   : > { %v716_v32 = vpop.xlane.xlu1 %715  ;;  %v739_v9 = vmul.f32 0.03125, %v718_v24  ;;  %v769_v41 = vmul.f32 %v4441_v52, %v4713_v59  ;;  %805 = vadd.xlane.f32.xlu0 %v783_v20  ;;  %v1857_v58 = vpack.c.bf16 %v1415_v60, %v1414_v14  ;;  %v1401_v27 = vadd.f32 %v4644_v16, %v1381_v26 }
 0x340   : > { %v738_v34 = vmul.f32 0.03125, %v716_v32  ;;  %803 = vadd.xlane.f32.xlu1 %v782_v61  ;;  %v768_v38 = vmul.f32 %v4441_v52, %v4716_v19  ;;  %v874_v37 = vmul.f32 %v3527_v6, %v4587_v57  ;;  %v893_v17 = vmul.f32 %v4687_v8, %v873_v56 }
 0x341   : > { %v4728_v2 = vsub.f32 %v4421_v40, %v739_v9  ;;  %v785_v29 = vmul.f32 %v769_v41, %v769_v41  ;;  %3303 = vmatprep.mubr.bf16.mxu1 %v1857_v58  ;;  %v1417_v1 = vmax.f32 %v1401_v27, 0.0  ;;  %v875_v57 = vmul.f32 %v3525_v15, %v4592_v18 }
 0x342   : > { %v3529_v51 = vpop.eup %3528  ;;  %v4731_v0 = vsub.f32 %v4427_v43, %v738_v34  ;;  %v784_v54 = vmul.f32 %v768_v38, %v768_v38  ;;  %v722_v63 = vpop.xlane.xlu0 %721  ;;  %v894_v13 = vmul.f32 %v4687_v8, %v874_v37  ;;  %v913_v16 = vadd.f32 %v4690_v30, %v893_v17 }
 0x343   : > { %v741_v35 = vmul.f32 0.03125, %v722_v63  ;;  %v876_v50 = vmul.f32 %v3529_v51, %v4597_v22  ;;  %809 = vadd.xlane.f32.xlu0 %v785_v29  ;;  %v1858_v43 = vpack.c.bf16 %v1417_v1, %v1416_v4  ;;  %v895_v53 = vmul.f32 %v4687_v8, %v875_v57  ;;  %v4747_v55 = vpop.xlane.xlu1 %719 }
 0x344   : > { %807 = vadd.xlane.f32.xlu1 %v784_v54  ;;  %v770_v40 = vmul.f32 %v4441_v52, %v4731_v0  ;;  %v914_v12 = vadd.f32 %v4690_v30, %v894_v13  ;;  %v929_v18 = vmax.f32 %v913_v16, 0.0 }
 0x345   : > { %v4742_v28 = vsub.f32 %v4431_v46, %v741_v35  ;;  %v896_v44 = vmul.f32 %v4687_v8, %v876_v50  ;;  %v915_v14 = vadd.f32 %v4690_v30, %v895_v53 }
 0x346   : > { %v786_v3 = vmul.f32 %v770_v40, %v770_v40  ;;  %3304 = vmatmul.mubr.bf16.gmra.mrb[44].mxu1 %v1858_v43  ;;  %v930_v23 = vmax.f32 %v914_v12, 0.0  ;;  %v4751_v10 = vpop.xlane.xlu0 %725 }
 0x347   : > { %v916_v22 = vadd.f32 %v4690_v30, %v896_v44  ;;  %v931_v21 = vmax.f32 %v915_v14, 0.0  ;;  %v4749_v46 = vpop.xlane.xlu1 %723 }
 0x348   : > { %811 = vadd.xlane.f32.xlu1 %v786_v3  ;;  %v1418_v5 = vpack.c.bf16 %v930_v23, %v929_v18 }
 0x349   : > { %v932_v36 = vmax.f32 %v916_v22, 0.0 }
 0x34a   : > { %3259 = vmatprep.mubr.bf16.mxu0 %v1418_v5 }
 0x34b   : > { %v1419_v39 = vpack.c.bf16 %v932_v36, %v931_v21  ;;  %v4753_v62 = vpop.xlane.xlu1 %727 }
 0x34d   : > { %3260 = vmatmul.mubr.bf16.vlgmr.msra.gmra.mrb[0].mxu0 %v1419_v39 }
 0x3c8   : > { %v802_v11 = vpop.xlane.xlu0 %801 }
 0x3c9   : > { %v829_v15 = vmul.f32 0.03125, %v802_v11 }
 0x3cb   : > { %v845_v20 = vadd.f32 1e-05, %v829_v15 }
 0x3cc   : > { %v806_v6 = vpop.xlane.xlu0 %805 }
 0x3cd   : > { %v804_v61 = vpop.xlane.xlu1 %803  ;;  %3530 = vrsqrt.f32 %v845_v20  ;;  %v831_v32 = vmul.f32 0.03125, %v806_v6 }
 0x3ce   : > { %v830_v24 = vmul.f32 0.03125, %v804_v61  ;;  %v740_v61 = vmul.f32 0.03125, %v4747_v55 }
 0x3cf   : > { %v847_v26 = vadd.f32 1e-05, %v831_v32 }
 0x3d0   : > { %v846_v60 = vadd.f32 1e-05, %v830_v24  ;;  %v810_v56 = vpop.xlane.xlu0 %809 }
 0x3d1   : > { %v808_v4 = vpop.xlane.xlu1 %807  ;;  %v833_v34 = vmul.f32 0.03125, %v810_v56 }
 0x3d2   : > { %3532 = vrsqrt.f32 %v846_v60  ;;  %v832_v9 = vmul.f32 0.03125, %v808_v4  ;;  %v742_v4 = vmul.f32 0.03125, %v4749_v46 }
 0x3d3   : > { %3534 = vrsqrt.f32 %v847_v26  ;;  %v849_v38 = vadd.f32 1e-05, %v833_v34  ;;  %v4785_v26 = vsub.f32 %v4425_v42, %v740_v61 }
 0x3d4   : > { %v848_v41 = vadd.f32 1e-05, %v832_v9  ;;  %v771_v9 = vmul.f32 %v4441_v52, %v4728_v2  ;;  %v4795_v34 = vsub.f32 %v4438_v49, %v742_v4 }
 0x3d5   : > { %v812_v58 = vpop.xlane.xlu1 %811  ;;  %v772_v46 = vmul.f32 %v4441_v52, %v4785_v26 }
 0x3d6   : > { %3536 = vrsqrt.f32 %v848_v41  ;;  %v834_v27 = vmul.f32 0.03125, %v812_v58 }
 0x3d7   : > { %3538 = vrsqrt.f32 %v849_v38  ;;  %v3531_v17 = vpop.eup %3530  ;;  %v743_v38 = vmul.f32 0.03125, %v4751_v10 }
 0x3d8   : > { %v850_v37 = vadd.f32 1e-05, %v834_v27  ;;  %v877_v51 = vmul.f32 %v3531_v17, %v4681_v25  ;;  %v787_v27 = vmul.f32 %v771_v9, %v771_v9  ;;  %v744_v17 = vmul.f32 0.03125, %v4753_v62 }
 0x3d9   : > { %v4816_v10 = vsub.f32 %v4429_v45, %v743_v38 }
 0x3da   : > { %3540 = vrsqrt.f32 %v850_v37  ;;  %v897_v54 = vmul.f32 %v4687_v8, %v877_v51  ;;  %v773_v37 = vmul.f32 %v4441_v52, %v4742_v28 }
 0x3dc   : > { %v3533_v29 = vpop.eup %3532  ;;  %v917_v57 = vadd.f32 %v4690_v30, %v897_v54  ;;  %v774_v54 = vmul.f32 %v4441_v52, %v4795_v34 }
 0x3dd   : > { %v3535_v63 = vpop.eup %3534  ;;  %v878_v1 = vmul.f32 %v3533_v29, %v4701_v7  ;;  %v788_v29 = vmul.f32 %v772_v46, %v772_v46 }
 0x3de   : > { %v879_v13 = vmul.f32 %v3535_v63, %v4698_v33  ;;  %v933_v53 = vmax.f32 %v917_v57, 0.0  ;;  %v789_v63 = vmul.f32 %v773_v37, %v773_v37 }
 0x3df   : > { %v898_v16 = vmul.f32 %v4687_v8, %v878_v1  ;;  %v4819_v1 = vsub.f32 %v4436_v48, %v744_v17 }
 0x3e0   : > { %v3537_v35 = vpop.eup %3536  ;;  %v899_v40 = vmul.f32 %v4687_v8, %v879_v13  ;;  %v790_v13 = vmul.f32 %v774_v54, %v774_v54 }
 0x3e1   : > { %v3539_v50 = vpop.eup %3538  ;;  %v918_v43 = vadd.f32 %v4690_v30, %v898_v16  ;;  %v880_v25 = vmul.f32 %v3537_v35, %v4716_v19  ;;  %v775_v35 = vmul.f32 %v4441_v52, %v4816_v10 }
 0x3e2   : > { %v881_v12 = vmul.f32 %v3539_v50, %v4713_v59  ;;  %v919_v33 = vadd.f32 %v4690_v30, %v899_v40  ;;  %v776_v50 = vmul.f32 %v4441_v52, %v4819_v1 }
 0x3e3   : > { %v934_v3 = vmax.f32 %v918_v43, 0.0  ;;  %v900_v7 = vmul.f32 %v4687_v8, %v880_v25  ;;  %v791_v43 = vmul.f32 %v775_v35, %v775_v35 }
 0x3e4   : > { %v3541_v44 = vpop.eup %3540  ;;  %v901_v18 = vmul.f32 %v4687_v8, %v881_v12  ;;  %v935_v5 = vmax.f32 %v919_v33, 0.0  ;;  %v792_v25 = vmul.f32 %v776_v50, %v776_v50 }
 0x3e5   : > { %v1420_v23 = vpack.c.bf16 %v934_v3, %v933_v53  ;;  %v920_v14 = vadd.f32 %v4690_v30, %v900_v7  ;;  %v882_v22 = vmul.f32 %v3541_v44, %v4731_v0 }
 0x3e6   : > { %v921_v59 = vadd.f32 %v4690_v30, %v901_v18 }
 0x3e7   : > { %3263 = vmatprep.mubr.bf16.mxu0 %v1420_v23  ;;  %v936_v21 = vmax.f32 %v920_v14, 0.0  ;;  %v902_v19 = vmul.f32 %v4687_v8, %v882_v22 }
 0x3e8   : > { %v937_v11 = vmax.f32 %v921_v59, 0.0 }
 0x3e9   : > { %v1421_v36 = vpack.c.bf16 %v936_v21, %v935_v5  ;;  %v922_v39 = vadd.f32 %v4690_v30, %v902_v19 }
 0x3eb   : > { %3264 = vmatmul.mubr.bf16.gmra.mrb[4].mxu0 %v1421_v36  ;;  %v938_v15 = vmax.f32 %v922_v39, 0.0 }
 0x3ed   : > { %v1422_v20 = vpack.c.bf16 %v938_v15, %v937_v11 }
 0x3ef   : > { %3267 = vmatprep.mubr.bf16.mxu0 %v1422_v20 }
 0x400   : > { %v4774_v6 = vpop.f32.mrb[32].mxu1 }
 0x401   : > { %v4776_v0 = vpop.f32.mrb[33].mxu1  ;;  %v2022_v56 = vmul.f32 %v4774_v6, %v4441_v52 }
 0x402   : > { %v4778_v24 = vpop.f32.mrb[34].mxu1  ;;  %v2020_v32 = vmul.f32 %v4441_v52, %v4776_v0 }
 0x403   : > { %v4782_v60 = vpop.f32.mrb[35].mxu1  ;;  %v2023_v42 = vmul.f32 %v4778_v24, %v4441_v52 }
 0x404   : > { %2036 = vadd.xlane.f32.xlu0 %v2020_v32  ;;  %v2021_v55 = vmul.f32 %v4441_v52, %v4782_v60 }
 0x406   : > { %2038 = vadd.xlane.f32.xlu1 %v2021_v55 }
 0x408   : > { %2040 = vadd.xlane.f32.xlu0 %v2022_v56  ;;  %v4801_v41 = vpop.f32.mrb[36].mxu1 }
 0x409   : > { %v4804_v58 = vpop.f32.mrb[37].mxu1  ;;  %v2026_v3 = vmul.f32 %v4801_v41, %v4441_v52 }
 0x40a   : > { %2042 = vadd.xlane.f32.xlu1 %v2023_v42  ;;  %v4808_v49 = vpop.f32.mrb[38].mxu1  ;;  %v2024_v57 = vmul.f32 %v4441_v52, %v4804_v58 }
 0x40b   : > { %v4811_v51 = vpop.f32.mrb[39].mxu1  ;;  %v2027_v44 = vmul.f32 %v4808_v49, %v4441_v52 }
 0x40c   : > { %813 = vadd.xlane.f32.xlu0 %v787_v27  ;;  %v2025_v48 = vmul.f32 %v4441_v52, %v4811_v51 }
 0x40e   : > { %815 = vadd.xlane.f32.xlu1 %v788_v29 }
 0x410   : > { %817 = vadd.xlane.f32.xlu0 %v789_v63 }
 0x411   : > { %v4821_v16 = vpop.f32.mrb[40].mxu1 }
 0x412   : > { %v4823_v62 = vpop.f32.mrb[41].mxu1  ;;  %819 = vadd.xlane.f32.xlu1 %v790_v13  ;;  %v2030_v21 = vmul.f32 %v4821_v16, %v4441_v52 }
 0x413   : > { %v4829_v45 = vpop.f32.mrb[42].mxu1  ;;  %v2028_v18 = vmul.f32 %v4441_v52, %v4823_v62 }
 0x414   : > { %v4831_v40 = vpop.f32.mrb[43].mxu1  ;;  %2044 = vadd.xlane.f32.xlu0 %v2024_v57  ;;  %v2031_v59 = vmul.f32 %v4829_v45, %v4441_v52 }
 0x415   : > { %v2029_v14 = vmul.f32 %v4441_v52, %v4831_v40 }
 0x416   : > { %2046 = vadd.xlane.f32.xlu1 %v2025_v48 }
 0x418   : > { %821 = vadd.xlane.f32.xlu0 %v791_v43 }
 0x419   : > { %v4837_v12 = vpop.f32.mrb[44].mxu1 }
 0x41a   : > { %v4839_v53 = vpop.f32.mrb[45].mxu1  ;;  %823 = vadd.xlane.f32.xlu1 %v792_v25  ;;  %v2034_v11 = vmul.f32 %v4837_v12, %v4441_v52 }
 0x41b   : > { %v4843_v7 = vpop.f32.mrb[46].mxu1  ;;  %v2032_v36 = vmul.f32 %v4441_v52, %v4839_v53 }
 0x41c   : > { %v4845_v33 = vpop.f32.mrb[47].mxu1  ;;  %2048 = vadd.xlane.f32.xlu0 %v2026_v3  ;;  %v2035_v15 = vmul.f32 %v4843_v7, %v4441_v52 }
 0x41d   : > { %v2033_v39 = vmul.f32 %v4441_v52, %v4845_v33 }
 0x41e   : > { %2050 = vadd.xlane.f32.xlu1 %v2027_v44 }
 0x420   : > { %2052 = vadd.xlane.f32.xlu0 %v2028_v18  ;;  %v4851_v23 = vpop.f32.mrb[0].mxu0 }
 0x421   : > { %v4855_v22 = vpop.f32.mrb[1].mxu0  ;;  %v1589_v32 = vmul.f32 %v4851_v23, %v4441_v52 }
 0x422   : > { %2054 = vadd.xlane.f32.xlu1 %v2029_v14  ;;  %v4857_v5 = vpop.f32.mrb[2].mxu0  ;;  %v1587_v20 = vmul.f32 %v4441_v52, %v4855_v22 }
 0x423   : > { %v4861_v19 = vpop.f32.mrb[3].mxu0  ;;  %v1590_v4 = vmul.f32 %v4857_v5, %v4441_v52 }
 0x424   : > { %2056 = vadd.xlane.f32.xlu0 %v2030_v21  ;;  %v1588_v61 = vmul.f32 %v4441_v52, %v4861_v19 }
 0x426   : > { %2058 = vadd.xlane.f32.xlu1 %v2031_v59 }
 0x428   : > { %2060 = vadd.xlane.f32.xlu0 %v2032_v36 }
 0x42a   : > { %2062 = vadd.xlane.f32.xlu1 %v2033_v39 }
 0x42c   : > { %2064 = vadd.xlane.f32.xlu0 %v2034_v11 }
 0x42e   : > { %2066 = vadd.xlane.f32.xlu1 %v2035_v15 }
 0x430   : > { %1603 = vadd.xlane.f32.xlu0 %v1587_v20 }
 0x432   : > { %1605 = vadd.xlane.f32.xlu1 %v1588_v61 }
 0x434   : > { %1607 = vadd.xlane.f32.xlu0 %v1589_v32 }
 0x436   : > { %1609 = vadd.xlane.f32.xlu1 %v1590_v4 }
 0x491   : > { %v2037_v55 = vpop.xlane.xlu0 %2036 }
 0x492   : > { %v2068_v56 = vmul.f32 0.03125, %v2037_v55 }
 0x493   : > { %v2039_v9 = vpop.xlane.xlu1 %2038 }
 0x494   : > { %v4882_v42 = vsub.f32 %v4776_v0, %v2068_v56  ;;  %v2069_v46 = vmul.f32 0.03125, %v2039_v9 }
 0x495   : > { %v2041_v38 = vpop.xlane.xlu0 %2040 }
 0x496   : > { %v4885_v27 = vsub.f32 %v4782_v60, %v2069_v46  ;;  %v2070_v37 = vmul.f32 0.03125, %v2041_v38  ;;  %v2100_v17 = vmul.f32 %v4441_v52, %v4882_v42 }
 0x497   : > { %v2043_v29 = vpop.xlane.xlu1 %2042 }
 0x498   : > { %v4890_v54 = vsub.f32 %v4774_v6, %v2070_v37  ;;  %v2071_v63 = vmul.f32 0.03125, %v2043_v29  ;;  %v2116_v13 = vmul.f32 %v2100_v17, %v2100_v17  ;;  %v2101_v57 = vmul.f32 %v4441_v52, %v4885_v27 }
 0x499   : > { %v814_v0 = vpop.xlane.xlu0 %813 }
 0x49a   : > { %v4895_v35 = vsub.f32 %v4778_v24, %v2071_v63  ;;  %v835_v48 = vmul.f32 0.03125, %v814_v0  ;;  %2132 = vadd.xlane.f32.xlu0 %v2116_v13  ;;  %v2117_v60 = vmul.f32 %v2101_v57, %v2101_v57  ;;  %v2102_v50 = vmul.f32 %v4441_v52, %v4890_v54 }
 0x49b   : > { %v816_v43 = vpop.xlane.xlu1 %815 }
 0x49c   : > { %v851_v25 = vadd.f32 1e-05, %v835_v48  ;;  %v836_v3 = vmul.f32 0.03125, %v816_v43  ;;  %2134 = vadd.xlane.f32.xlu1 %v2117_v60  ;;  %v2118_v6 = vmul.f32 %v2102_v50, %v2102_v50  ;;  %v2103_v44 = vmul.f32 %v4441_v52, %v4895_v35 }
 0x49d   : > { %v818_v18 = vpop.xlane.xlu0 %817 }
 0x49e   : > { %3542 = vrsqrt.f32 %v851_v25  ;;  %v852_v14 = vadd.f32 1e-05, %v836_v3  ;;  %v837_v21 = vmul.f32 0.03125, %v818_v18  ;;  %2136 = vadd.xlane.f32.xlu0 %v2118_v6  ;;  %v2119_v24 = vmul.f32 %v2103_v44, %v2103_v44 }
 0x49f   : > { %v820_v59 = vpop.xlane.xlu1 %819 }
 0x4a0   : > { %3544 = vrsqrt.f32 %v852_v14  ;;  %v853_v36 = vadd.f32 1e-05, %v837_v21  ;;  %v838_v39 = vmul.f32 0.03125, %v820_v59  ;;  %2138 = vadd.xlane.f32.xlu1 %v2119_v24 }
 0x4a1   : > { %v2045_v11 = vpop.xlane.xlu0 %2044 }
 0x4a2   : > { %3546 = vrsqrt.f32 %v853_v36  ;;  %v854_v15 = vadd.f32 1e-05, %v838_v39  ;;  %v2072_v20 = vmul.f32 0.03125, %v2045_v11 }
 0x4a3   : > { %v2047_v61 = vpop.xlane.xlu1 %2046 }
 0x4a4   : > { %3548 = vrsqrt.f32 %v854_v15  ;;  %v4902_v32 = vsub.f32 %v4804_v58, %v2072_v20  ;;  %v2073_v4 = vmul.f32 0.03125, %v2047_v61 }
 0x4a5   : > { %v822_v55 = vpop.xlane.xlu0 %821 }
 0x4a6   : > { %v4905_v56 = vsub.f32 %v4811_v51, %v2073_v4  ;;  %v839_v9 = vmul.f32 0.03125, %v822_v55  ;;  %v2104_v46 = vmul.f32 %v4441_v52, %v4902_v32 }
 0x4a7   : > { %v824_v38 = vpop.xlane.xlu1 %823 }
 0x4a8   : > { %v3543_v37 = vpop.eup %3542  ;;  %v855_v17 = vadd.f32 1e-05, %v839_v9  ;;  %v840_v29 = vmul.f32 0.03125, %v824_v38  ;;  %v2120_v63 = vmul.f32 %v2104_v46, %v2104_v46  ;;  %v2105_v13 = vmul.f32 %v4441_v52, %v4905_v56 }
 0x4a9   : > { %v2049_v57 = vpop.xlane.xlu0 %2048  ;;  %v883_v58 = vmul.f32 %v3543_v37, %v4728_v2 }
 0x4aa   : > { %v3545_v0 = vpop.eup %3544  ;;  %3550 = vrsqrt.f32 %v855_v17  ;;  %v856_v48 = vadd.f32 1e-05, %v840_v29  ;;  %v2074_v51 = vmul.f32 0.03125, %v2049_v57  ;;  %2140 = vadd.xlane.f32.xlu0 %v2120_v63  ;;  %v2121_v60 = vmul.f32 %v2105_v13, %v2105_v13 }
 0x4ab   : > { %v2051_v50 = vpop.xlane.xlu1 %2050  ;;  %v884_v43 = vmul.f32 %v3545_v0, %v4785_v26  ;;  %v903_v25 = vmul.f32 %v4687_v8, %v883_v58 }
 0x4ac   : > { %v3547_v3 = vpop.eup %3546  ;;  %3552 = vrsqrt.f32 %v856_v48  ;;  %v4915_v6 = vsub.f32 %v4801_v41, %v2074_v51  ;;  %v2075_v44 = vmul.f32 0.03125, %v2051_v50  ;;  %2142 = vadd.xlane.f32.xlu1 %v2121_v60 }
 0x4ad   : > { %v2053_v18 = vpop.xlane.xlu0 %2052  ;;  %v904_v2 = vmul.f32 %v4687_v8, %v884_v43  ;;  %v923_v14 = vadd.f32 %v4690_v30, %v903_v25  ;;  %v885_v21 = vmul.f32 %v3547_v3, %v4742_v28 }
 0x4ae   : > { %v3549_v24 = vpop.eup %3548  ;;  %v4921_v59 = vsub.f32 %v4808_v49, %v2075_v44  ;;  %v2076_v26 = vmul.f32 0.03125, %v2053_v18  ;;  %v2106_v36 = vmul.f32 %v4441_v52, %v4915_v6 }
 0x4af   : > { %v2055_v39 = vpop.xlane.xlu1 %2054  ;;  %v924_v41 = vadd.f32 %v4690_v30, %v904_v2  ;;  %v886_v11 = vmul.f32 %v3549_v24, %v4795_v34  ;;  %v905_v15 = vmul.f32 %v4687_v8, %v885_v21  ;;  %v939_v55 = vmax.f32 %v923_v14, 0.0 }
 0x4b0   : > { %v4929_v20 = vsub.f32 %v4823_v62, %v2076_v26  ;;  %v2077_v61 = vmul.f32 0.03125, %v2055_v39  ;;  %v2122_v28 = vmul.f32 %v2106_v36, %v2106_v36  ;;  %v2107_v49 = vmul.f32 %v4441_v52, %v4921_v59 }
 0x4b1   : > { %v2057_v4 = vpop.xlane.xlu0 %2056  ;;  %v940_v9 = vmax.f32 %v924_v41, 0.0  ;;  %v906_v46 = vmul.f32 %v4687_v8, %v886_v11  ;;  %v925_v38 = vadd.f32 %v4690_v30, %v905_v15 }
 0x4b2   : > { %v4936_v37 = vsub.f32 %v4831_v40, %v2077_v61  ;;  %v2078_v34 = vmul.f32 0.03125, %v2057_v4  ;;  %2144 = vadd.xlane.f32.xlu0 %v2122_v28  ;;  %v2123_v17 = vmul.f32 %v2107_v49, %v2107_v49  ;;  %v2108_v62 = vmul.f32 %v4441_v52, %v4929_v20 }
 0x4b3   : > { %v2059_v29 = vpop.xlane.xlu1 %2058  ;;  %v1423_v63 = vpack.c.bf16 %v940_v9, %v939_v55  ;;  %v926_v13 = vadd.f32 %v4690_v30, %v906_v46  ;;  %v941_v60 = vmax.f32 %v925_v38, 0.0 }
 0x4b4   : > { %v3551_v57 = vpop.eup %3550  ;;  %v4942_v58 = vsub.f32 %v4821_v16, %v2078_v34  ;;  %v2079_v0 = vmul.f32 0.03125, %v2059_v29  ;;  %2146 = vadd.xlane.f32.xlu1 %v2123_v17  ;;  %v2124_v48 = vmul.f32 %v2108_v62, %v2108_v62  ;;  %v2109_v40 = vmul.f32 %v4441_v52, %v4936_v37 }
 0x4b5   : > { %v2061_v51 = vpop.xlane.xlu0 %2060  ;;  %3268 = vmatmul.mubr.bf16.gmra.mrb[8].mxu0 %v1423_v63  ;;  %v942_v50 = vmax.f32 %v926_v13, 0.0  ;;  %v887_v43 = vmul.f32 %v3551_v57, %v4816_v10 }
 0x4b6   : > { %v3553_v25 = vpop.eup %3552  ;;  %v4948_v3 = vsub.f32 %v4829_v45, %v2079_v0  ;;  %v2080_v44 = vmul.f32 0.03125, %v2061_v51  ;;  %2148 = vadd.xlane.f32.xlu0 %v2124_v48  ;;  %v2125_v16 = vmul.f32 %v2109_v40, %v2109_v40  ;;  %v2110_v18 = vmul.f32 %v4441_v52, %v4942_v58 }
 0x4b7   : > { %v2063_v2 = vpop.xlane.xlu1 %2062  ;;  %v1424_v14 = vpack.c.bf16 %v942_v50, %v941_v60  ;;  %v888_v21 = vmul.f32 %v3553_v25, %v4819_v1  ;;  %v907_v24 = vmul.f32 %v4687_v8, %v887_v43 }
 0x4b8   : > { %v4955_v26 = vsub.f32 %v4839_v53, %v2080_v44  ;;  %v2081_v10 = vmul.f32 0.03125, %v2063_v2  ;;  %2150 = vadd.xlane.f32.xlu1 %v2125_v16  ;;  %v2126_v36 = vmul.f32 %v2110_v18, %v2110_v18  ;;  %v2111_v45 = vmul.f32 %v4441_v52, %v4948_v3 }
 0x4b9   : > { %v2065_v39 = vpop.xlane.xlu0 %2064  ;;  %3271 = vmatprep.mubr.bf16.mxu0 %v1424_v14  ;;  %v908_v41 = vmul.f32 %v4687_v8, %v888_v21  ;;  %v927_v11 = vadd.f32 %v4690_v30, %v907_v24 }
 0x4ba   : > { %v4962_v15 = vsub.f32 %v4845_v33, %v2081_v10  ;;  %v2082_v1 = vmul.f32 0.03125, %v2065_v39  ;;  %2152 = vadd.xlane.f32.xlu0 %v2126_v36  ;;  %v2127_v61 = vmul.f32 %v2111_v45, %v2111_v45  ;;  %v2112_v53 = vmul.f32 %v4441_v52, %v4955_v26 }
 0x4bb   : > { %v2067_v28 = vpop.xlane.xlu1 %2066  ;;  %v928_v49 = vadd.f32 %v4690_v30, %v908_v41  ;;  %v943_v38 = vmax.f32 %v927_v11, 0.0 }
 0x4bc   : > { %v4968_v4 = vsub.f32 %v4837_v12, %v2082_v1  ;;  %v2083_v55 = vmul.f32 0.03125, %v2067_v28  ;;  %2154 = vadd.xlane.f32.xlu1 %v2127_v61  ;;  %v2128_v8 = vmul.f32 %v2112_v53, %v2112_v53  ;;  %v2113_v9 = vmul.f32 %v4441_v52, %v4962_v15 }
 0x4bd   : > { %v1604_v33 = vpop.xlane.xlu0 %1603  ;;  %v944_v34 = vmax.f32 %v928_v49, 0.0 }
 0x4be   : > { %v4972_v46 = vpop.f32.mrb[4].mxu0  ;;  %v4975_v17 = vsub.f32 %v4843_v7, %v2083_v55  ;;  %v1635_v62 = vmul.f32 0.03125, %v1604_v33  ;;  %2156 = vadd.xlane.f32.xlu0 %v2128_v8  ;;  %v2129_v12 = vmul.f32 %v2113_v9, %v2113_v9  ;;  %v2114_v57 = vmul.f32 %v4441_v52, %v4968_v4 }
 0x4bf   : > { %v4977_v30 = vpop.f32.mrb[5].mxu0  ;;  %v1606_v29 = vpop.xlane.xlu1 %1605  ;;  %v1425_v13 = vpack.c.bf16 %v944_v34, %v943_v38  ;;  %v1593_v39 = vmul.f32 %v4972_v46, %v4441_v52 }
 0x4c0   : > { %v4979_v63 = vpop.f32.mrb[6].mxu0  ;;  %v4984_v0 = vsub.f32 %v4855_v22, %v1635_v62  ;;  %v1636_v48 = vmul.f32 0.03125, %v1606_v29  ;;  %2158 = vadd.xlane.f32.xlu1 %v2129_v12  ;;  %v2115_v7 = vmul.f32 %v4441_v52, %v4975_v17  ;;  %v2130_v60 = vmul.f32 %v2114_v57, %v2114_v57  ;;  %v5020_v29 = vld [vmem:[%s5555_s6] sm:$0xff] }
 0x4c1   : > { %v4986_v40 = vpop.f32.mrb[7].mxu0  ;;  %3272 = vmatmul.mubr.bf16.gmra.mrb[12].mxu0 %v1425_v13  ;;  %v1608_v51 = vpop.xlane.xlu0 %1607  ;;  %v1591_v45 = vmul.f32 %v4441_v52, %v4977_v30  ;;  %v1594_v41 = vmul.f32 %v4979_v63, %v4441_v52  ;;  %v2230_v62 = vsub.s32 6, %v4628_v31  ;;  %v2250_v12 = vsub.s32 7, %v4628_v31 }
 0x4c2   : > { %v4991_v50 = vsub.f32 %v4861_v19, %v1636_v48  ;;  %v1637_v43 = vmul.f32 0.03125, %v1608_v51  ;;  %v2131_v25 = vmul.f32 %v2115_v7, %v2115_v7  ;;  %v1667_v44 = vmul.f32 %v4441_v52, %v4984_v0  ;;  %2160 = vadd.xlane.f32.xlu0 %v2130_v60 }
 0x4c3   : > { %v1610_v22 = vpop.xlane.xlu1 %1609  ;;  %v5023_v13 = vrot.slane %v5020_v29, %v2230_v62  ;;  %v5027_v51 = vrot.slane %v5020_v29, %v2250_v12 }
 0x4c4   : > { %v4996_v16 = vsub.f32 %v4851_v23, %v1637_v43  ;;  %v1638_v18 = vmul.f32 0.03125, %v1610_v22  ;;  %2162 = vadd.xlane.f32.xlu1 %v2131_v25  ;;  %v1683_v2 = vmul.f32 %v1667_v44, %v1667_v44  ;;  %v1668_v14 = vmul.f32 %v4441_v52, %v4991_v50 }
 0x4c6   : > { %v5001_v21 = vsub.f32 %v4857_v5, %v1638_v18  ;;  %v1684_v19 = vmul.f32 %v1668_v14, %v1668_v14  ;;  %v1669_v24 = vmul.f32 %v4441_v52, %v4996_v16  ;;  %1699 = vadd.xlane.f32.xlu0 %v1683_v2  ;;  %v1592_v5 = vmul.f32 %v4441_v52, %v4986_v40 }
 0x4c8   : > { %1701 = vadd.xlane.f32.xlu1 %v1684_v19  ;;  %v1685_v10 = vmul.f32 %v1669_v24, %v1669_v24  ;;  %v1670_v23 = vmul.f32 %v4441_v52, %v5001_v21 }
 0x4ca   : > { %v1686_v36 = vmul.f32 %v1670_v23, %v1670_v23  ;;  %1703 = vadd.xlane.f32.xlu0 %v1685_v10 }
 0x4cc   : > { %1705 = vadd.xlane.f32.xlu1 %v1686_v36 }
 0x4ce   : > { %1611 = vadd.xlane.f32.xlu0 %v1591_v45 }
 0x4d0   : > { %1613 = vadd.xlane.f32.xlu1 %v1592_v5 }
 0x4d2   : > { %1615 = vadd.xlane.f32.xlu0 %v1593_v39 }
 0x4d4   : > { %1617 = vadd.xlane.f32.xlu1 %v1594_v41 }
 0x527   : > { %v2133_v11 = vpop.xlane.xlu0 %2132 }
 0x528   : > { %v2164_v1 = vmul.f32 0.03125, %v2133_v11 }
 0x529   : > { %v2135_v61 = vpop.xlane.xlu1 %2134 }
 0x52a   : > { %v2180_v53 = vadd.f32 1e-05, %v2164_v1  ;;  %v2165_v28 = vmul.f32 0.03125, %v2135_v61 }
 0x52b   : > { %v2137_v49 = vpop.xlane.xlu0 %2136 }
 0x52c   : > { %3554 = vrsqrt.f32 %v2180_v53  ;;  %v2181_v55 = vadd.f32 1e-05, %v2165_v28  ;;  %v2166_v8 = vmul.f32 0.03125, %v2137_v49 }
 0x52d   : > { %v2139_v9 = vpop.xlane.xlu1 %2138 }
 0x52e   : > { %3556 = vrsqrt.f32 %v2181_v55  ;;  %v2182_v33 = vadd.f32 1e-05, %v2166_v8  ;;  %v2167_v38 = vmul.f32 0.03125, %v2139_v9 }
 0x530   : > { %3558 = vrsqrt.f32 %v2182_v33  ;;  %v2183_v34 = vadd.f32 1e-05, %v2167_v38 }
 0x532   : > { %3560 = vrsqrt.f32 %v2183_v34 }
 0x536   : > { %v3555_v57 = vpop.eup %3554 }
 0x537   : > { %v2141_v48 = vpop.xlane.xlu0 %2140  ;;  %v2212_v7 = vmul.f32 %v3555_v57, %v4882_v42 }
 0x538   : > { %v3557_v60 = vpop.eup %3556  ;;  %v2168_v43 = vmul.f32 0.03125, %v2141_v48 }
 0x539   : > { %v2143_v25 = vpop.xlane.xlu1 %2142  ;;  %v2213_v44 = vmul.f32 %v3557_v60, %v4885_v27  ;;  %v2232_v22 = vmul.f32 %v5023_v13, %v2212_v7 }
 0x53a   : > { %v3559_v18 = vpop.eup %3558  ;;  %v2184_v2 = vadd.f32 1e-05, %v2168_v43  ;;  %v2169_v14 = vmul.f32 0.03125, %v2143_v25 }
 0x53b   : > { %v2233_v19 = vmul.f32 %v5023_v13, %v2213_v44  ;;  %v2252_v24 = vadd.f32 %v5027_v51, %v2232_v22  ;;  %v2214_v10 = vmul.f32 %v3559_v18, %v4890_v54 }
 0x53c   : > { %v3561_v42 = vpop.eup %3560  ;;  %3562 = vrsqrt.f32 %v2184_v2  ;;  %v2185_v23 = vadd.f32 1e-05, %v2169_v14 }
 0x53d   : > { %v2253_v36 = vadd.f32 %v5027_v51, %v2233_v19  ;;  %v2215_v45 = vmul.f32 %v3561_v42, %v4895_v35  ;;  %v2234_v27 = vmul.f32 %v5023_v13, %v2214_v10  ;;  %v2268_v39 = vmax.f32 %v2252_v24, 0.0 }
 0x53e   : > { %3564 = vrsqrt.f32 %v2185_v23 }
 0x53f   : > { %v2145_v5 = vpop.xlane.xlu0 %2144  ;;  %v2269_v41 = vmax.f32 %v2253_v36, 0.0  ;;  %v2235_v11 = vmul.f32 %v5023_v13, %v2215_v45  ;;  %v2254_v1 = vadd.f32 %v5027_v51, %v2234_v27 }
 0x540   : > { %v2170_v61 = vmul.f32 0.03125, %v2145_v5 }
 0x541   : > { %v2147_v53 = vpop.xlane.xlu1 %2146  ;;  %v2292_v54 = vpack.c.bf16 %v2269_v41, %v2268_v39  ;;  %v2255_v28 = vadd.f32 %v5027_v51, %v2235_v11  ;;  %v2270_v35 = vmax.f32 %v2254_v1, 0.0 }
 0x542   : > { %v2186_v49 = vadd.f32 1e-05, %v2170_v61  ;;  %v2171_v55 = vmul.f32 0.03125, %v2147_v53 }
 0x543   : > { %v2149_v8 = vpop.xlane.xlu0 %2148  ;;  %3307 = vmatprep.subr.bf16.mxu0 %v2292_v54  ;;  %v2271_v9 = vmax.f32 %v2255_v28, 0.0 }
 0x544   : > { %3566 = vrsqrt.f32 %v2186_v49  ;;  %v2187_v33 = vadd.f32 1e-05, %v2171_v55  ;;  %v2172_v38 = vmul.f32 0.03125, %v2149_v8  ;;  %3308 = vmatpush3.bf16.xpose.msra.mxu0 %v2292_v54 }
 0x545   : > { %v2151_v34 = vpop.xlane.xlu1 %2150  ;;  %v2293_v62 = vpack.c.bf16 %v2271_v9, %v2270_v35 }
 0x546   : > { %v3563_v12 = vpop.eup %3562  ;;  %3568 = vrsqrt.f32 %v2187_v33  ;;  %v2188_v57 = vadd.f32 1e-05, %v2172_v38  ;;  %v2173_v48 = vmul.f32 0.03125, %v2151_v34 }
 0x547   : > { %v2153_v7 = vpop.xlane.xlu0 %2152  ;;  %3309 = vmatprep.subr.bf16.mxu0 %v2293_v62  ;;  %v2216_v60 = vmul.f32 %v3563_v12, %v4902_v32 }
 0x548   : > { %v3565_v43 = vpop.eup %3564  ;;  %3570 = vrsqrt.f32 %v2188_v57  ;;  %v2189_v25 = vadd.f32 1e-05, %v2173_v48  ;;  %v2174_v44 = vmul.f32 0.03125, %v2153_v7 }
 0x549   : > { %v2155_v22 = vpop.xlane.xlu1 %2154  ;;  %v2217_v18 = vmul.f32 %v3565_v43, %v4905_v56  ;;  %v2236_v2 = vmul.f32 %v5023_v13, %v2216_v60 }
 0x54a   : > { %3572 = vrsqrt.f32 %v2189_v25  ;;  %v2190_v14 = vadd.f32 1e-05, %v2174_v44  ;;  %v2175_v19 = vmul.f32 0.03125, %v2155_v22 }
 0x54b   : > { %v2157_v24 = vpop.xlane.xlu0 %2156  ;;  %v2237_v10 = vmul.f32 %v5023_v13, %v2217_v18  ;;  %v2256_v42 = vadd.f32 %v5027_v51, %v2236_v2 }
 0x54c   : > { %3574 = vrsqrt.f32 %v2190_v14  ;;  %v2191_v23 = vadd.f32 1e-05, %v2175_v19  ;;  %v2176_v32 = vmul.f32 0.03125, %v2157_v24  ;;  %3310 = vmatpush3.bf16.xpose.msra.mxu0 %v2293_v62 }
 0x54d   : > { %v2159_v36 = vpop.xlane.xlu1 %2158  ;;  %v2257_v45 = vadd.f32 %v5027_v51, %v2237_v10  ;;  %v2272_v39 = vmax.f32 %v2256_v42, 0.0 }
 0x54e   : > { %v3567_v27 = vpop.eup %3566  ;;  %3576 = vrsqrt.f32 %v2191_v23  ;;  %v2192_v56 = vadd.f32 1e-05, %v2176_v32  ;;  %v2177_v5 = vmul.f32 0.03125, %v2159_v36 }
 0x54f   : > { %v2273_v41 = vmax.f32 %v2257_v45, 0.0  ;;  %v2218_v11 = vmul.f32 %v3567_v27, %v4915_v6  ;;  %v2161_v53 = vpop.xlane.xlu0 %2160 }
 0x550   : > { %v3569_v1 = vpop.eup %3568  ;;  %3578 = vrsqrt.f32 %v2192_v56  ;;  %v2193_v61 = vadd.f32 1e-05, %v2177_v5  ;;  %v2178_v54 = vmul.f32 0.03125, %v2161_v53 }
 0x551   : > { %v2163_v28 = vpop.xlane.xlu1 %2162  ;;  %v2294_v49 = vpack.c.bf16 %v2273_v41, %v2272_v39  ;;  %v2219_v55 = vmul.f32 %v3569_v1, %v4921_v59  ;;  %v2238_v8 = vmul.f32 %v5023_v13, %v2218_v11 }
 0x552   : > { %v3571_v35 = vpop.eup %3570  ;;  %3580 = vrsqrt.f32 %v2193_v61  ;;  %v2179_v9 = vmul.f32 0.03125, %v2163_v28  ;;  %v2194_v62 = vadd.f32 1e-05, %v2178_v54  ;;  %v1797_v61 = vsub.s32 4, %v4628_v31 }
 0x553   : > { %3311 = vmatprep.subr.bf16.mxu0 %v2294_v49  ;;  %v2239_v33 = vmul.f32 %v5023_v13, %v2219_v55  ;;  %v2258_v38 = vadd.f32 %v5027_v51, %v2238_v8  ;;  %v2220_v6 = vmul.f32 %v3571_v35, %v4929_v20  ;;  %v1700_v57 = vpop.xlane.xlu0 %1699 }
 0x554   : > { %v3573_v34 = vpop.eup %3572  ;;  %v2195_v12 = vadd.f32 1e-05, %v2179_v9  ;;  %3312 = vmatpush3.bf16.xpose.msra.mxu0 %v2294_v49  ;;  %v1731_v48 = vmul.f32 0.03125, %v1700_v57  ;;  %v1817_v9 = vsub.s32 5, %v4628_v31 }
 0x555   : > { %v1702_v7 = vpop.xlane.xlu1 %1701  ;;  %v2259_v59 = vadd.f32 %v5027_v51, %v2239_v33  ;;  %v2221_v25 = vmul.f32 %v3573_v34, %v4936_v37  ;;  %v2240_v44 = vmul.f32 %v5023_v13, %v2220_v6  ;;  %v2274_v18 = vmax.f32 %v2258_v38, 0.0 }
 0x556   : > { %v3575_v60 = vpop.eup %3574  ;;  %3582 = vrsqrt.f32 %v2195_v12  ;;  %v1732_v43 = vmul.f32 0.03125, %v1702_v7  ;;  %v1747_v22 = vadd.f32 1e-05, %v1731_v48  ;;  %v5077_v31 = vrot.slane %v5020_v29, %v1817_v9 }
 0x557   : > { %v2275_v2 = vmax.f32 %v2259_v59, 0.0  ;;  %v2222_v20 = vmul.f32 %v3575_v60, %v4942_v58  ;;  %3584 = vrsqrt.f32 %v2194_v62  ;;  %v2241_v24 = vmul.f32 %v5023_v13, %v2221_v25  ;;  %v1704_v45 = vpop.xlane.xlu0 %1703 }
 0x558   : > { %v3577_v14 = vpop.eup %3576  ;;  %v1748_v19 = vadd.f32 1e-05, %v1732_v43  ;;  %v2260_v10 = vadd.f32 %v5027_v51, %v2240_v44  ;;  %3586 = vrsqrt.f32 %v1747_v22  ;;  %v1733_v53 = vmul.f32 0.03125, %v1704_v45 }
 0x559   : > { %v1706_v42 = vpop.xlane.xlu1 %1705  ;;  %v2295_v23 = vpack.c.bf16 %v2275_v2, %v2274_v18  ;;  %v2223_v32 = vmul.f32 %v3577_v14, %v4948_v3  ;;  %v2261_v36 = vadd.f32 %v5027_v51, %v2241_v24  ;;  %v2242_v58 = vmul.f32 %v5023_v13, %v2222_v20 }
 0x55a   : > { %v3579_v37 = vpop.eup %3578  ;;  %3588 = vrsqrt.f32 %v1748_v19  ;;  %v1734_v5 = vmul.f32 0.03125, %v1706_v42  ;;  %v2276_v39 = vmax.f32 %v2260_v10, 0.0  ;;  %v1749_v34 = vadd.f32 1e-05, %v1733_v53 }
 0x55b   : > { %3313 = vmatprep.subr.bf16.mxu0 %v2295_v23  ;;  %v2243_v27 = vmul.f32 %v5023_v13, %v2223_v32  ;;  %v2277_v41 = vmax.f32 %v2261_v36, 0.0  ;;  %v2262_v11 = vadd.f32 %v5027_v51, %v2242_v58  ;;  %v2224_v3 = vmul.f32 %v3579_v37, %v4955_v26 }
 0x55c   : > { %v3581_v56 = vpop.eup %3580  ;;  %3314 = vmatpush3.bf16.xpose.msra.mxu0 %v2295_v23  ;;  %v1750_v8 = vadd.f32 1e-05, %v1734_v5  ;;  %v5071_v26 = vrot.slane %v5020_v29, %v1797_v61  ;;  %v1612_v61 = vpop.xlane.xlu0 %1611 }
 0x55d   : > { %v2263_v1 = vadd.f32 %v5027_v51, %v2243_v27  ;;  %v2296_v54 = vpack.c.bf16 %v2277_v41, %v2276_v39  ;;  %v2225_v28 = vmul.f32 %v3581_v56, %v4962_v15  ;;  %v2278_v33 = vmax.f32 %v2262_v11, 0.0 }
 0x55e   : > { %v2244_v38 = vmul.f32 %v5023_v13, %v2224_v3  ;;  %3590 = vrsqrt.f32 %v1750_v8 }
 0x55f   : > { %v2279_v49 = vmax.f32 %v2263_v1, 0.0  ;;  %3315 = vmatprep.subr.bf16.mxu0 %v2296_v54  ;;  %v2245_v35 = vmul.f32 %v5023_v13, %v2225_v28  ;;  %3592 = vrsqrt.f32 %v1749_v34 }
 0x560   : > { %v3583_v55 = vpop.eup %3582  ;;  %v2264_v59 = vadd.f32 %v5027_v51, %v2244_v38 }
 0x561   : > { %v3585_v6 = vpop.eup %3584  ;;  %v2297_v12 = vpack.c.bf16 %v2279_v49, %v2278_v33  ;;  %v2265_v15 = vadd.f32 %v5027_v51, %v2245_v35  ;;  %v2227_v57 = vmul.f32 %v3583_v55, %v4975_v17  ;;  %v1639_v49 = vmul.f32 0.03125, %v1612_v61  ;;  %v1616_v55 = vpop.xlane.xlu0 %1615 }
 0x562   : > { %v3587_v62 = vpop.eup %3586  ;;  %v2226_v43 = vmul.f32 %v3585_v6, %v4968_v4  ;;  %v2280_v18 = vmax.f32 %v2264_v59, 0.0  ;;  %v1641_v6 = vmul.f32 0.03125, %v1616_v55 }
 0x563   : > { %v1779_v7 = vmul.f32 %v3587_v62, %v4984_v0  ;;  %v2281_v44 = vmax.f32 %v2265_v15, 0.0  ;;  %v2247_v22 = vmul.f32 %v5023_v13, %v2227_v57  ;;  %v5103_v38 = vsub.f32 %v4977_v30, %v1639_v49 }
 0x564   : > { %v3589_v48 = vpop.eup %3588  ;;  %3316 = vmatpush3.bf16.xpose.msra.mxu0 %v2296_v54  ;;  %v2246_v2 = vmul.f32 %v5023_v13, %v2226_v43  ;;  %v1614_v54 = vpop.xlane.xlu1 %1613 }
 0x565   : > { %3317 = vmatprep.subr.bf16.mxu0 %v2297_v12  ;;  %v1780_v60 = vmul.f32 %v3589_v48, %v4991_v50  ;;  %v1799_v25 = vmul.f32 %v5071_v26, %v1779_v7  ;;  %v2298_v20 = vpack.c.bf16 %v2281_v44, %v2280_v18  ;;  %v2267_v4 = vadd.f32 %v5027_v51, %v2247_v22 }
 0x566   : > { %v2266_v24 = vadd.f32 %v5027_v51, %v2246_v2  ;;  %v1640_v8 = vmul.f32 0.03125, %v1614_v54  ;;  %v5113_v7 = vsub.f32 %v4972_v46, %v1641_v6  ;;  %v1671_v59 = vmul.f32 %v4441_v52, %v5103_v38 }
 0x567   : > { %v1800_v17 = vmul.f32 %v5071_v26, %v1780_v60  ;;  %v1819_v0 = vadd.f32 %v5077_v31, %v1799_v25  ;;  %v2283_v42 = vmax.f32 %v2267_v4, 0.0 }
 0x568   : > { %v3591_v10 = vpop.eup %3590  ;;  %v2282_v37 = vmax.f32 %v2266_v24, 0.0  ;;  %v1618_v9 = vpop.xlane.xlu1 %1617  ;;  %v5109_v15 = vsub.f32 %v4986_v40, %v1640_v8  ;;  %v1687_v46 = vmul.f32 %v1671_v59, %v1671_v59  ;;  %v1673_v25 = vmul.f32 %v4441_v52, %v5113_v7 }
 0x569   : > { %v1820_v29 = vadd.f32 %v5077_v31, %v1800_v17  ;;  %v1835_v14 = vmax.f32 %v1819_v0, 0.0  ;;  %v3593_v23 = vpop.eup %3592  ;;  %v1782_v32 = vmul.f32 %v3591_v10, %v5001_v21  ;;  %v1642_v57 = vmul.f32 0.03125, %v1618_v9 }
 0x56a   : > { %v1781_v36 = vmul.f32 %v3593_v23, %v4996_v16  ;;  %v2299_v13 = vpack.c.bf16 %v2283_v42, %v2282_v37  ;;  %v1672_v43 = vmul.f32 %v4441_v52, %v5109_v15 }
 0x56b   : > { %v1836_v50 = vmax.f32 %v1820_v29, 0.0  ;;  %v1802_v45 = vmul.f32 %v5071_v26, %v1782_v32  ;;  %v5120_v60 = vsub.f32 %v4979_v63, %v1642_v57  ;;  %v1689_v63 = vmul.f32 %v1673_v25, %v1673_v25 }
 0x56c   : > { %3318 = vmatpush3.bf16.xpose.msra.mxu0 %v2297_v12  ;;  %v1801_v58 = vmul.f32 %v5071_v26, %v1781_v36  ;;  %v1688_v44 = vmul.f32 %v1672_v43, %v1672_v43 }
 0x56d   : > { %3319 = vmatprep.subr.bf16.mxu0 %v2298_v20  ;;  %v2284_v19 = vpack.c.bf16 %v1836_v50, %v1835_v14  ;;  %v1822_v27 = vadd.f32 %v5077_v31, %v1802_v45  ;;  %v1674_v17 = vmul.f32 %v4441_v52, %v5120_v60 }
 0x56e   : > { %v1821_v51 = vadd.f32 %v5077_v31, %v1801_v58 }
 0x56f   : > { %3323 = vmatprep.mubr.bf16.mxu0 %v2284_v19  ;;  %v1838_v56 = vmax.f32 %v1822_v27, 0.0  ;;  %v1690_v22 = vmul.f32 %v1674_v17, %v1674_v17 }
 0x570   : > { %v1837_v5 = vmax.f32 %v1821_v51, 0.0 }
 0x572   : > { %v2285_v39 = vpack.c.bf16 %v1838_v56, %v1837_v5 }
 0x574   : > { %3320 = vmatpush3.bf16.xpose.msra.mxu0 %v2298_v20 }
 0x575   : > { %3321 = vmatprep.subr.bf16.mxu0 %v2299_v13 }
 0x57c   : > { %3322 = vmatpush3.bf16.xpose.msra.mxu0 %v2299_v13 }
 0x583   : > { %3324 = vmatmul.mubr.bf16.vlgmr.msra.gmra.mrb[16].mxu0 %v2285_v39 }
 0x588   : > { %v3269_v21 = vpop.f32.mrb[8].mxu0 }
 0x589   : > { %v1556_v41 = vpop.f32.mrb[9].mxu0  ;;  %v1597_v53 = vmul.f32 %v3269_v21, %v4441_v52 }
 0x58a   : > { %v1595_v16 = vmul.f32 %v4441_v52, %v1556_v41  ;;  %v3270_v11 = vpop.f32.mrb[10].mxu0 }
 0x58b   : > { %v1559_v1 = vpop.f32.mrb[11].mxu0  ;;  %v1598_v28 = vmul.f32 %v3270_v11, %v4441_v52 }
 0x58c   : > { %v1596_v3 = vmul.f32 %v4441_v52, %v1559_v1  ;;  %1619 = vadd.xlane.f32.xlu0 %v1595_v16 }
 0x58e   : > { %1621 = vadd.xlane.f32.xlu1 %v1596_v3 }
 0x590   : > { %1623 = vadd.xlane.f32.xlu0 %v1597_v53 }
 0x592   : > { %1625 = vadd.xlane.f32.xlu1 %v1598_v28 }
 0x594   : > { %v5100_v35 = vpop.f32.mrb[12].mxu0 }
 0x595   : > { %v1572_v33 = vpop.f32.mrb[13].mxu0  ;;  %v1601_v30 = vmul.f32 %v5100_v35, %v4441_v52 }
 0x596   : > { %v1599_v34 = vmul.f32 %v4441_v52, %v1572_v33  ;;  %v5106_v62 = vpop.f32.mrb[14].mxu0 }
 0x597   : > { %v1575_v12 = vpop.f32.mrb[15].mxu0  ;;  %v1602_v40 = vmul.f32 %v5106_v62, %v4441_v52 }
 0x598   : > { %v1600_v48 = vmul.f32 %v4441_v52, %v1575_v12  ;;  %1627 = vadd.xlane.f32.xlu0 %v1599_v34 }
 0x59a   : > { %1629 = vadd.xlane.f32.xlu1 %v1600_v48 }
 0x59c   : > { %1631 = vadd.xlane.f32.xlu0 %v1601_v30 }
 0x59e   : > { %1633 = vadd.xlane.f32.xlu1 %v1602_v40 }
 0x5a0   : > { %1707 = vadd.xlane.f32.xlu0 %v1687_v46 }
 0x5a2   : > { %1709 = vadd.xlane.f32.xlu1 %v1688_v44 }
 0x5a4   : > { %1711 = vadd.xlane.f32.xlu0 %v1689_v63 }
 0x5a6   : > { %1713 = vadd.xlane.f32.xlu1 %v1690_v22 }
 0x619   : > { %v1620_v0 = vpop.xlane.xlu0 %1619 }
 0x61a   : > { %v1643_v18 = vmul.f32 0.03125, %v1620_v0 }
 0x61b   : > { %v1622_v29 = vpop.xlane.xlu1 %1621 }
 0x61c   : > { %v5130_v2 = vsub.f32 %v1556_v41, %v1643_v18  ;;  %v1644_v20 = vmul.f32 0.03125, %v1622_v29 }
 0x61d   : > { %v1624_v14 = vpop.xlane.xlu0 %1623 }
 0x61e   : > { %v5132_v50 = vsub.f32 %v1559_v1, %v1644_v20  ;;  %v1645_v4 = vmul.f32 0.03125, %v1624_v14  ;;  %v1675_v19 = vmul.f32 %v4441_v52, %v5130_v2 }
 0x61f   : > { %v1626_v24 = vpop.xlane.xlu1 %1625 }
 0x620   : > { %v5136_v10 = vsub.f32 %v3269_v21, %v1645_v4  ;;  %v1646_v42 = vmul.f32 0.03125, %v1626_v24  ;;  %v1691_v23 = vmul.f32 %v1675_v19, %v1675_v19  ;;  %v1676_v32 = vmul.f32 %v4441_v52, %v5132_v50 }
 0x622   : > { %v5140_v37 = vsub.f32 %v3270_v11, %v1646_v42  ;;  %1715 = vadd.xlane.f32.xlu0 %v1691_v23  ;;  %v1692_v36 = vmul.f32 %v1676_v32, %v1676_v32  ;;  %v1677_v13 = vmul.f32 %v4441_v52, %v5136_v10 }
 0x624   : > { %1717 = vadd.xlane.f32.xlu1 %v1692_v36  ;;  %v1693_v45 = vmul.f32 %v1677_v13, %v1677_v13  ;;  %v1678_v58 = vmul.f32 %v4441_v52, %v5140_v37 }
 0x625   : > { %v1628_v27 = vpop.xlane.xlu0 %1627 }
 0x626   : > { %v1647_v51 = vmul.f32 0.03125, %v1628_v27  ;;  %1719 = vadd.xlane.f32.xlu0 %v1693_v45  ;;  %v1694_v56 = vmul.f32 %v1678_v58, %v1678_v58 }
 0x627   : > { %v1630_v5 = vpop.xlane.xlu1 %1629 }
 0x628   : > { %v5146_v39 = vsub.f32 %v1572_v33, %v1647_v51  ;;  %v1648_v21 = vmul.f32 0.03125, %v1630_v5  ;;  %1721 = vadd.xlane.f32.xlu1 %v1694_v56 }
 0x629   : > { %v1632_v41 = vpop.xlane.xlu0 %1631 }
 0x62a   : > { %v5148_v16 = vsub.f32 %v1575_v12, %v1648_v21  ;;  %v1649_v11 = vmul.f32 0.03125, %v1632_v41  ;;  %v1679_v1 = vmul.f32 %v4441_v52, %v5146_v39  ;;  %v4044_v21 = vmov -1e+30  }
 0x62b   : > { %v1634_v3 = vpop.xlane.xlu1 %1633 }
 0x62c   : > { %v5153_v61 = vsub.f32 %v5100_v35, %v1649_v11  ;;  %v1650_v53 = vmul.f32 0.03125, %v1634_v3  ;;  %v1695_v54 = vmul.f32 %v1679_v1, %v1679_v1  ;;  %v1680_v28 = vmul.f32 %v4441_v52, %v5148_v16 }
 0x62d   : > { %v1708_v49 = vpop.xlane.xlu0 %1707 }
 0x62e   : > { %v5158_v55 = vsub.f32 %v5106_v62, %v1650_v53  ;;  %v1735_v8 = vmul.f32 0.03125, %v1708_v49  ;;  %1723 = vadd.xlane.f32.xlu0 %v1695_v54  ;;  %v1696_v9 = vmul.f32 %v1680_v28, %v1680_v28  ;;  %v1681_v33 = vmul.f32 %v4441_v52, %v5153_v61 }
 0x62f   : > { %v1710_v6 = vpop.xlane.xlu1 %1709 }
 0x630   : > { %v1751_v34 = vadd.f32 1e-05, %v1735_v8  ;;  %v1736_v12 = vmul.f32 0.03125, %v1710_v6  ;;  %1725 = vadd.xlane.f32.xlu1 %v1696_v9  ;;  %v1697_v35 = vmul.f32 %v1681_v33, %v1681_v33  ;;  %v1682_v57 = vmul.f32 %v4441_v52, %v5158_v55 }
 0x631   : > { %v1712_v48 = vpop.xlane.xlu0 %1711 }
 0x632   : > { %3594 = vrsqrt.f32 %v1751_v34  ;;  %v1752_v30 = vadd.f32 1e-05, %v1736_v12  ;;  %v1737_v59 = vmul.f32 0.03125, %v1712_v48  ;;  %1727 = vadd.xlane.f32.xlu0 %v1697_v35  ;;  %v1698_v62 = vmul.f32 %v1682_v57, %v1682_v57 }
 0x633   : > { %v1714_v40 = vpop.xlane.xlu1 %1713 }
 0x634   : > { %3596 = vrsqrt.f32 %v1752_v30  ;;  %v1753_v43 = vadd.f32 1e-05, %v1737_v59  ;;  %v1738_v46 = vmul.f32 0.03125, %v1714_v40  ;;  %1729 = vadd.xlane.f32.xlu1 %v1698_v62 }
 0x636   : > { %3598 = vrsqrt.f32 %v1753_v43  ;;  %v1754_v25 = vadd.f32 1e-05, %v1738_v46 }
 0x638   : > { %3600 = vrsqrt.f32 %v1754_v25 }
 0x63c   : > { %v3595_v44 = vpop.eup %3594 }
 0x63d   : > { %v1783_v17 = vmul.f32 %v3595_v44, %v5103_v38 }
 0x63e   : > { %v3597_v63 = vpop.eup %3596 }
 0x63f   : > { %v1784_v52 = vmul.f32 %v3597_v63, %v5109_v15  ;;  %v1803_v22 = vmul.f32 %v5071_v26, %v1783_v17 }
 0x640   : > { %v3599_v0 = vpop.eup %3598 }
 0x641   : > { %v1804_v18 = vmul.f32 %v5071_v26, %v1784_v52  ;;  %v1823_v29 = vadd.f32 %v5077_v31, %v1803_v22  ;;  %v1785_v20 = vmul.f32 %v3599_v0, %v5113_v7 }
 0x642   : > { %v3601_v14 = vpop.eup %3600 }
 0x643   : > { %v1824_v4 = vadd.f32 %v5077_v31, %v1804_v18  ;;  %v1786_v19 = vmul.f32 %v3601_v14, %v5120_v60  ;;  %v1805_v24 = vmul.f32 %v5071_v26, %v1785_v20  ;;  %v1839_v38 = vmax.f32 %v1823_v29, 0.0 }
 0x645   : > { %v1840_v42 = vmax.f32 %v1824_v4, 0.0  ;;  %v1806_v15 = vmul.f32 %v5071_v26, %v1786_v19  ;;  %v1825_v23 = vadd.f32 %v5077_v31, %v1805_v24 }
 0x647   : > { %v2286_v32 = vpack.c.bf16 %v1840_v42, %v1839_v38  ;;  %v1826_v36 = vadd.f32 %v5077_v31, %v1806_v15  ;;  %v1841_v13 = vmax.f32 %v1825_v23, 0.0 }
 0x649   : > { %3327 = vmatprep.mubr.bf16.mxu0 %v2286_v32  ;;  %v1842_v45 = vmax.f32 %v1826_v36, 0.0 }
 0x64b   : > { %v2287_v7 = vpack.c.bf16 %v1842_v45, %v1841_v13 }
 0x64d   : > { %3328 = vmatmul.mubr.bf16.gmra.mrb[20].mxu0 %v2287_v7 }
 0x656   : > { %v3325_v58 = vpop.f32.mrb[16].mxu0 }
 0x657   : > { %v2334_v60 = vpop.f32.mrb[17].mxu0 }
 0x658   : > { %v5177_v27 = vsel %vm2430_vm1, %v2334_v60, -1e+30  ;;  %v3326_v51 = vpop.f32.mrb[18].mxu0 }
 0x659   : > { %v2337_v56 = vpop.f32.mrb[19].mxu0  ;;  %2463 = vmax.xlane.f32.xlu1 %v5177_v27 }
 0x65a   : > { %v5180_v5 = vsel %vm2430_vm1, %v2337_v56, -1e+30 }
 0x65d   : > { %2465 = vmax.xlane.f32.xlu1 %v5180_v5 }
 0x65f   : > { %2623 = vxpose.xlu0.b32.start [1/16] %v5177_v27, 128 }
 0x661   : > { %2467 = vmax.xlane.f32.xlu1 %v4044_v21 }
 0x663   : > { %2624 = vxpose.xlu0.b32.cont [2/16] %v5180_v5, 128 }
 0x665   : > { %2469 = vmax.xlane.f32.xlu1 %v4044_v21 }
 0x667   : > { %2625 = vxpose.xlu0.b32.cont [3/16] %v4044_v21, 128 }
 0x669   : > { %2471 = vmax.xlane.f32.xlu1 %v4044_v21 }
 0x66b   : > { %2626 = vxpose.xlu0.b32.cont [4/16] %v4044_v21, 128 }
 0x66d   : > { %2473 = vmax.xlane.f32.xlu1 %v4044_v21 }
 0x66f   : > { %2627 = vxpose.xlu0.b32.cont [5/16] %v4044_v21, 128 }
 0x671   : > { %2475 = vmax.xlane.f32.xlu1 %v4044_v21 }
 0x673   : > { %2628 = vxpose.xlu0.b32.cont [6/16] %v4044_v21, 128 }
 0x675   : > { %2477 = vmax.xlane.f32.xlu1 %v4044_v21 }
 0x677   : > { %2629 = vxpose.xlu0.b32.cont [7/16] %v4044_v21, 128 }
 0x679   : > { %2479 = vmax.xlane.f32.xlu1 %v4044_v21 }
 0x67b   : > { %2630 = vxpose.xlu0.b32.cont [8/16] %v4044_v21, 128 }
 0x67d   : > { %2481 = vmax.xlane.f32.xlu1 %v4044_v21 }
 0x67f   : > { %2631 = vxpose.xlu0.b32.cont [9/16] %v4044_v21, 128 }
 0x681   : > { %2483 = vmax.xlane.f32.xlu1 %v4044_v21 }
 0x683   : > { %2632 = vxpose.xlu0.b32.cont [10/16] %v4044_v21, 128 }
 0x685   : > { %2485 = vmax.xlane.f32.xlu1 %v4044_v21 }
 0x687   : > { %2633 = vxpose.xlu0.b32.cont [11/16] %v4044_v21, 128 }
 0x689   : > { %2487 = vmax.xlane.f32.xlu1 %v4044_v21 }
 0x68b   : > { %2634 = vxpose.xlu0.b32.cont [12/16] %v4044_v21, 128 }
 0x68d   : > { %2489 = vmax.xlane.f32.xlu1 %v4044_v21 }
 0x68f   : > { %2635 = vxpose.xlu0.b32.cont [13/16] %v4044_v21, 128 }
 0x691   : > { %2491 = vmax.xlane.f32.xlu1 %v4044_v21 }
 0x693   : > { %2636 = vxpose.xlu0.b32.cont [14/16] %v4044_v21, 128 }
 0x695   : > { %2493 = vmax.xlane.f32.xlu1 %v4044_v21 }
 0x697   : > { %2637 = vxpose.xlu0.b32.cont [15/16] %v4044_v21, 128 }
 0x69b   : > { %2638 = vxpose.xlu0.b32.end [16/16] %v4044_v21, 128 }
 0x6af   : > { %v1716_v47 = vpop.xlane.xlu0 %1715 }
 0x6b0   : > { %v1739_v41 = vmul.f32 0.03125, %v1716_v47 }
 0x6b1   : > { %v1718_v11 = vpop.xlane.xlu1 %1717 }
 0x6b2   : > { %v1755_v1 = vadd.f32 1e-05, %v1739_v41  ;;  %v1740_v3 = vmul.f32 0.03125, %v1718_v11 }
 0x6b3   : > { %v1720_v53 = vpop.xlane.xlu0 %1719 }
 0x6b4   : > { %3602 = vrsqrt.f32 %v1755_v1  ;;  %v1756_v54 = vadd.f32 1e-05, %v1740_v3  ;;  %v1741_v28 = vmul.f32 0.03125, %v1720_v53 }
 0x6b5   : > { %v1722_v49 = vpop.xlane.xlu1 %1721 }
 0x6b6   : > { %3604 = vrsqrt.f32 %v1756_v54  ;;  %v1757_v8 = vadd.f32 1e-05, %v1741_v28  ;;  %v1742_v9 = vmul.f32 0.03125, %v1722_v49 }
 0x6b8   : > { %3606 = vrsqrt.f32 %v1757_v8  ;;  %v1758_v33 = vadd.f32 1e-05, %v1742_v9 }
 0x6ba   : > { %3608 = vrsqrt.f32 %v1758_v33 }
 0x6bb   : > { %v1724_v6 = vpop.xlane.xlu0 %1723 }
 0x6bc   : > { %v1743_v34 = vmul.f32 0.03125, %v1724_v6 }
 0x6bd   : > { %v1726_v12 = vpop.xlane.xlu1 %1725 }
 0x6be   : > { %v3603_v35 = vpop.eup %3602  ;;  %v1759_v57 = vadd.f32 1e-05, %v1743_v34  ;;  %v1744_v48 = vmul.f32 0.03125, %v1726_v12 }
 0x6bf   : > { %v1728_v30 = vpop.xlane.xlu0 %1727  ;;  %v1787_v59 = vmul.f32 %v3603_v35, %v5130_v2 }
 0x6c0   : > { %v3605_v62 = vpop.eup %3604  ;;  %3610 = vrsqrt.f32 %v1759_v57  ;;  %v1760_v40 = vadd.f32 1e-05, %v1744_v48  ;;  %v1745_v43 = vmul.f32 0.03125, %v1728_v30 }
 0x6c1   : > { %v1730_v46 = vpop.xlane.xlu1 %1729  ;;  %v1788_v25 = vmul.f32 %v3605_v62, %v5132_v50  ;;  %v1807_v44 = vmul.f32 %v5071_v26, %v1787_v59 }
 0x6c2   : > { %v3607_v17 = vpop.eup %3606  ;;  %3612 = vrsqrt.f32 %v1760_v40  ;;  %v1761_v63 = vadd.f32 1e-05, %v1745_v43  ;;  %v1746_v52 = vmul.f32 0.03125, %v1730_v46 }
 0x6c3   : > { %v1808_v22 = vmul.f32 %v5071_v26, %v1788_v25  ;;  %v1827_v0 = vadd.f32 %v5077_v31, %v1807_v44  ;;  %v1789_v18 = vmul.f32 %v3607_v17, %v5136_v10 }
 0x6c4   : > { %v3609_v2 = vpop.eup %3608  ;;  %3614 = vrsqrt.f32 %v1761_v63  ;;  %v1762_v29 = vadd.f32 1e-05, %v1746_v52 }
 0x6c5   : > { %v1828_v20 = vadd.f32 %v5077_v31, %v1808_v22  ;;  %v1790_v14 = vmul.f32 %v3609_v2, %v5140_v37  ;;  %v1809_v50 = vmul.f32 %v5071_v26, %v1789_v18  ;;  %v1843_v4 = vmax.f32 %v1827_v0, 0.0 }
 0x6c6   : > { %3616 = vrsqrt.f32 %v1762_v29 }
 0x6c7   : > { %v1844_v19 = vmax.f32 %v1828_v20, 0.0  ;;  %v1810_v24 = vmul.f32 %v5071_v26, %v1790_v14  ;;  %v1829_v38 = vadd.f32 %v5077_v31, %v1809_v50 }
 0x6c9   : > { %v2288_v42 = vpack.c.bf16 %v1844_v19, %v1843_v4  ;;  %v1830_v15 = vadd.f32 %v5077_v31, %v1810_v24  ;;  %v1845_v23 = vmax.f32 %v1829_v38, 0.0 }
 0x6ca   : > { %v3611_v10 = vpop.eup %3610 }
 0x6cb   : > { %3331 = vmatprep.mubr.bf16.mxu0 %v2288_v42  ;;  %v1846_v32 = vmax.f32 %v1830_v15, 0.0  ;;  %v1791_v36 = vmul.f32 %v3611_v10, %v5146_v39 }
 0x6cc   : > { %v3613_v13 = vpop.eup %3612 }
 0x6cd   : > { %v2289_v37 = vpack.c.bf16 %v1846_v32, %v1845_v23  ;;  %v1792_v45 = vmul.f32 %v3613_v13, %v5148_v16  ;;  %v1811_v7 = vmul.f32 %v5071_v26, %v1791_v36 }
 0x6ce   : > { %v3615_v58 = vpop.eup %3614 }
 0x6cf   : > { %3332 = vmatmul.mubr.bf16.gmra.mrb[24].mxu0 %v2289_v37  ;;  %v1812_v60 = vmul.f32 %v5071_v26, %v1792_v45  ;;  %v1831_v51 = vadd.f32 %v5077_v31, %v1811_v7  ;;  %v1793_v56 = vmul.f32 %v3615_v58, %v5153_v61 }
 0x6d0   : > { %v3617_v21 = vpop.eup %3616 }
 0x6d1   : > { %v1832_v47 = vadd.f32 %v5077_v31, %v1812_v60  ;;  %v1794_v41 = vmul.f32 %v3617_v21, %v5158_v55  ;;  %v1813_v39 = vmul.f32 %v5071_v26, %v1793_v56  ;;  %v1847_v11 = vmax.f32 %v1831_v51, 0.0 }
 0x6d3   : > { %v1848_v1 = vmax.f32 %v1832_v47, 0.0  ;;  %v1814_v16 = vmul.f32 %v5071_v26, %v1794_v41  ;;  %v1833_v3 = vadd.f32 %v5077_v31, %v1813_v39 }
 0x6d5   : > { %v2290_v53 = vpack.c.bf16 %v1848_v1, %v1847_v11  ;;  %v1834_v54 = vadd.f32 %v5077_v31, %v1814_v16  ;;  %v1849_v28 = vmax.f32 %v1833_v3, 0.0 }
 0x6d7   : > { %3335 = vmatprep.mubr.bf16.mxu0 %v2290_v53  ;;  %v1850_v49 = vmax.f32 %v1834_v54, 0.0 }
 0x6d9   : > { %v2291_v61 = vpack.c.bf16 %v1850_v49, %v1849_v28 }
 0x6db   : > { %3336 = vmatmul.mubr.bf16.gmra.mrb[28].mxu0 %v2291_v61 }
 0x6df   : > { %v5209_v8 = vpop.trf.xlu0 }
 0x6e0   : > { %2655 = vmax.xlane.f32.xlu1 %v5209_v8 }
 0x6e3   : > { %v5212_v55 = vpop.trf.xlu0 }
 0x6e4   : > { %2657 = vmax.xlane.f32.xlu1 %v5212_v55 }
 0x6e6   : > { %v2464_v9 = vpop.xlane.xlu1 %2463 }
 0x6e7   : > { %v5215_v26 = vpop.trf.xlu0  ;;  %v2495_v18 = vsub.f32 %v5177_v27, %v2464_v9 }
 0x6e8   : > { %2659 = vmax.xlane.f32.xlu1 %v5215_v26 }
 0x6e9   : > { %v2511_v50 = vmul.f32 1.442695, %v2495_v18 }
 0x6ea   : > { %v2466_v33 = vpop.xlane.xlu1 %2465 }
 0x6eb   : > { %v5218_v31 = vpop.trf.xlu0  ;;  %v2496_v4 = vsub.f32 %v5180_v5, %v2466_v33 }
 0x6ec   : > { %2661 = vmax.xlane.f32.xlu1 %v5218_v31 }
 0x6ed   : > { %v2513_v27 = vmul.f32 1.442695, %v2496_v4 }
 0x6ee   : > { %v2468_v6 = vpop.xlane.xlu1 %2467 }
 0x6ef   : > { %v5221_v34 = vpop.trf.xlu0  ;;  %v2497_v24 = vsub.f32 -1e+30, %v2468_v6 }
 0x6f0   : > { %2663 = vmax.xlane.f32.xlu1 %v5221_v34 }
 0x6f1   : > { %v2515_v32 = vmul.f32 1.442695, %v2497_v24 }
 0x6f2   : > { %v2470_v12 = vpop.xlane.xlu1 %2469 }
 0x6f3   : > { %v5224_v35 = vpop.trf.xlu0  ;;  %v2498_v10 = vsub.f32 -1e+30, %v2470_v12 }
 0x6f4   : > { %2665 = vmax.xlane.f32.xlu1 %v5224_v35 }
 0x6f5   : > { %v2517_v13 = vmul.f32 1.442695, %v2498_v10 }
 0x6f6   : > { %v2472_v57 = vpop.xlane.xlu1 %2471 }
 0x6f7   : > { %v5227_v48 = vpop.trf.xlu0  ;;  %v2499_v45 = vsub.f32 -1e+30, %v2472_v57 }
 0x6f8   : > { %2667 = vmax.xlane.f32.xlu1 %v5227_v48 }
 0x6f9   : > { %v2519_v47 = vmul.f32 1.442695, %v2499_v45 }
 0x6fa   : > { %v5230_v30 = vpop.xlane.xlu1 %2473 }
 0x6fb   : > { %v5232_v59 = vpop.trf.xlu0  ;;  %v2500_v51 = vsub.f32 -1e+30, %v5230_v30 }
 0x6fc   : > { %2669 = vmax.xlane.f32.xlu1 %v5232_v59 }
 0x6fd   : > { %v2521_v1 = vmul.f32 1.442695, %v2500_v51 }
 0x6fe   : > { %v5235_v62 = vpop.xlane.xlu1 %2475 }
 0x6ff   : > { %v5237_v40 = vpop.trf.xlu0  ;;  %v2501_v54 = vsub.f32 -1e+30, %v5235_v62 }
 0x700   : > { %2671 = vmax.xlane.f32.xlu1 %v5237_v40 }
 0x701   : > { %v2523_v33 = vmul.f32 1.442695, %v2501_v54 }
 0x702   : > { %v2478_v43 = vpop.xlane.xlu1 %2477 }
 0x703   : > { %v2502_v46 = vsub.f32 -1e+30, %v2478_v43  ;;  %v5240_v25 = vpop.trf.xlu0 }
 0x704   : > { %2673 = vmax.xlane.f32.xlu1 %v5240_v25 }
 0x705   : > { %v2525_v44 = vmul.f32 1.442695, %v2502_v46 }
 0x706   : > { %v5243_v17 = vpop.xlane.xlu1 %2479 }
 0x707   : > { %3618 = vpow2.f32 %v2525_v44  ;;  %v5245_v63 = vpop.trf.xlu0  ;;  %v2503_v6 = vsub.f32 -1e+30, %v5243_v17 }
 0x708   : > { %2675 = vmax.xlane.f32.xlu1 %v5245_v63 }
 0x709   : > { %v2527_v30 = vmul.f32 1.442695, %v2503_v6 }
 0x70a   : > { %v2482_v52 = vpop.xlane.xlu1 %2481 }
 0x70b   : > { %v2504_v22 = vsub.f32 -1e+30, %v2482_v52  ;;  %v5248_v0 = vpop.trf.xlu0 }
 0x70c   : > { %2677 = vmax.xlane.f32.xlu0 %v5248_v0 }
 0x70d   : > { %v2529_v2 = vmul.f32 1.442695, %v2504_v22 }
 0x70e   : > { %v5252_v29 = vpop.xlane.xlu1 %2483 }
 0x70f   : > { %3620 = vpow2.f32 %v2529_v2  ;;  %v5254_v20 = vpop.trf.xlu0  ;;  %v2505_v62 = vsub.f32 -1e+30, %v5252_v29 }
 0x710   : > { %2679 = vmax.xlane.f32.xlu1 %v5254_v20  ;;  %3622 = vpow2.f32 %v2511_v50 }
 0x711   : > { %v5257_v14 = vpop.eup %3618  ;;  %v2531_v46 = vmul.f32 1.442695, %v2505_v62 }
 0x712   : > { %2557 = vadd.xlane.f32.xlu0 %v5257_v14  ;;  %v2486_v19 = vpop.xlane.xlu1 %2485 }
 0x713   : > { %v2506_v38 = vsub.f32 -1e+30, %v2486_v19  ;;  %v5261_v42 = vpop.trf.xlu0 }
 0x714   : > { %2681 = vmax.xlane.f32.xlu1 %v5261_v42 }
 0x715   : > { %v2533_v15 = vmul.f32 1.442695, %v2506_v38 }
 0x716   : > { %v2488_v23 = vpop.xlane.xlu1 %2487 }
 0x717   : > { %3624 = vpow2.f32 %v2533_v15  ;;  %v5264_v36 = vpop.trf.xlu0  ;;  %v2507_v44 = vsub.f32 -1e+30, %v2488_v23 }
 0x718   : > { %2683 = vmax.xlane.f32.xlu1 %v5264_v36  ;;  %3626 = vpow2.f32 %v2513_v27 }
 0x719   : > { %v5267_v5 = vpop.eup %3620  ;;  %3628 = vpow2.f32 %v2515_v32  ;;  %v2535_v22 = vmul.f32 1.442695, %v2507_v44 }
 0x71a   : > { %2561 = vadd.xlane.f32.xlu0 %v5267_v5  ;;  %v2490_v37 = vpop.xlane.xlu1 %2489  ;;  %3630 = vpow2.f32 %v2517_v13  ;;  %v5274_v21 = vpop.eup %3622 }
 0x71b   : > { %v2508_v7 = vsub.f32 -1e+30, %v2490_v37  ;;  %v5270_v58 = vpop.trf.xlu0 }
 0x71c   : > { %2685 = vmax.xlane.f32.xlu1 %v5270_v58 }
 0x71d   : > { %v2537_v60 = vmul.f32 1.442695, %v2508_v7 }
 0x71e   : > { %v2492_v56 = vpop.xlane.xlu1 %2491 }
 0x71f   : > { %3632 = vpow2.f32 %v2537_v60  ;;  %v2509_v18 = vsub.f32 -1e+30, %v2492_v56 }
 0x720   : > { %v3329_v41 = vpop.f32.mrb[20].mxu0  ;;  %2543 = vadd.xlane.f32.xlu1 %v5274_v21  ;;  %3634 = vpow2.f32 %v2519_v47 }
 0x721   : > { %v5277_v39 = vpop.eup %3624  ;;  %v2350_v11 = vpop.f32.mrb[21].mxu0  ;;  %3636 = vpow2.f32 %v2521_v1  ;;  %v2539_v29 = vmul.f32 1.442695, %v2509_v18 }
 0x722   : > { %v3330_v16 = vpop.f32.mrb[22].mxu0  ;;  %2565 = vadd.xlane.f32.xlu0 %v5277_v39  ;;  %v2494_v3 = vpop.xlane.xlu1 %2493 }
 0x723   : > { %v5280_v53 = vpop.eup %3626  ;;  %v2510_v28 = vsub.f32 -1e+30, %v2494_v3  ;;  %v2353_v49 = vpop.f32.mrb[23].mxu0 }
 0x724   : > { %2545 = vadd.xlane.f32.xlu1 %v5280_v53  ;;  %v5284_v61 = vpop.eup %3628 }
 0x725   : > { %v2541_v9 = vmul.f32 1.442695, %v2510_v28  ;;  %v5287_v12 = vpop.eup %3630 }
 0x727   : > { %3638 = vpow2.f32 %v2541_v9 }
 0x728   : > { %2547 = vadd.xlane.f32.xlu1 %v5284_v61  ;;  %3640 = vpow2.f32 %v2523_v33 }
 0x729   : > { %v5290_v57 = vpop.eup %3632  ;;  %3642 = vpow2.f32 %v2527_v30 }
 0x72a   : > { %2569 = vadd.xlane.f32.xlu0 %v5290_v57  ;;  %v5295_v43 = vpop.eup %3634  ;;  %3644 = vpow2.f32 %v2531_v46 }
 0x72b   : > { %v5297_v17 = vpop.eup %3636  ;;  %3646 = vpow2.f32 %v2535_v22 }
 0x72c   : > { %2549 = vadd.xlane.f32.xlu1 %v5287_v12  ;;  %3648 = vpow2.f32 %v2539_v29 }
 0x730   : > { %2551 = vadd.xlane.f32.xlu1 %v5295_v43 }
 0x731   : > { %v5300_v52 = vpop.eup %3638 }
 0x732   : > { %2573 = vadd.xlane.f32.xlu0 %v5300_v52  ;;  %v5304_v2 = vpop.eup %3640 }
 0x733   : > { %v5307_v50 = vpop.eup %3642 }
 0x734   : > { %2553 = vadd.xlane.f32.xlu1 %v5297_v17  ;;  %v5310_v4 = vpop.eup %3644 }
 0x735   : > { %v5313_v19 = vpop.eup %3646 }
 0x736   : > { %v5316_v24 = vpop.eup %3648 }
 0x738   : > { %2555 = vadd.xlane.f32.xlu1 %v5304_v2 }
 0x73c   : > { %2559 = vadd.xlane.f32.xlu1 %v5307_v50 }
 0x740   : > { %2563 = vadd.xlane.f32.xlu1 %v5310_v4 }
 0x744   : > { %2567 = vadd.xlane.f32.xlu1 %v5313_v19 }
 0x748   : > { %2571 = vadd.xlane.f32.xlu1 %v5316_v24 }
 0x76d   : > { %v2656_v38 = vpop.xlane.xlu1 %2655 }
 0x76e   : > { %v2687_v27 = vsub.f32 %v5209_v8, %v2656_v38 }
 0x770   : > { %v2703_v15 = vmul.f32 1.442695, %v2687_v27 }
 0x771   : > { %v2658_v10 = vpop.xlane.xlu1 %2657 }
 0x772   : > { %3650 = vpow2.f32 %v2703_v15  ;;  %v2688_v23 = vsub.f32 %v5212_v55, %v2658_v10 }
 0x774   : > { %v2705_v32 = vmul.f32 1.442695, %v2688_v23 }
 0x775   : > { %v2660_v13 = vpop.xlane.xlu1 %2659 }
 0x776   : > { %3652 = vpow2.f32 %v2705_v32  ;;  %v2689_v37 = vsub.f32 %v5215_v26, %v2660_v13 }
 0x778   : > { %v2707_v45 = vmul.f32 1.442695, %v2689_v37 }
 0x779   : > { %v2662_v7 = vpop.xlane.xlu1 %2661 }
 0x77a   : > { %3654 = vpow2.f32 %v2707_v45  ;;  %v2690_v60 = vsub.f32 %v5218_v31, %v2662_v7 }
 0x77c   : > { %v5323_v51 = vpop.eup %3650  ;;  %v2709_v56 = vmul.f32 1.442695, %v2690_v60 }
 0x77d   : > { %2735 = vadd.xlane.f32.xlu1 %v5323_v51  ;;  %v2664_v8 = vpop.xlane.xlu1 %2663 }
 0x77e   : > { %3656 = vpow2.f32 %v2709_v56  ;;  %v2691_v47 = vsub.f32 %v5221_v34, %v2664_v8 }
 0x780   : > { %v5327_v55 = vpop.eup %3652  ;;  %v2711_v41 = vmul.f32 1.442695, %v2691_v47 }
 0x781   : > { %2737 = vadd.xlane.f32.xlu0 %v5327_v55  ;;  %v2666_v26 = vpop.xlane.xlu1 %2665 }
 0x782   : > { %3658 = vpow2.f32 %v2711_v41  ;;  %v2692_v11 = vsub.f32 %v5224_v35, %v2666_v26 }
 0x784   : > { %v5331_v1 = vpop.eup %3654  ;;  %v2713_v31 = vmul.f32 1.442695, %v2692_v11 }
 0x785   : > { %2739 = vadd.xlane.f32.xlu1 %v5331_v1  ;;  %v2668_v16 = vpop.xlane.xlu1 %2667 }
 0x786   : > { %3660 = vpow2.f32 %v2713_v31  ;;  %v2693_v3 = vsub.f32 %v5227_v48, %v2668_v16 }
 0x788   : > { %v5335_v54 = vpop.eup %3656  ;;  %v2715_v34 = vmul.f32 1.442695, %v2693_v3 }
 0x789   : > { %2741 = vadd.xlane.f32.xlu0 %v5335_v54  ;;  %v2670_v28 = vpop.xlane.xlu1 %2669 }
 0x78a   : > { %3662 = vpow2.f32 %v2715_v34  ;;  %v2694_v49 = vsub.f32 %v5232_v59, %v2670_v28 }
 0x78c   : > { %v5339_v9 = vpop.eup %3658  ;;  %v2717_v35 = vmul.f32 1.442695, %v2694_v49 }
 0x78d   : > { %2743 = vadd.xlane.f32.xlu1 %v5339_v9  ;;  %v2672_v33 = vpop.xlane.xlu1 %2671 }
 0x78e   : > { %3664 = vpow2.f32 %v2717_v35  ;;  %v2695_v6 = vsub.f32 %v5237_v40, %v2672_v33 }
 0x790   : > { %v5343_v30 = vpop.eup %3660  ;;  %v2719_v48 = vmul.f32 1.442695, %v2695_v6 }
 0x791   : > { %2745 = vadd.xlane.f32.xlu0 %v5343_v30  ;;  %v2674_v62 = vpop.xlane.xlu1 %2673 }
 0x792   : > { %3666 = vpow2.f32 %v2719_v48  ;;  %v2696_v46 = vsub.f32 %v5240_v25, %v2674_v62 }
 0x794   : > { %v5347_v44 = vpop.eup %3662  ;;  %v2721_v59 = vmul.f32 1.442695, %v2696_v46 }
 0x795   : > { %2747 = vadd.xlane.f32.xlu1 %v5347_v44  ;;  %v2676_v22 = vpop.xlane.xlu1 %2675 }
 0x796   : > { %3668 = vpow2.f32 %v2721_v59  ;;  %v2697_v18 = vsub.f32 %v5245_v63, %v2676_v22 }
 0x798   : > { %v5351_v29 = vpop.eup %3664  ;;  %v2723_v40 = vmul.f32 1.442695, %v2697_v18 }
 0x799   : > { %v2678_v38 = vpop.xlane.xlu0 %2677  ;;  %2749 = vadd.xlane.f32.xlu0 %v5351_v29 }
 0x79a   : > { %3670 = vpow2.f32 %v2723_v40  ;;  %v2698_v27 = vsub.f32 %v5248_v0, %v2678_v38 }
 0x79c   : > { %v5355_v15 = vpop.eup %3666  ;;  %v2725_v25 = vmul.f32 1.442695, %v2698_v27 }
 0x79d   : > { %2751 = vadd.xlane.f32.xlu1 %v5355_v15  ;;  %v2680_v10 = vpop.xlane.xlu1 %2679 }
 0x79e   : > { %3672 = vpow2.f32 %v2725_v25  ;;  %v2699_v23 = vsub.f32 %v5254_v20, %v2680_v10 }
 0x79f   : > { %v2558_v32 = vpop.xlane.xlu0 %2557 }
 0x7a0   : > { %v5359_v63 = vpop.eup %3668  ;;  %v2727_v13 = vmul.f32 1.442695, %v2699_v23  ;;  %3674 = vrcp.f32 %v2558_v32 }
 0x7a1   : > { %2753 = vadd.xlane.f32.xlu0 %v5359_v63  ;;  %v2682_v37 = vpop.xlane.xlu1 %2681 }
 0x7a2   : > { %3676 = vpow2.f32 %v2727_v13  ;;  %v2700_v0 = vsub.f32 %v5261_v42, %v2682_v37  ;;  %v3333_v45 = vpop.f32.mrb[24].mxu0 }
 0x7a3   : > { %v2366_v7 = vpop.f32.mrb[25].mxu0 }
 0x7a4   : > { %v5363_v60 = vpop.eup %3670  ;;  %v2729_v56 = vmul.f32 1.442695, %v2700_v0  ;;  %v3334_v8 = vpop.f32.mrb[26].mxu0 }
 0x7a5   : > { %v2369_v47 = vpop.f32.mrb[27].mxu0  ;;  %2755 = vadd.xlane.f32.xlu1 %v5363_v60  ;;  %v2684_v20 = vpop.xlane.xlu1 %2683 }
 0x7a6   : > { %3678 = vpow2.f32 %v2729_v56  ;;  %v2701_v41 = vsub.f32 %v5264_v36, %v2684_v20 }
 0x7a7   : > { %v2562_v26 = vpop.xlane.xlu0 %2561 }
 0x7a8   : > { %v5368_v11 = vpop.eup %3672  ;;  %v2731_v31 = vmul.f32 1.442695, %v2701_v41  ;;  %3680 = vrcp.f32 %v2562_v26 }
 0x7a9   : > { %2757 = vadd.xlane.f32.xlu0 %v5368_v11  ;;  %v2686_v42 = vpop.xlane.xlu1 %2685 }
 0x7aa   : > { %v3675_v16 = vpop.eup %3674  ;;  %3682 = vpow2.f32 %v2731_v31  ;;  %v2702_v3 = vsub.f32 %v5270_v58, %v2686_v42 }
 0x7ab   : > { %v2598_v34 = vmul.f32 %v3675_v16, %v5257_v14 }
 0x7ac   : > { %v5373_v28 = vpop.eup %3676  ;;  %v2733_v49 = vmul.f32 1.442695, %v2702_v3 }
 0x7ad   : > { %2614 = vst [vmem:[%s5377_s3 + $0x38] sm:$0xff] %v2598_v34  ;;  %2759 = vadd.xlane.f32.xlu1 %v5373_v28  ;;  %v2544_v36 = vpop.xlane.xlu1 %2543 }
 0x7ae   : > { %3684 = vpow2.f32 %v2733_v49  ;;  %v3337_v35 = vpop.f32.mrb[28].mxu0 }
 0x7af   : > { %3686 = vrcp.f32 %v2544_v36  ;;  %v2382_v33 = vpop.f32.mrb[29].mxu0  ;;  %v2566_v6 = vpop.xlane.xlu0 %2565 }
 0x7b0   : > { %v5381_v58 = vpop.eup %3678  ;;  %3688 = vrcp.f32 %v2566_v6  ;;  %v3338_v14 = vpop.f32.mrb[30].mxu0 }
 0x7b1   : > { %v2385_v48 = vpop.f32.mrb[31].mxu0  ;;  %2761 = vadd.xlane.f32.xlu0 %v5381_v58  ;;  %v2546_v62 = vpop.xlane.xlu1 %2545 }
 0x7b2   : > { %v3681_v46 = vpop.eup %3680  ;;  %3690 = vrcp.f32 %v2546_v62 }
 0x7b3   : > { %v2600_v59 = vmul.f32 %v3681_v46, %v5267_v5 }
 0x7b4   : > { %v5385_v22 = vpop.eup %3682 }
 0x7b5   : > { %2616 = vst [vmem:[%s5377_s3 + $0x48] sm:$0xff] %v2600_v59  ;;  %2763 = vadd.xlane.f32.xlu1 %v5385_v22  ;;  %v2548_v18 = vpop.xlane.xlu1 %2547 }
 0x7b6   : > { %3692 = vrcp.f32 %v2548_v18 }
 0x7b7   : > { %v2570_v40 = vpop.xlane.xlu0 %2569 }
 0x7b8   : > { %v5389_v38 = vpop.eup %3684  ;;  %3694 = vrcp.f32 %v2570_v40 }
 0x7b9   : > { %v3687_v27 = vpop.eup %3686  ;;  %2765 = vadd.xlane.f32.xlu0 %v5389_v38  ;;  %v2550_v25 = vpop.xlane.xlu1 %2549 }
 0x7ba   : > { %v3689_v10 = vpop.eup %3688  ;;  %v2591_v5 = vmul.f32 %v3687_v27, %v5274_v21  ;;  %3696 = vrcp.f32 %v2550_v25 }
 0x7bb   : > { %v2602_v23 = vmul.f32 %v3689_v10, %v5277_v39 }
 0x7bc   : > { %v3691_v32 = vpop.eup %3690  ;;  %2607 = vst [vmem:[%s5377_s3] sm:$0xff] %v2591_v5 }
 0x7bd   : > { %2618 = vst [vmem:[%s5377_s3 + $0x58] sm:$0xff] %v2602_v23  ;;  %v2592_v13 = vmul.f32 %v3691_v32, %v5280_v53  ;;  %v2552_v37 = vpop.xlane.xlu1 %2551 }
 0x7be   : > { %3698 = vrcp.f32 %v2552_v37 }
 0x7bf   : > { %2608 = vst [vmem:[%s5377_s3 + $0x8] sm:$0xff] %v2592_v13  ;;  %v2574_v0 = vpop.xlane.xlu0 %2573 }
 0x7c0   : > { %v3693_v45 = vpop.eup %3692  ;;  %3700 = vrcp.f32 %v2574_v0 }
 0x7c1   : > { %v2593_v7 = vmul.f32 %v3693_v45, %v5284_v61  ;;  %v2554_v21 = vpop.xlane.xlu1 %2553 }
 0x7c2   : > { %v3695_v56 = vpop.eup %3694  ;;  %3702 = vrcp.f32 %v2554_v21 }
 0x7c3   : > { %2609 = vst [vmem:[%s5377_s3 + $0x10] sm:$0xff] %v2593_v7  ;;  %v2604_v39 = vmul.f32 %v3695_v56, %v5290_v57 }
 0x7c4   : > { %v3697_v8 = vpop.eup %3696 }
 0x7c5   : > { %2620 = vst [vmem:[%s5377_s3 + $0x68] sm:$0xff] %v2604_v39  ;;  %v2594_v53 = vmul.f32 %v3697_v8, %v5287_v12  ;;  %v2556_v47 = vpop.xlane.xlu1 %2555 }
 0x7c6   : > { %3704 = vrcp.f32 %v2556_v47 }
 0x7c7   : > { %2610 = vst [vmem:[%s5377_s3 + $0x18] sm:$0xff] %v2594_v53 }
 0x7c8   : > { %v3699_v20 = vpop.eup %3698 }
 0x7c9   : > { %v2595_v41 = vmul.f32 %v3699_v20, %v5295_v43  ;;  %v2560_v61 = vpop.xlane.xlu1 %2559 }
 0x7ca   : > { %v3701_v26 = vpop.eup %3700  ;;  %3706 = vrcp.f32 %v2560_v61 }
 0x7cb   : > { %2611 = vst [vmem:[%s5377_s3 + $0x20] sm:$0xff] %v2595_v41  ;;  %v2606_v31 = vmul.f32 %v3701_v26, %v5300_v52 }
 0x7cc   : > { %v3703_v57 = vpop.eup %3702 }
 0x7cd   : > { %2622 = vst [vmem:[%s5377_s3 + $0x78] sm:$0xff] %v2606_v31  ;;  %v2596_v42 = vmul.f32 %v3703_v57, %v5297_v17  ;;  %v2564_v12 = vpop.xlane.xlu1 %2563 }
 0x7ce   : > { %3708 = vrcp.f32 %v2564_v12 }
 0x7cf   : > { %2612 = vst [vmem:[%s5377_s3 + $0x28] sm:$0xff] %v2596_v42 }
 0x7d0   : > { %v3705_v16 = vpop.eup %3704 }
 0x7d1   : > { %v2597_v43 = vmul.f32 %v3705_v16, %v5304_v2  ;;  %v2568_v3 = vpop.xlane.xlu1 %2567 }
 0x7d2   : > { %3710 = vrcp.f32 %v2568_v3 }
 0x7d3   : > { %2613 = vst [vmem:[%s5377_s3 + $0x30] sm:$0xff] %v2597_v43 }
 0x7d4   : > { %v3707_v52 = vpop.eup %3706 }
 0x7d5   : > { %v2599_v34 = vmul.f32 %v3707_v52, %v5307_v50  ;;  %v2572_v49 = vpop.xlane.xlu1 %2571 }
 0x7d6   : > { %3712 = vrcp.f32 %v2572_v49 }
 0x7d7   : > { %2615 = vst [vmem:[%s5377_s3 + $0x40] sm:$0xff] %v2599_v34 }
 0x7d8   : > { %v3709_v17 = vpop.eup %3708 }
 0x7d9   : > { %v2601_v36 = vmul.f32 %v3709_v17, %v5310_v4 }
 0x7db   : > { %2617 = vst [vmem:[%s5377_s3 + $0x50] sm:$0xff] %v2601_v36 }
 0x7dc   : > { %v3711_v35 = vpop.eup %3710 }
 0x7dd   : > { %v2603_v2 = vmul.f32 %v3711_v35, %v5313_v19 }
 0x7df   : > { %2619 = vst [vmem:[%s5377_s3 + $0x60] sm:$0xff] %v2603_v2 }
 0x7e0   : > { %v3713_v33 = vpop.eup %3712 }
 0x7e1   : > { %v2605_v50 = vmul.f32 %v3713_v33, %v5316_v24 }
 0x7e3   : > { %2621 = vst [vmem:[%s5377_s3 + $0x70] sm:$0xff] %v2605_v50 }
 0x7e4   : > { %3932 = shalt.err (!%p3929_p8)
}
 0x7e5   : > { %s3933_s27 = scalar_lea.hbm %s5425_s0, 2048  ;;  %s3937_s17 = scalar_lea.hbm %s5556_s7, 4096 }
 0x7e6   : > { %p3934_p11 = scmp.ne.s32.totalorder %s5425_s0, %s3933_s27  ;;  %p3938_p1 = scmp.lt.u32.totalorder %s5425_s0, %s5556_s7 }
 0x7e7   : > { %p3939_p2 = scmp.lt.u32.totalorder %s3937_s17, %s3933_s27  ;;  %p3941_p0 = scmp.lt.u32.totalorder %s3933_s27, %s5425_s0 }
 0x7e8   : > { %p3935_p7 = pnand %p3934_p11, %p4265_p10 }
 0x7e9   : > { %p3940_p13 = por %p3939_p2, %p3938_p1 }
 0x7ea   : > { %p3936_p12 = pneg %p3935_p7 }
 0x7eb   : > { %p3942_p4 = por %p3941_p0, %p3940_p13 }
 0x7ed   : > { %p3943_p6 = pnand %p3942_p4, %p3936_p12 }
 0x7ef   : > { %3946 = shalt.err (!%p3943_p6)
}
 0x7f0   : > { %s4046_s15 = smov 128   ;;  %s4047_s18 = smov 8  }
 0x7f1   : > { %3359 = dma.vmem_to_hbm [thread:$0]  (%p4265_p10), %s5427_s21, 2048, %s5425_s0, %s2816_s22, %s4046_s15, %s4046_s15, %s4047_s18  }
 0x7f2   : > { %s5461_s25 = scalar_lea.vmem [#allocation14], %s3036_s12  ;;  %s5499_s22 = scalar_lea.hbm %s5557_s8, %s3097_s10 }
 0x7f3   : > { %s2850_s12 = sshll.u32 %s5461_s25, 4  ;;  %s2821_s2 = scalar_lea.sflag [#allocation15], %s4360_s16  ;;  %s5501_s12 = int_to_ptr.vmem [resolvable:$true] %s2850_s12 }
 0x7f4   : > { %s3947_s19 = scalar_lea.vmem %s5501_s12, 2048  ;;  %s4048_s13 = smov [#allocation14]  }
 0x7f5   : > { %p3948_p3 = scmp.ne.s32.totalorder %s5501_s12, %s3947_s19  ;;  %s3951_s27 = sshll.u32 %s4048_s13, 4  ;;  %s3952_s27 = int_to_ptr.vmem [resolvable:$false] %s3951_s27 }
 0x7f6   : > { %s3953_s9 = scalar_lea.vmem %s3952_s27, 4096  ;;  %p3954_p8 = scmp.lt.s32.totalorder %s5501_s12, %s3952_s27 }
 0x7f7   : > { %p3949_p5 = pnand %p3948_p3, %p4265_p10  ;;  %p3955_p11 = scmp.lt.s32.totalorder %s3953_s9, %s3947_s19 }
 0x7f9   : > { %p3950_p9 = pneg %p3949_p5  ;;  %p3956_p7 = por %p3955_p11, %p3954_p8 }
 0x7fb   : > { %p3957_p12 = pnand %p3956_p7, %p3950_p9 }
 0x80a   : > { %v2736_v4 = vpop.xlane.xlu1 %2735 }
 0x80b   : > { %3714 = vrcp.f32 %v2736_v4 }
 0x80e   : > { %v2738_v19 = vpop.xlane.xlu0 %2737 }
 0x80f   : > { %3716 = vrcp.f32 %v2738_v19 }
 0x812   : > { %v2740_v24 = vpop.xlane.xlu1 %2739 }
 0x813   : > { %3718 = vrcp.f32 %v2740_v24 }
 0x815   : > { %v3715_v6 = vpop.eup %3714 }
 0x816   : > { %v2783_v14 = vmul.f32 %v3715_v6, %v5323_v51  ;;  %v2742_v48 = vpop.xlane.xlu0 %2741 }
 0x817   : > { %3720 = vrcp.f32 %v2742_v48 }
 0x818   : > { %2799 = vst [vmem:[%s5461_s25] sm:$0xff] %v2783_v14 }
 0x819   : > { %v3717_v62 = vpop.eup %3716 }
 0x81a   : > { %v2784_v46 = vmul.f32 %v3717_v62, %v5327_v55  ;;  %v2744_v59 = vpop.xlane.xlu1 %2743 }
 0x81b   : > { %3722 = vrcp.f32 %v2744_v59 }
 0x81c   : > { %2800 = vst [vmem:[%s5461_s25 + $0x8] sm:$0xff] %v2784_v46 }
 0x81d   : > { %v3719_v18 = vpop.eup %3718 }
 0x81e   : > { %v2785_v51 = vmul.f32 %v3719_v18, %v5331_v1  ;;  %v2746_v40 = vpop.xlane.xlu0 %2745 }
 0x81f   : > { %3724 = vrcp.f32 %v2746_v40 }
 0x820   : > { %2801 = vst [vmem:[%s5461_s25 + $0x10] sm:$0xff] %v2785_v51 }
 0x821   : > { %v3721_v27 = vpop.eup %3720 }
 0x822   : > { %v2786_v25 = vmul.f32 %v3721_v27, %v5335_v54  ;;  %v2748_v10 = vpop.xlane.xlu1 %2747 }
 0x823   : > { %3726 = vrcp.f32 %v2748_v10 }
 0x824   : > { %2802 = vst [vmem:[%s5461_s25 + $0x18] sm:$0xff] %v2786_v25 }
 0x825   : > { %v3723_v5 = vpop.eup %3722 }
 0x826   : > { %v2787_v55 = vmul.f32 %v3723_v5, %v5339_v9  ;;  %v2750_v23 = vpop.xlane.xlu0 %2749 }
 0x827   : > { %3728 = vrcp.f32 %v2750_v23 }
 0x828   : > { %2803 = vst [vmem:[%s5461_s25 + $0x20] sm:$0xff] %v2787_v55 }
 0x829   : > { %v3725_v32 = vpop.eup %3724 }
 0x82a   : > { %v2788_v1 = vmul.f32 %v3725_v32, %v5343_v30  ;;  %v2752_v13 = vpop.xlane.xlu1 %2751 }
 0x82b   : > { %3730 = vrcp.f32 %v2752_v13 }
 0x82c   : > { %2804 = vst [vmem:[%s5461_s25 + $0x28] sm:$0xff] %v2788_v1 }
 0x82d   : > { %v3727_v37 = vpop.eup %3726 }
 0x82e   : > { %v2789_v54 = vmul.f32 %v3727_v37, %v5347_v44  ;;  %v2754_v0 = vpop.xlane.xlu0 %2753 }
 0x82f   : > { %3732 = vrcp.f32 %v2754_v0 }
 0x830   : > { %2805 = vst [vmem:[%s5461_s25 + $0x30] sm:$0xff] %v2789_v54 }
 0x831   : > { %v3729_v45 = vpop.eup %3728 }
 0x832   : > { %v2790_v9 = vmul.f32 %v3729_v45, %v5351_v29  ;;  %v2756_v7 = vpop.xlane.xlu1 %2755 }
 0x833   : > { %3734 = vrcp.f32 %v2756_v7 }
 0x834   : > { %2806 = vst [vmem:[%s5461_s25 + $0x38] sm:$0xff] %v2790_v9 }
 0x835   : > { %v3731_v21 = vpop.eup %3730 }
 0x836   : > { %v2791_v30 = vmul.f32 %v3731_v21, %v5355_v15  ;;  %v2758_v56 = vpop.xlane.xlu0 %2757 }
 0x837   : > { %3736 = vrcp.f32 %v2758_v56 }
 0x838   : > { %2807 = vst [vmem:[%s5461_s25 + $0x40] sm:$0xff] %v2791_v30 }
 0x839   : > { %v3733_v39 = vpop.eup %3732 }
 0x83a   : > { %v2792_v44 = vmul.f32 %v3733_v39, %v5359_v63  ;;  %v2760_v8 = vpop.xlane.xlu1 %2759 }
 0x83b   : > { %3738 = vrcp.f32 %v2760_v8 }
 0x83c   : > { %2808 = vst [vmem:[%s5461_s25 + $0x48] sm:$0xff] %v2792_v44 }
 0x83d   : > { %v3735_v53 = vpop.eup %3734 }
 0x83e   : > { %v2793_v29 = vmul.f32 %v3735_v53, %v5363_v60  ;;  %v2762_v47 = vpop.xlane.xlu0 %2761 }
 0x83f   : > { %3740 = vrcp.f32 %v2762_v47 }
 0x840   : > { %2809 = vst [vmem:[%s5461_s25 + $0x50] sm:$0xff] %v2793_v29 }
 0x841   : > { %v3737_v15 = vpop.eup %3736 }
 0x842   : > { %v2794_v20 = vmul.f32 %v3737_v15, %v5368_v11  ;;  %v2764_v41 = vpop.xlane.xlu1 %2763 }
 0x843   : > { %3742 = vrcp.f32 %v2764_v41 }
 0x844   : > { %2810 = vst [vmem:[%s5461_s25 + $0x58] sm:$0xff] %v2794_v20 }
 0x845   : > { %v3739_v63 = vpop.eup %3738 }
 0x846   : > { %v2795_v61 = vmul.f32 %v3739_v63, %v5373_v28  ;;  %v2766_v26 = vpop.xlane.xlu0 %2765 }
 0x847   : > { %3744 = vrcp.f32 %v2766_v26 }
 0x848   : > { %2811 = vst [vmem:[%s5461_s25 + $0x60] sm:$0xff] %v2795_v61 }
 0x849   : > { %v3741_v60 = vpop.eup %3740 }
 0x84a   : > { %v2796_v31 = vmul.f32 %v3741_v60, %v5381_v58 }
 0x84c   : > { %2812 = vst [vmem:[%s5461_s25 + $0x68] sm:$0xff] %v2796_v31 }
 0x84d   : > { %v3743_v57 = vpop.eup %3742 }
 0x84e   : > { %v2797_v11 = vmul.f32 %v3743_v57, %v5385_v22 }
 0x850   : > { %2813 = vst [vmem:[%s5461_s25 + $0x70] sm:$0xff] %v2797_v11 }
 0x851   : > { %v3745_v42 = vpop.eup %3744 }
 0x852   : > { %v2798_v12 = vmul.f32 %v3745_v42, %v5389_v38 }
 0x854   : > { %2814 = vst [vmem:[%s5461_s25 + $0x78] sm:$0xff] %v2798_v12 }
 0x855   : > { %3960 = shalt.err (!%p3957_p12)
}
 0x856   : > { %s3961_s10 = scalar_lea.hbm %s5499_s22, 2048  ;;  %s3965_s17 = scalar_lea.hbm %s5557_s8, 4096 }
 0x857   : > { %p3962_p1 = scmp.ne.s32.totalorder %s5499_s22, %s3961_s10  ;;  %p3966_p0 = scmp.lt.u32.totalorder %s5499_s22, %s5557_s8 }
 0x858   : > { %p3967_p4 = scmp.lt.u32.totalorder %s3965_s17, %s3961_s10  ;;  %p3969_p3 = scmp.lt.u32.totalorder %s3961_s10, %s5499_s22 }
 0x859   : > { %p3963_p2 = pnand %p3962_p1, %p4265_p10 }
 0x85a   : > { %p3968_p6 = por %p3967_p4, %p3966_p0 }
 0x85b   : > { %p3964_p13 = pneg %p3963_p2 }
 0x85c   : > { %p3970_p5 = por %p3969_p3, %p3968_p6 }
 0x85e   : > { %p3971_p9 = pnand %p3970_p5, %p3964_p13 }
 0x860   : > { %3974 = shalt.err (!%p3971_p9)
}
 0x861   : > { %3360 = dma.vmem_to_hbm [thread:$0]  (%p4265_p10), %s5501_s12, 2048, %s5499_s22, %s2821_s2, %s4046_s15, %s4046_s15, %s4047_s18  }
 0x862 PF: > { %s5593_s25 = sld [smem:[#allocation23_spill]]  ;;  %s5594_s21 = sld [smem:[#allocation24_spill]] }
 0x863   : > { %p5596_p11 = scmp.ge.s32.totalorder %s4033_s30, 2 }
 0x868   : > { %s2865_s0 = sand.u32 1, %s5593_s25   ;;  %p5595_p8 = scmp.ne.s32.totalorder %s5594_s21, 0 }
 0x869   : > { %s2866_s19 = scalar_lea.sflag [#allocation4], %s2865_s0 }
 0x86a   : > { %p3384_p7 = pnand %p5596_p11, %p5595_p8 }
 0x86c   : > { %4012 = dma.done.wait (!%p3384_p7), %s2866_s19, 2048  }
 0x86d   : > { %4014 = vsyncadd (!%p3384_p7), %s2866_s19, 4294965248  ;;  %s2875_s23 = scalar_lea.sflag [#allocation15], %s2865_s0 }
 0x86e   : > { %4016 = dma.done.wait (!%p3384_p7), %s2875_s23, 2048  }
 0x86f   : > { %4018 = vsyncadd (!%p3384_p7), %s2875_s23, 4294965248  ;;  %p30_p10 = scmp.ge.s32.totalorder %s4255_s26, 4   ;;  %s5597_s27 = smov %s4025_s28 }
 0x870   : > { %s5598_s28 = smov %s4029_s29  ;;  %s5599_s29 = smov %s4271_s24 }
 0x871   : > { %s5600_s30 = smov %s4255_s26  ;;  %32 = sbr.rel (!%p30_p10) target bundleno = 15 (0xf), region = 139 }
 0x878   :  { %2880 = vsyncpa [#allocation3], 1 }
 0x879   :  { %2882 = vsyncpa [#allocation3 + $0x1], 1 }
 0x87a   :  { %2883 = vsyncpa [#allocation6], 1 }
 0x87b   :  { %2885 = vsyncpa [#allocation6 + $0x1], 1 }
 0x87c   :  { %2886 = vsyncpa [#allocation9], 1 }
 0x87d   :  { %2887 = vsyncpa [#allocation12], 1 }
 0x87e   :  { %2888 = vsyncpa [#allocation4], 1 }
 0x87f   :  { %2890 = vsyncpa [#allocation4 + $0x1], 1 }
 0x880   :  { %2891 = vsyncpa [#allocation15], 1 }
 0x881   :  { %2893 = vsyncpa [#allocation15 + $0x1], 1 }

</bundles_post_ra>
